<compile_context>
chip_gen: v5e
topology: v5e:2x2
jax: 0.10.0
libtpu: 0.0.40
codegen_flags: <defaults>
</compile_context>

<pallas_src>
import functools

import jax
import jax.numpy as jnp
from jax.experimental import pallas as pl
from jax.experimental.pallas import tpu as pltpu

# ----------------------------- model dimensions -----------------------------
IMG = 28                 # input spatial size (required by fc1 = 16*7*7 -> 10)
C1IN, C1OUT = 1, 8
P1 = IMG // 2            # 14 : pooled-1 spatial size
C2OUT = 16
P2 = P1 // 2             # 7  : pooled-2 spatial size
NCLS = 10
PITCH1 = IMG + 2         # 30 : per-image row pitch (incl. zero-pad rows), stage 1
PITCH2 = P1 + 2          # 16 : per-image row pitch, stage 2
LANES1 = IMG * C1OUT     # 224: conv1 output lanes, index = w*8  + c
LANES_P1 = P1 * C1OUT    # 112: pooled1 lanes,      index = j*8  + c
LANES2 = P1 * C2OUT      # 224: conv2 output lanes, index = w*16 + c
LANES_P2 = P2 * C2OUT    # 112: pooled2 lanes,      index = j*16 + c


# ------------------------------ fused kernel --------------------------------

def _cnn_fused_kernel(x_ref, r1_ref, b1_ref, s1_ref, t1_ref,
                      r2_ref, b2_ref, s2_ref, t2_ref, wfc_ref, bfc_ref,
                      o_ref, xp1_ref, xp2_ref, *, nb):
    f32 = jnp.float32
    rows1 = nb * PITCH1
    rows2 = nb * PITCH2

    # Stage-1 slab: image n occupies rows [n*PITCH1, (n+1)*PITCH1); the first
    # and last row of each block (and 2 trailing rows) stay zero == conv1's
    # H padding.
    xp1_ref[...] = jnp.zeros(xp1_ref.shape, f32)
    for n in range(nb):
        xp1_ref[n * PITCH1 + 1:n * PITCH1 + 1 + IMG, :] = x_ref[n]

    # conv1 + bias + ReLU: 3 shifted-row matmuls with structured weights.
    a1 = jnp.zeros((rows1, LANES1), f32)
    for kh in range(3):
        a1 = a1 + jnp.dot(xp1_ref[kh:kh + rows1, :], r1_ref[kh],
                          preferred_element_type=f32)
    a1 = jnp.maximum(a1 + b1_ref[...], 0.0)

    # 2x2 max-pool: pairwise lane max + 0/1 compaction matmul (W direction),
    # pairwise row max + 0/1 selection matmul (H direction) that also
    # re-spaces rows into conv2's zero-padded slab layout.
    pmw1 = jnp.maximum(a1[:, :LANES1 - C1OUT], a1[:, C1OUT:])
    z1 = jnp.dot(pmw1, s1_ref[...], preferred_element_type=f32)       # (rows1, 112)
    pmh1 = jnp.maximum(z1[:rows1 - 1, :], z1[1:rows1, :])             # (rows1-1, 112)
    xp2_ref[...] = jnp.zeros(xp2_ref.shape, f32)
    xp2_ref[0:rows2, :] = jnp.dot(t1_ref[...], pmh1,
                                  preferred_element_type=f32)         # (rows2, 112)

    # conv2 + bias + ReLU.
    a2 = jnp.zeros((rows2, LANES2), f32)
    for kh in range(3):
        a2 = a2 + jnp.dot(xp2_ref[kh:kh + rows2, :], r2_ref[kh],
                          preferred_element_type=f32)
    a2 = jnp.maximum(a2 + b2_ref[...], 0.0)

    # Second 2x2 max-pool (W part); the H part is folded into the fc1 step.
    pmw2 = jnp.maximum(a2[:, :LANES2 - C2OUT], a2[:, C2OUT:])
    z2 = jnp.dot(pmw2, s2_ref[...], preferred_element_type=f32)       # (rows2, 112)
    pmh2 = jnp.maximum(z2[:rows2 - 1, :], z2[1:rows2, :])             # (rows2-1, 112)

    # fc1: for each pooled row i, 0/1-select that row for every image in the
    # tile, then multiply by the matching slice of the reordered FC weight.
    logits = jnp.zeros((nb, NCLS), f32)
    for i in range(P2):
        p2_i = jnp.dot(t2_ref[i], pmh2, preferred_element_type=f32)   # (nb, 112)
        logits = logits + jnp.dot(p2_i, wfc_ref[i],
                                  preferred_element_type=f32)
    o_ref[...] = logits + bfc_ref[...]


# ----------------------- weight / helper-matrix prep ------------------------

def _conv_tap_matrices(w_oihw, width):
    """R[kh] of shape (width*Cin, width*Cout): with slab lane index w*Cin+ci,
    conv_row(h) = sum_kh padded_row(h+kh) @ R[kh]; output lane = w*Cout+co.
    'same' W padding is folded in (out-of-range kw entries are zero)."""
    cout, cin, kh_, kw_ = w_oihw.shape
    wt = jnp.transpose(w_oihw, (2, 3, 1, 0)).astype(jnp.float32)   # (kh, kw, ci, co)
    wi = jnp.arange(width)[:, None, None]
    wo = jnp.arange(width)[None, :, None]
    kw = jnp.arange(kw_)[None, None, :]
    onehot = (wi - wo + 1 == kw).astype(jnp.float32)               # (width, width, 3)
    r = jnp.einsum('awk,hkio->haiwo', onehot, wt)
    return r.reshape(kh_, width * cin, width * cout)


def _wpool_matrix(width, cout):
    """0/1 matrix (width*cout - cout, (width//2)*cout) compacting pairwise-max
    lanes to the pooled width (keeps lane 2j*cout + c for output j*cout + c)."""
    m = jnp.arange((width // 2) * cout)
    target = (m // cout) * (2 * cout) + (m % cout)
    lane = jnp.arange(width * cout - cout)[:, None]
    return (lane == target[None, :]).astype(jnp.float32)


def _hpool_respace_matrix(nb):
    """0/1 matrix (nb*PITCH2, nb*PITCH1 - 1): picks pairwise-max row
    n*PITCH1 + 2*i into row n*PITCH2 + 1 + i, leaving the first/last row of
    each per-image block zero (== conv2's H padding)."""
    r = jnp.arange(nb * PITCH2)[:, None]
    c = jnp.arange(nb * PITCH1 - 1)[None, :]
    n = r // PITCH2
    i = r % PITCH2 - 1
    valid = (r % PITCH2 >= 1) & (r % PITCH2 <= P1)
    return (valid & (c == n * PITCH1 + 2 * i)).astype(jnp.float32)


def _fc_select_matrices(nb):
    """0/1 tensor (P2, nb, nb*PITCH2 - 1): [i, n, n*PITCH2 + 2*i] = 1."""
    i = jnp.arange(P2)[:, None, None]
    n = jnp.arange(nb)[None, :, None]
    c = jnp.arange(nb * PITCH2 - 1)[None, None, :]
    return (c == n * PITCH2 + 2 * i).astype(jnp.float32)


def _fc_weight_matrix(wfc):
    """(P2, P2*C2OUT, NCLS): [i, j*16+c, k] = wfc[k, c*49 + i*7 + j], i.e. the
    torch Linear weight reordered so the NCHW reshape(N, -1) flatten is free."""
    w = wfc.reshape(NCLS, C2OUT, P2, P2).astype(jnp.float32)       # (k, c, i, j)
    return jnp.transpose(w, (2, 3, 1, 0)).reshape(P2, P2 * C2OUT, NCLS)


def prepare_params(params, batch_tile=8):
    """One-time reformat of torch-layout parameters into the small structured
    matrices consumed by the fused kernel (total < 0.7 MB)."""
    nb = int(batch_tile)
    return {
        "r1": _conv_tap_matrices(params["w1"], IMG),                      # (3, 28, 224)
        "b1": jnp.tile(params["b1"].astype(jnp.float32), IMG)[None, :],   # (1, 224)
        "s1": _wpool_matrix(IMG, C1OUT),                                  # (216, 112)
        "t1": _hpool_respace_matrix(nb),                                  # (nb*16, nb*30-1)
        "r2": _conv_tap_matrices(params["w2"], P1),                       # (3, 112, 224)
        "b2": jnp.tile(params["b2"].astype(jnp.float32), P1)[None, :],    # (1, 224)
        "s2": _wpool_matrix(P1, C2OUT),                                   # (208, 112)
        "t2": _fc_select_matrices(nb),                                    # (7, nb, nb*16-1)
        "wfc": _fc_weight_matrix(params["wfc"]),                          # (7, 112, 10)
        "bfc": params["bfc"].astype(jnp.float32)[None, :],                # (1, 10)
    }


# ------------------------------- forward ------------------------------------

@jax.jit
def cnn_forward(prep, x_nchw):
    """x: (N, 1, 28, 28) f32 -> logits (N, 10) f32."""
    n = x_nchw.shape[0]
    nb = prep["t1"].shape[0] // PITCH2                 # batch tile (static)
    x = x_nchw.reshape(n, IMG, IMG).astype(jnp.float32)
    n_pad = ((n + nb - 1) // nb) * nb
    if n_pad != n:
        x = jnp.pad(x, ((0, n_pad - n), (0, 0), (0, 0)))

    def full_spec(a):
        zeros = (0,) * a.ndim
        return pl.BlockSpec(a.shape, lambda i: zeros)  # resident, not re-DMA'd

    kernel = functools.partial(_cnn_fused_kernel, nb=nb)
    out = pl.pallas_call(
        kernel,
        out_shape=jax.ShapeDtypeStruct((n_pad, NCLS), jnp.float32),
        grid_spec=pltpu.PrefetchScalarGridSpec(
            num_scalar_prefetch=0,
            grid=(n_pad // nb,),
            in_specs=[
                pl.BlockSpec((nb, IMG, IMG), lambda i: (i, 0, 0)),
                full_spec(prep["r1"]), full_spec(prep["b1"]),
                full_spec(prep["s1"]), full_spec(prep["t1"]),
                full_spec(prep["r2"]), full_spec(prep["b2"]),
                full_spec(prep["s2"]), full_spec(prep["t2"]),
                full_spec(prep["wfc"]), full_spec(prep["bfc"]),
            ],
            out_specs=pl.BlockSpec((nb, NCLS), lambda i: (i, 0)),
            scratch_shapes=[
                pltpu.VMEM((nb * PITCH1 + 2, IMG), jnp.float32),       # stage-1 slab
                pltpu.VMEM((nb * PITCH2 + 2, LANES_P1), jnp.float32),  # stage-2 slab
            ],
        ),
        compiler_params=pltpu.CompilerParams(
            dimension_semantics=("parallel",)),
    )(x, prep["r1"], prep["b1"], prep["s1"], prep["t1"],
      prep["r2"], prep["b2"], prep["s2"], prep["t2"],
      prep["wfc"], prep["bfc"])
    return out[:n]


# ------------------------------ parameters ----------------------------------

def init_params(key):
    """Deterministic synthetic params, PyTorch-like uniform(+-1/sqrt(fan_in))."""
    ks = jax.random.split(key, 6)

    def u(k, shape, fan_in):
        bound = 1.0 / jnp.sqrt(float(fan_in))
        return jax.random.uniform(k, shape, jnp.float32, -bound, bound)

    return {
        "w1": u(ks[0], (C1OUT, C1IN, 3, 3), C1IN * 9),
        "b1": u(ks[1], (C1OUT,), C1IN * 9),
        "w2": u(ks[2], (C2OUT, C1OUT, 3, 3), C1OUT * 9),
        "b2": u(ks[3], (C2OUT,), C1OUT * 9),
        "wfc": u(ks[4], (NCLS, C2OUT * P2 * P2), C2OUT * P2 * P2),  # torch Linear (out, in)
        "bfc": u(ks[5], (NCLS,), C2OUT * P2 * P2),
    }


# ------------------------- pure-XLA reference check --------------------------

def cnn_reference(params, x_nchw):
    """Plain-JAX reference with the exact PyTorch forward semantics."""
    dn = ("NCHW", "OIHW", "NCHW")
    y = jax.lax.conv_general_dilated(x_nchw, params["w1"], (1, 1),
                                     ((1, 1), (1, 1)), dimension_numbers=dn)
    y = jax.nn.relu(y + params["b1"][None, :, None, None])
    y = jax.lax.reduce_window(y, -jnp.inf, jax.lax.max,
                              (1, 1, 2, 2), (1, 1, 2, 2), "VALID")
    y = jax.lax.conv_general_dilated(y, params["w2"], (1, 1),
                                     ((1, 1), (1, 1)), dimension_numbers=dn)
    y = jax.nn.relu(y + params["b2"][None, :, None, None])
    y = jax.lax.reduce_window(y, -jnp.inf, jax.lax.max,
                              (1, 1, 2, 2), (1, 1, 2, 2), "VALID")
    y = y.reshape(y.shape[0], -1)
    return y @ params["wfc"].T + params["bfc"][None, :]


# --------------------------------- main --------------------------------------

if __name__ == "__main__":
    key = jax.random.PRNGKey(0)
    k_param, k_x = jax.random.split(key)

    params = init_params(k_param)
    prep = prepare_params(params, batch_tile=8)

    # MNIST-sized input required by fc1 = Linear(16*7*7, 10): 28x28 spatial.
    x = jax.random.normal(k_x, (2, 1, 28, 28), dtype=jnp.float32)

    logits = cnn_forward(prep, x)
    logits = jax.block_until_ready(logits)

    assert logits.shape == (2, NCLS), logits.shape
    assert logits.dtype == jnp.float32

    # Cross-check the fused Pallas kernel against the pure-XLA reference.
    ref = jax.block_until_ready(cnn_reference(params, x))
    err = float(jnp.max(jnp.abs(logits - ref)))
    assert err < 3e-3, f"max |pallas - reference| = {err}"

    print("KERNEL_OK")
</pallas_src>

<mosaic_0001>
module attributes {stable_mosaic.version = 11 : i64} {
  func.func @_cnn_fused_kernel(%arg0: i32, %arg1: memref<8x28x28xf32, #tpu.memory_space<vmem>>, %arg2: memref<3x28x224xf32, #tpu.memory_space<vmem>>, %arg3: memref<1x224xf32, #tpu.memory_space<vmem>>, %arg4: memref<216x112xf32, #tpu.memory_space<vmem>>, %arg5: memref<128x239xf32, #tpu.memory_space<vmem>>, %arg6: memref<3x112x224xf32, #tpu.memory_space<vmem>>, %arg7: memref<1x224xf32, #tpu.memory_space<vmem>>, %arg8: memref<208x112xf32, #tpu.memory_space<vmem>>, %arg9: memref<7x8x127xf32, #tpu.memory_space<vmem>>, %arg10: memref<7x112x10xf32, #tpu.memory_space<vmem>>, %arg11: memref<1x10xf32, #tpu.memory_space<vmem>>, %arg12: memref<8x10xf32, #tpu.memory_space<vmem>>, %arg13: memref<242x28xf32, #tpu.memory_space<vmem>>, %arg14: memref<130x112xf32, #tpu.memory_space<vmem>>) attributes {dimension_semantics = [#tpu.dimension_semantics<parallel>], iteration_bounds = array<i64: 1>, scalar_prefetch = 0 : i64, scratch_operands = 2 : i64, tpu.core_type = #tpu.core_type<tc>, window_params = [{transform_indices = @transform_0, window_bounds = array<i64: 8, 28, 28>}, {pipeline_mode = #tpu.pipeline_mode<synchronous>, transform_indices = @transform_1, window_bounds = array<i64: 3, 28, 224>}, {pipeline_mode = #tpu.pipeline_mode<synchronous>, transform_indices = @transform_2, window_bounds = array<i64: 1, 224>}, {pipeline_mode = #tpu.pipeline_mode<synchronous>, transform_indices = @transform_3, window_bounds = array<i64: 216, 112>}, {pipeline_mode = #tpu.pipeline_mode<synchronous>, transform_indices = @transform_4, window_bounds = array<i64: 128, 239>}, {pipeline_mode = #tpu.pipeline_mode<synchronous>, transform_indices = @transform_5, window_bounds = array<i64: 3, 112, 224>}, {pipeline_mode = #tpu.pipeline_mode<synchronous>, transform_indices = @transform_6, window_bounds = array<i64: 1, 224>}, {pipeline_mode = #tpu.pipeline_mode<synchronous>, transform_indices = @transform_7, window_bounds = array<i64: 208, 112>}, {pipeline_mode = #tpu.pipeline_mode<synchronous>, transform_indices = @transform_8, window_bounds = array<i64: 7, 8, 127>}, {pipeline_mode = #tpu.pipeline_mode<synchronous>, transform_indices = @transform_9, window_bounds = array<i64: 7, 112, 10>}, {pipeline_mode = #tpu.pipeline_mode<synchronous>, transform_indices = @transform_10, window_bounds = array<i64: 1, 10>}, {transform_indices = @transform_11, window_bounds = array<i64: 8, 10>}]} {
    %cst = arith.constant 0.000000e+00 : f32
    %0 = vector.broadcast %cst : f32 to vector<242x28xf32>
    %c0 = arith.constant 0 : index
    %c0_0 = arith.constant 0 : index
    %1 = vector.load %arg13[%c0, %c0_0] : memref<242x28xf32, #tpu.memory_space<vmem>>, vector<242x28xf32>
    tpu.vector_store %arg13[%c0, %c0_0], %0 {strides = array<i32>} : memref<242x28xf32, #tpu.memory_space<vmem>>, vector<242x28xf32>,
    %c0_1 = arith.constant 0 : index
    %c0_2 = arith.constant 0 : index
    %c0_3 = arith.constant 0 : index
    %2 = vector.load %arg1[%c0_1, %c0_2, %c0_3] : memref<8x28x28xf32, #tpu.memory_space<vmem>>, vector<1x28x28xf32>
    %3 = vector.shape_cast %2 : vector<1x28x28xf32> to vector<28x28xf32>
    %c1 = arith.constant 1 : index
    %c0_4 = arith.constant 0 : index
    %4 = vector.load %arg13[%c1, %c0_4] : memref<242x28xf32, #tpu.memory_space<vmem>>, vector<28x28xf32>
    tpu.vector_store %arg13[%c1, %c0_4], %3 {strides = array<i32>} : memref<242x28xf32, #tpu.memory_space<vmem>>, vector<28x28xf32>,
    %c1_5 = arith.constant 1 : index
    %c0_6 = arith.constant 0 : index
    %c0_7 = arith.constant 0 : index
    %5 = vector.load %arg1[%c1_5, %c0_6, %c0_7] : memref<8x28x28xf32, #tpu.memory_space<vmem>>, vector<1x28x28xf32>
    %6 = vector.shape_cast %5 : vector<1x28x28xf32> to vector<28x28xf32>
    %c31 = arith.constant 31 : index
    %c0_8 = arith.constant 0 : index
    %7 = vector.load %arg13[%c31, %c0_8] : memref<242x28xf32, #tpu.memory_space<vmem>>, vector<28x28xf32>
    tpu.vector_store %arg13[%c31, %c0_8], %6 {strides = array<i32>} : memref<242x28xf32, #tpu.memory_space<vmem>>, vector<28x28xf32>,
    %c2 = arith.constant 2 : index
    %c0_9 = arith.constant 0 : index
    %c0_10 = arith.constant 0 : index
    %8 = vector.load %arg1[%c2, %c0_9, %c0_10] : memref<8x28x28xf32, #tpu.memory_space<vmem>>, vector<1x28x28xf32>
    %9 = vector.shape_cast %8 : vector<1x28x28xf32> to vector<28x28xf32>
    %c61 = arith.constant 61 : index
    %c0_11 = arith.constant 0 : index
    %10 = vector.load %arg13[%c61, %c0_11] : memref<242x28xf32, #tpu.memory_space<vmem>>, vector<28x28xf32>
    tpu.vector_store %arg13[%c61, %c0_11], %9 {strides = array<i32>} : memref<242x28xf32, #tpu.memory_space<vmem>>, vector<28x28xf32>,
    %c3 = arith.constant 3 : index
    %c0_12 = arith.constant 0 : index
    %c0_13 = arith.constant 0 : index
    %11 = vector.load %arg1[%c3, %c0_12, %c0_13] : memref<8x28x28xf32, #tpu.memory_space<vmem>>, vector<1x28x28xf32>
    %12 = vector.shape_cast %11 : vector<1x28x28xf32> to vector<28x28xf32>
    %c91 = arith.constant 91 : index
    %c0_14 = arith.constant 0 : index
    %13 = vector.load %arg13[%c91, %c0_14] : memref<242x28xf32, #tpu.memory_space<vmem>>, vector<28x28xf32>
    tpu.vector_store %arg13[%c91, %c0_14], %12 {strides = array<i32>} : memref<242x28xf32, #tpu.memory_space<vmem>>, vector<28x28xf32>,
    %c4 = arith.constant 4 : index
    %c0_15 = arith.constant 0 : index
    %c0_16 = arith.constant 0 : index
    %14 = vector.load %arg1[%c4, %c0_15, %c0_16] : memref<8x28x28xf32, #tpu.memory_space<vmem>>, vector<1x28x28xf32>
    %15 = vector.shape_cast %14 : vector<1x28x28xf32> to vector<28x28xf32>
    %c121 = arith.constant 121 : index
    %c0_17 = arith.constant 0 : index
    %16 = vector.load %arg13[%c121, %c0_17] : memref<242x28xf32, #tpu.memory_space<vmem>>, vector<28x28xf32>
    tpu.vector_store %arg13[%c121, %c0_17], %15 {strides = array<i32>} : memref<242x28xf32, #tpu.memory_space<vmem>>, vector<28x28xf32>,
    %c5 = arith.constant 5 : index
    %c0_18 = arith.constant 0 : index
    %c0_19 = arith.constant 0 : index
    %17 = vector.load %arg1[%c5, %c0_18, %c0_19] : memref<8x28x28xf32, #tpu.memory_space<vmem>>, vector<1x28x28xf32>
    %18 = vector.shape_cast %17 : vector<1x28x28xf32> to vector<28x28xf32>
    %c151 = arith.constant 151 : index
    %c0_20 = arith.constant 0 : index
    %19 = vector.load %arg13[%c151, %c0_20] : memref<242x28xf32, #tpu.memory_space<vmem>>, vector<28x28xf32>
    tpu.vector_store %arg13[%c151, %c0_20], %18 {strides = array<i32>} : memref<242x28xf32, #tpu.memory_space<vmem>>, vector<28x28xf32>,
    %c6 = arith.constant 6 : index
    %c0_21 = arith.constant 0 : index
    %c0_22 = arith.constant 0 : index
    %20 = vector.load %arg1[%c6, %c0_21, %c0_22] : memref<8x28x28xf32, #tpu.memory_space<vmem>>, vector<1x28x28xf32>
    %21 = vector.shape_cast %20 : vector<1x28x28xf32> to vector<28x28xf32>
    %c181 = arith.constant 181 : index
    %c0_23 = arith.constant 0 : index
    %22 = vector.load %arg13[%c181, %c0_23] : memref<242x28xf32, #tpu.memory_space<vmem>>, vector<28x28xf32>
    tpu.vector_store %arg13[%c181, %c0_23], %21 {strides = array<i32>} : memref<242x28xf32, #tpu.memory_space<vmem>>, vector<28x28xf32>,
    %c7 = arith.constant 7 : index
    %c0_24 = arith.constant 0 : index
    %c0_25 = arith.constant 0 : index
    %23 = vector.load %arg1[%c7, %c0_24, %c0_25] : memref<8x28x28xf32, #tpu.memory_space<vmem>>, vector<1x28x28xf32>
    %24 = vector.shape_cast %23 : vector<1x28x28xf32> to vector<28x28xf32>
    %c211 = arith.constant 211 : index
    %c0_26 = arith.constant 0 : index
    %25 = vector.load %arg13[%c211, %c0_26] : memref<242x28xf32, #tpu.memory_space<vmem>>, vector<28x28xf32>
    tpu.vector_store %arg13[%c211, %c0_26], %24 {strides = array<i32>} : memref<242x28xf32, #tpu.memory_space<vmem>>, vector<28x28xf32>,
    %cst_27 = arith.constant 0.000000e+00 : f32
    %26 = vector.broadcast %cst_27 : f32 to vector<240x224xf32>
    %c0_28 = arith.constant 0 : index
    %c0_29 = arith.constant 0 : index
    %27 = vector.load %arg13[%c0_28, %c0_29] : memref<242x28xf32, #tpu.memory_space<vmem>>, vector<240x28xf32>
    %c0_30 = arith.constant 0 : index
    %c0_31 = arith.constant 0 : index
    %c0_32 = arith.constant 0 : index
    %28 = vector.load %arg2[%c0_30, %c0_31, %c0_32] : memref<3x28x224xf32, #tpu.memory_space<vmem>>, vector<1x28x224xf32>
    %29 = vector.shape_cast %28 : vector<1x28x224xf32> to vector<28x224xf32>
    %cst_33 = arith.constant dense<0.000000e+00> : vector<240x224xf32>
    %30 = tpu.matmul %27, %29, %cst_33 {dimension_numbers = #tpu.dot_dimension_numbers<[1], [0], [0], [1], [0, 0, 1, 1], [], []>} : vector<240x28xf32>, vector<28x224xf32>, vector<240x224xf32> -> vector<240x224xf32>
    %31 = arith.addf %26, %30 : vector<240x224xf32>
    %c1_34 = arith.constant 1 : index
    %c0_35 = arith.constant 0 : index
    %32 = vector.load %arg13[%c1_34, %c0_35] : memref<242x28xf32, #tpu.memory_space<vmem>>, vector<240x28xf32>
    %c1_36 = arith.constant 1 : index
    %c0_37 = arith.constant 0 : index
    %c0_38 = arith.constant 0 : index
    %33 = vector.load %arg2[%c1_36, %c0_37, %c0_38] : memref<3x28x224xf32, #tpu.memory_space<vmem>>, vector<1x28x224xf32>
    %34 = vector.shape_cast %33 : vector<1x28x224xf32> to vector<28x224xf32>
    %cst_39 = arith.constant dense<0.000000e+00> : vector<240x224xf32>
    %35 = tpu.matmul %32, %34, %cst_39 {dimension_numbers = #tpu.dot_dimension_numbers<[1], [0], [0], [1], [0, 0, 1, 1], [], []>} : vector<240x28xf32>, vector<28x224xf32>, vector<240x224xf32> -> vector<240x224xf32>
    %36 = arith.addf %31, %35 : vector<240x224xf32>
    %c2_40 = arith.constant 2 : index
    %c0_41 = arith.constant 0 : index
    %37 = vector.load %arg13[%c2_40, %c0_41] : memref<242x28xf32, #tpu.memory_space<vmem>>, vector<240x28xf32>
    %c2_42 = arith.constant 2 : index
    %c0_43 = arith.constant 0 : index
    %c0_44 = arith.constant 0 : index
    %38 = vector.load %arg2[%c2_42, %c0_43, %c0_44] : memref<3x28x224xf32, #tpu.memory_space<vmem>>, vector<1x28x224xf32>
    %39 = vector.shape_cast %38 : vector<1x28x224xf32> to vector<28x224xf32>
    %cst_45 = arith.constant dense<0.000000e+00> : vector<240x224xf32>
    %40 = tpu.matmul %37, %39, %cst_45 {dimension_numbers = #tpu.dot_dimension_numbers<[1], [0], [0], [1], [0, 0, 1, 1], [], []>} : vector<240x28xf32>, vector<28x224xf32>, vector<240x224xf32> -> vector<240x224xf32>
    %41 = arith.addf %36, %40 : vector<240x224xf32>
    %c0_46 = arith.constant 0 : index
    %c0_47 = arith.constant 0 : index
    %42 = vector.load %arg3[%c0_46, %c0_47] : memref<1x224xf32, #tpu.memory_space<vmem>>, vector<1x224xf32>
    %43 = vector.broadcast %42 : vector<1x224xf32> to vector<240x224xf32>
    %44 = arith.addf %41, %43 : vector<240x224xf32>
    %cst_48 = arith.constant 0.000000e+00 : f32
    %45 = vector.broadcast %cst_48 : f32 to vector<240x224xf32>
    %46 = arith.maximumf %44, %45 : vector<240x224xf32>
    %47 = vector.extract_strided_slice %46 {offsets = [0, 0], sizes = [240, 216], strides = [1, 1]} : vector<240x224xf32> to vector<240x216xf32>
    %48 = vector.extract_strided_slice %46 {offsets = [0, 8], sizes = [240, 216], strides = [1, 1]} : vector<240x224xf32> to vector<240x216xf32>
    %49 = arith.maximumf %47, %48 : vector<240x216xf32>
    %c0_49 = arith.constant 0 : index
    %c0_50 = arith.constant 0 : index
    %50 = vector.load %arg4[%c0_49, %c0_50] : memref<216x112xf32, #tpu.memory_space<vmem>>, vector<216x112xf32>
    %cst_51 = arith.constant dense<0.000000e+00> : vector<240x112xf32>
    %51 = tpu.matmul %49, %50, %cst_51 {dimension_numbers = #tpu.dot_dimension_numbers<[1], [0], [0], [1], [0, 0, 1, 1], [], []>} : vector<240x216xf32>, vector<216x112xf32>, vector<240x112xf32> -> vector<240x112xf32>
    %52 = vector.extract_strided_slice %51 {offsets = [0, 0], sizes = [239, 112], strides = [1, 1]} : vector<240x112xf32> to vector<239x112xf32>
    %53 = vector.extract_strided_slice %51 {offsets = [1, 0], sizes = [239, 112], strides = [1, 1]} : vector<240x112xf32> to vector<239x112xf32>
    %54 = arith.maximumf %52, %53 : vector<239x112xf32>
    %cst_52 = arith.constant 0.000000e+00 : f32
    %55 = vector.broadcast %cst_52 : f32 to vector<130x112xf32>
    %c0_53 = arith.constant 0 : index
    %c0_54 = arith.constant 0 : index
    %56 = vector.load %arg14[%c0_53, %c0_54] : memref<130x112xf32, #tpu.memory_space<vmem>>, vector<130x112xf32>
    tpu.vector_store %arg14[%c0_53, %c0_54], %55 {strides = array<i32>} : memref<130x112xf32, #tpu.memory_space<vmem>>, vector<130x112xf32>,
    %c0_55 = arith.constant 0 : index
    %c0_56 = arith.constant 0 : index
    %57 = vector.load %arg5[%c0_55, %c0_56] : memref<128x239xf32, #tpu.memory_space<vmem>>, vector<128x239xf32>
    %cst_57 = arith.constant dense<0.000000e+00> : vector<128x112xf32>
    %58 = tpu.matmul %57, %54, %cst_57 {dimension_numbers = #tpu.dot_dimension_numbers<[1], [0], [0], [1], [0, 0, 1, 1], [], []>} : vector<128x239xf32>, vector<239x112xf32>, vector<128x112xf32> -> vector<128x112xf32>
    %c0_58 = arith.constant 0 : index
    %c0_59 = arith.constant 0 : index
    %59 = vector.load %arg14[%c0_58, %c0_59] : memref<130x112xf32, #tpu.memory_space<vmem>>, vector<128x112xf32>
    tpu.vector_store %arg14[%c0_58, %c0_59], %58 {strides = array<i32>} : memref<130x112xf32, #tpu.memory_space<vmem>>, vector<128x112xf32>,
    %cst_60 = arith.constant 0.000000e+00 : f32
    %60 = vector.broadcast %cst_60 : f32 to vector<128x224xf32>
    %c0_61 = arith.constant 0 : index
    %c0_62 = arith.constant 0 : index
    %61 = vector.load %arg14[%c0_61, %c0_62] : memref<130x112xf32, #tpu.memory_space<vmem>>, vector<128x112xf32>
    %c0_63 = arith.constant 0 : index
    %c0_64 = arith.constant 0 : index
    %c0_65 = arith.constant 0 : index
    %62 = vector.load %arg6[%c0_63, %c0_64, %c0_65] : memref<3x112x224xf32, #tpu.memory_space<vmem>>, vector<1x112x224xf32>
    %63 = vector.shape_cast %62 : vector<1x112x224xf32> to vector<112x224xf32>
    %cst_66 = arith.constant dense<0.000000e+00> : vector<128x224xf32>
    %64 = tpu.matmul %61, %63, %cst_66 {dimension_numbers = #tpu.dot_dimension_numbers<[1], [0], [0], [1], [0, 0, 1, 1], [], []>} : vector<128x112xf32>, vector<112x224xf32>, vector<128x224xf32> -> vector<128x224xf32>
    %65 = arith.addf %60, %64 : vector<128x224xf32>
    %c1_67 = arith.constant 1 : index
    %c0_68 = arith.constant 0 : index
    %66 = vector.load %arg14[%c1_67, %c0_68] : memref<130x112xf32, #tpu.memory_space<vmem>>, vector<128x112xf32>
    %c1_69 = arith.constant 1 : index
    %c0_70 = arith.constant 0 : index
    %c0_71 = arith.constant 0 : index
    %67 = vector.load %arg6[%c1_69, %c0_70, %c0_71] : memref<3x112x224xf32, #tpu.memory_space<vmem>>, vector<1x112x224xf32>
    %68 = vector.shape_cast %67 : vector<1x112x224xf32> to vector<112x224xf32>
    %cst_72 = arith.constant dense<0.000000e+00> : vector<128x224xf32>
    %69 = tpu.matmul %66, %68, %cst_72 {dimension_numbers = #tpu.dot_dimension_numbers<[1], [0], [0], [1], [0, 0, 1, 1], [], []>} : vector<128x112xf32>, vector<112x224xf32>, vector<128x224xf32> -> vector<128x224xf32>
    %70 = arith.addf %65, %69 : vector<128x224xf32>
    %c2_73 = arith.constant 2 : index
    %c0_74 = arith.constant 0 : index
    %71 = vector.load %arg14[%c2_73, %c0_74] : memref<130x112xf32, #tpu.memory_space<vmem>>, vector<128x112xf32>
    %c2_75 = arith.constant 2 : index
    %c0_76 = arith.constant 0 : index
    %c0_77 = arith.constant 0 : index
    %72 = vector.load %arg6[%c2_75, %c0_76, %c0_77] : memref<3x112x224xf32, #tpu.memory_space<vmem>>, vector<1x112x224xf32>
    %73 = vector.shape_cast %72 : vector<1x112x224xf32> to vector<112x224xf32>
    %cst_78 = arith.constant dense<0.000000e+00> : vector<128x224xf32>
    %74 = tpu.matmul %71, %73, %cst_78 {dimension_numbers = #tpu.dot_dimension_numbers<[1], [0], [0], [1], [0, 0, 1, 1], [], []>} : vector<128x112xf32>, vector<112x224xf32>, vector<128x224xf32> -> vector<128x224xf32>
    %75 = arith.addf %70, %74 : vector<128x224xf32>
    %c0_79 = arith.constant 0 : index
    %c0_80 = arith.constant 0 : index
    %76 = vector.load %arg7[%c0_79, %c0_80] : memref<1x224xf32, #tpu.memory_space<vmem>>, vector<1x224xf32>
    %77 = vector.broadcast %76 : vector<1x224xf32> to vector<128x224xf32>
    %78 = arith.addf %75, %77 : vector<128x224xf32>
    %cst_81 = arith.constant 0.000000e+00 : f32
    %79 = vector.broadcast %cst_81 : f32 to vector<128x224xf32>
    %80 = arith.maximumf %78, %79 : vector<128x224xf32>
    %81 = vector.extract_strided_slice %80 {offsets = [0, 0], sizes = [128, 208], strides = [1, 1]} : vector<128x224xf32> to vector<128x208xf32>
    %82 = vector.extract_strided_slice %80 {offsets = [0, 16], sizes = [128, 208], strides = [1, 1]} : vector<128x224xf32> to vector<128x208xf32>
    %83 = arith.maximumf %81, %82 : vector<128x208xf32>
    %c0_82 = arith.constant 0 : index
    %c0_83 = arith.constant 0 : index
    %84 = vector.load %arg8[%c0_82, %c0_83] : memref<208x112xf32, #tpu.memory_space<vmem>>, vector<208x112xf32>
    %cst_84 = arith.constant dense<0.000000e+00> : vector<128x112xf32>
    %85 = tpu.matmul %83, %84, %cst_84 {dimension_numbers = #tpu.dot_dimension_numbers<[1], [0], [0], [1], [0, 0, 1, 1], [], []>} : vector<128x208xf32>, vector<208x112xf32>, vector<128x112xf32> -> vector<128x112xf32>
    %86 = vector.extract_strided_slice %85 {offsets = [0, 0], sizes = [127, 112], strides = [1, 1]} : vector<128x112xf32> to vector<127x112xf32>
    %87 = vector.extract_strided_slice %85 {offsets = [1, 0], sizes = [127, 112], strides = [1, 1]} : vector<128x112xf32> to vector<127x112xf32>
    %88 = arith.maximumf %86, %87 : vector<127x112xf32>
    %cst_85 = arith.constant 0.000000e+00 : f32
    %89 = vector.broadcast %cst_85 : f32 to vector<8x10xf32>
    %c0_86 = arith.constant 0 : index
    %c0_87 = arith.constant 0 : index
    %c0_88 = arith.constant 0 : index
    %90 = vector.load %arg9[%c0_86, %c0_87, %c0_88] : memref<7x8x127xf32, #tpu.memory_space<vmem>>, vector<1x8x127xf32>
    %91 = vector.shape_cast %90 : vector<1x8x127xf32> to vector<8x127xf32>
    %cst_89 = arith.constant dense<0.000000e+00> : vector<8x112xf32>
    %92 = tpu.matmul %91, %88, %cst_89 {dimension_numbers = #tpu.dot_dimension_numbers<[1], [0], [0], [1], [0, 0, 1, 1], [], []>} : vector<8x127xf32>, vector<127x112xf32>, vector<8x112xf32> -> vector<8x112xf32>
    %c0_90 = arith.constant 0 : index
    %c0_91 = arith.constant 0 : index
    %c0_92 = arith.constant 0 : index
    %93 = vector.load %arg10[%c0_90, %c0_91, %c0_92] : memref<7x112x10xf32, #tpu.memory_space<vmem>>, vector<1x112x10xf32>
    %94 = vector.shape_cast %93 : vector<1x112x10xf32> to vector<112x10xf32>
    %cst_93 = arith.constant dense<0.000000e+00> : vector<8x10xf32>
    %95 = tpu.matmul %92, %94, %cst_93 {dimension_numbers = #tpu.dot_dimension_numbers<[1], [0], [0], [1], [0, 0, 1, 1], [], []>} : vector<8x112xf32>, vector<112x10xf32>, vector<8x10xf32> -> vector<8x10xf32>
    %96 = arith.addf %89, %95 : vector<8x10xf32>
    %c1_94 = arith.constant 1 : index
    %c0_95 = arith.constant 0 : index
    %c0_96 = arith.constant 0 : index
    %97 = vector.load %arg9[%c1_94, %c0_95, %c0_96] : memref<7x8x127xf32, #tpu.memory_space<vmem>>, vector<1x8x127xf32>
    %98 = vector.shape_cast %97 : vector<1x8x127xf32> to vector<8x127xf32>
    %cst_97 = arith.constant dense<0.000000e+00> : vector<8x112xf32>
    %99 = tpu.matmul %98, %88, %cst_97 {dimension_numbers = #tpu.dot_dimension_numbers<[1], [0], [0], [1], [0, 0, 1, 1], [], []>} : vector<8x127xf32>, vector<127x112xf32>, vector<8x112xf32> -> vector<8x112xf32>
    %c1_98 = arith.constant 1 : index
    %c0_99 = arith.constant 0 : index
    %c0_100 = arith.constant 0 : index
    %100 = vector.load %arg10[%c1_98, %c0_99, %c0_100] : memref<7x112x10xf32, #tpu.memory_space<vmem>>, vector<1x112x10xf32>
    %101 = vector.shape_cast %100 : vector<1x112x10xf32> to vector<112x10xf32>
    %cst_101 = arith.constant dense<0.000000e+00> : vector<8x10xf32>
    %102 = tpu.matmul %99, %101, %cst_101 {dimension_numbers = #tpu.dot_dimension_numbers<[1], [0], [0], [1], [0, 0, 1, 1], [], []>} : vector<8x112xf32>, vector<112x10xf32>, vector<8x10xf32> -> vector<8x10xf32>
    %103 = arith.addf %96, %102 : vector<8x10xf32>
    %c2_102 = arith.constant 2 : index
    %c0_103 = arith.constant 0 : index
    %c0_104 = arith.constant 0 : index
    %104 = vector.load %arg9[%c2_102, %c0_103, %c0_104] : memref<7x8x127xf32, #tpu.memory_space<vmem>>, vector<1x8x127xf32>
    %105 = vector.shape_cast %104 : vector<1x8x127xf32> to vector<8x127xf32>
    %cst_105 = arith.constant dense<0.000000e+00> : vector<8x112xf32>
    %106 = tpu.matmul %105, %88, %cst_105 {dimension_numbers = #tpu.dot_dimension_numbers<[1], [0], [0], [1], [0, 0, 1, 1], [], []>} : vector<8x127xf32>, vector<127x112xf32>, vector<8x112xf32> -> vector<8x112xf32>
    %c2_106 = arith.constant 2 : index
    %c0_107 = arith.constant 0 : index
    %c0_108 = arith.constant 0 : index
    %107 = vector.load %arg10[%c2_106, %c0_107, %c0_108] : memref<7x112x10xf32, #tpu.memory_space<vmem>>, vector<1x112x10xf32>
    %108 = vector.shape_cast %107 : vector<1x112x10xf32> to vector<112x10xf32>
    %cst_109 = arith.constant dense<0.000000e+00> : vector<8x10xf32>
    %109 = tpu.matmul %106, %108, %cst_109 {dimension_numbers = #tpu.dot_dimension_numbers<[1], [0], [0], [1], [0, 0, 1, 1], [], []>} : vector<8x112xf32>, vector<112x10xf32>, vector<8x10xf32> -> vector<8x10xf32>
    %110 = arith.addf %103, %109 : vector<8x10xf32>
    %c3_110 = arith.constant 3 : index
    %c0_111 = arith.constant 0 : index
    %c0_112 = arith.constant 0 : index
    %111 = vector.load %arg9[%c3_110, %c0_111, %c0_112] : memref<7x8x127xf32, #tpu.memory_space<vmem>>, vector<1x8x127xf32>
    %112 = vector.shape_cast %111 : vector<1x8x127xf32> to vector<8x127xf32>
    %cst_113 = arith.constant dense<0.000000e+00> : vector<8x112xf32>
    %113 = tpu.matmul %112, %88, %cst_113 {dimension_numbers = #tpu.dot_dimension_numbers<[1], [0], [0], [1], [0, 0, 1, 1], [], []>} : vector<8x127xf32>, vector<127x112xf32>, vector<8x112xf32> -> vector<8x112xf32>
    %c3_114 = arith.constant 3 : index
    %c0_115 = arith.constant 0 : index
    %c0_116 = arith.constant 0 : index
    %114 = vector.load %arg10[%c3_114, %c0_115, %c0_116] : memref<7x112x10xf32, #tpu.memory_space<vmem>>, vector<1x112x10xf32>
    %115 = vector.shape_cast %114 : vector<1x112x10xf32> to vector<112x10xf32>
    %cst_117 = arith.constant dense<0.000000e+00> : vector<8x10xf32>
    %116 = tpu.matmul %113, %115, %cst_117 {dimension_numbers = #tpu.dot_dimension_numbers<[1], [0], [0], [1], [0, 0, 1, 1], [], []>} : vector<8x112xf32>, vector<112x10xf32>, vector<8x10xf32> -> vector<8x10xf32>
    %117 = arith.addf %110, %116 : vector<8x10xf32>
    %c4_118 = arith.constant 4 : index
    %c0_119 = arith.constant 0 : index
    %c0_120 = arith.constant 0 : index
    %118 = vector.load %arg9[%c4_118, %c0_119, %c0_120] : memref<7x8x127xf32, #tpu.memory_space<vmem>>, vector<1x8x127xf32>
    %119 = vector.shape_cast %118 : vector<1x8x127xf32> to vector<8x127xf32>
    %cst_121 = arith.constant dense<0.000000e+00> : vector<8x112xf32>
    %120 = tpu.matmul %119, %88, %cst_121 {dimension_numbers = #tpu.dot_dimension_numbers<[1], [0], [0], [1], [0, 0, 1, 1], [], []>} : vector<8x127xf32>, vector<127x112xf32>, vector<8x112xf32> -> vector<8x112xf32>
    %c4_122 = arith.constant 4 : index
    %c0_123 = arith.constant 0 : index
    %c0_124 = arith.constant 0 : index
    %121 = vector.load %arg10[%c4_122, %c0_123, %c0_124] : memref<7x112x10xf32, #tpu.memory_space<vmem>>, vector<1x112x10xf32>
    %122 = vector.shape_cast %121 : vector<1x112x10xf32> to vector<112x10xf32>
    %cst_125 = arith.constant dense<0.000000e+00> : vector<8x10xf32>
    %123 = tpu.matmul %120, %122, %cst_125 {dimension_numbers = #tpu.dot_dimension_numbers<[1], [0], [0], [1], [0, 0, 1, 1], [], []>} : vector<8x112xf32>, vector<112x10xf32>, vector<8x10xf32> -> vector<8x10xf32>
    %124 = arith.addf %117, %123 : vector<8x10xf32>
    %c5_126 = arith.constant 5 : index
    %c0_127 = arith.constant 0 : index
    %c0_128 = arith.constant 0 : index
    %125 = vector.load %arg9[%c5_126, %c0_127, %c0_128] : memref<7x8x127xf32, #tpu.memory_space<vmem>>, vector<1x8x127xf32>
    %126 = vector.shape_cast %125 : vector<1x8x127xf32> to vector<8x127xf32>
    %cst_129 = arith.constant dense<0.000000e+00> : vector<8x112xf32>
    %127 = tpu.matmul %126, %88, %cst_129 {dimension_numbers = #tpu.dot_dimension_numbers<[1], [0], [0], [1], [0, 0, 1, 1], [], []>} : vector<8x127xf32>, vector<127x112xf32>, vector<8x112xf32> -> vector<8x112xf32>
    %c5_130 = arith.constant 5 : index
    %c0_131 = arith.constant 0 : index
    %c0_132 = arith.constant 0 : index
    %128 = vector.load %arg10[%c5_130, %c0_131, %c0_132] : memref<7x112x10xf32, #tpu.memory_space<vmem>>, vector<1x112x10xf32>
    %129 = vector.shape_cast %128 : vector<1x112x10xf32> to vector<112x10xf32>
    %cst_133 = arith.constant dense<0.000000e+00> : vector<8x10xf32>
    %130 = tpu.matmul %127, %129, %cst_133 {dimension_numbers = #tpu.dot_dimension_numbers<[1], [0], [0], [1], [0, 0, 1, 1], [], []>} : vector<8x112xf32>, vector<112x10xf32>, vector<8x10xf32> -> vector<8x10xf32>
    %131 = arith.addf %124, %130 : vector<8x10xf32>
    %c6_134 = arith.constant 6 : index
    %c0_135 = arith.constant 0 : index
    %c0_136 = arith.constant 0 : index
    %132 = vector.load %arg9[%c6_134, %c0_135, %c0_136] : memref<7x8x127xf32, #tpu.memory_space<vmem>>, vector<1x8x127xf32>
    %133 = vector.shape_cast %132 : vector<1x8x127xf32> to vector<8x127xf32>
    %cst_137 = arith.constant dense<0.000000e+00> : vector<8x112xf32>
    %134 = tpu.matmul %133, %88, %cst_137 {dimension_numbers = #tpu.dot_dimension_numbers<[1], [0], [0], [1], [0, 0, 1, 1], [], []>} : vector<8x127xf32>, vector<127x112xf32>, vector<8x112xf32> -> vector<8x112xf32>
    %c6_138 = arith.constant 6 : index
    %c0_139 = arith.constant 0 : index
    %c0_140 = arith.constant 0 : index
    %135 = vector.load %arg10[%c6_138, %c0_139, %c0_140] : memref<7x112x10xf32, #tpu.memory_space<vmem>>, vector<1x112x10xf32>
    %136 = vector.shape_cast %135 : vector<1x112x10xf32> to vector<112x10xf32>
    %cst_141 = arith.constant dense<0.000000e+00> : vector<8x10xf32>
    %137 = tpu.matmul %134, %136, %cst_141 {dimension_numbers = #tpu.dot_dimension_numbers<[1], [0], [0], [1], [0, 0, 1, 1], [], []>} : vector<8x112xf32>, vector<112x10xf32>, vector<8x10xf32> -> vector<8x10xf32>
    %138 = arith.addf %131, %137 : vector<8x10xf32>
    %c0_142 = arith.constant 0 : index
    %c0_143 = arith.constant 0 : index
    %139 = vector.load %arg11[%c0_142, %c0_143] : memref<1x10xf32, #tpu.memory_space<vmem>>, vector<1x10xf32>
    %140 = vector.broadcast %139 : vector<1x10xf32> to vector<8x10xf32>
    %141 = arith.addf %138, %140 : vector<8x10xf32>
    %c0_144 = arith.constant 0 : index
    %c0_145 = arith.constant 0 : index
    %142 = vector.load %arg12[%c0_144, %c0_145] : memref<8x10xf32, #tpu.memory_space<vmem>>, vector<8x10xf32>
    tpu.vector_store %arg12[%c0_144, %c0_145], %141 {strides = array<i32>} : memref<8x10xf32, #tpu.memory_space<vmem>>, vector<8x10xf32>,
    return
  }
  func.func @transform_0(%arg0: i32) -> (i32, i32, i32) {
    %c0_i32 = arith.constant 0 : i32
    %c0_i32_0 = arith.constant 0 : i32
    %c0_i32_1 = arith.constant 0 : i32
    return %arg0, %c0_i32, %c0_i32_0 : i32, i32, i32
  }
  func.func @transform_1(%arg0: i32) -> (i32, i32, i32) {
    %c0_i32 = arith.constant 0 : i32
    %c0_i32_0 = arith.constant 0 : i32
    %c0_i32_1 = arith.constant 0 : i32
    %c0_i32_2 = arith.constant 0 : i32
    return %c0_i32, %c0_i32_0, %c0_i32_1 : i32, i32, i32
  }
  func.func @transform_2(%arg0: i32) -> (i32, i32) {
    %c0_i32 = arith.constant 0 : i32
    %c0_i32_0 = arith.constant 0 : i32
    %c0_i32_1 = arith.constant 0 : i32
    return %c0_i32, %c0_i32_0 : i32, i32
  }
  func.func @transform_3(%arg0: i32) -> (i32, i32) {
    %c0_i32 = arith.constant 0 : i32
    %c0_i32_0 = arith.constant 0 : i32
    %c0_i32_1 = arith.constant 0 : i32
    return %c0_i32, %c0_i32_0 : i32, i32
  }
  func.func @transform_4(%arg0: i32) -> (i32, i32) {
    %c0_i32 = arith.constant 0 : i32
    %c0_i32_0 = arith.constant 0 : i32
    %c0_i32_1 = arith.constant 0 : i32
    return %c0_i32, %c0_i32_0 : i32, i32
  }
  func.func @transform_5(%arg0: i32) -> (i32, i32, i32) {
    %c0_i32 = arith.constant 0 : i32
    %c0_i32_0 = arith.constant 0 : i32
    %c0_i32_1 = arith.constant 0 : i32
    %c0_i32_2 = arith.constant 0 : i32
    return %c0_i32, %c0_i32_0, %c0_i32_1 : i32, i32, i32
  }
  func.func @transform_6(%arg0: i32) -> (i32, i32) {
    %c0_i32 = arith.constant 0 : i32
    %c0_i32_0 = arith.constant 0 : i32
    %c0_i32_1 = arith.constant 0 : i32
    return %c0_i32, %c0_i32_0 : i32, i32
  }
  func.func @transform_7(%arg0: i32) -> (i32, i32) {
    %c0_i32 = arith.constant 0 : i32
    %c0_i32_0 = arith.constant 0 : i32
    %c0_i32_1 = arith.constant 0 : i32
    return %c0_i32, %c0_i32_0 : i32, i32
  }
  func.func @transform_8(%arg0: i32) -> (i32, i32, i32) {
    %c0_i32 = arith.constant 0 : i32
    %c0_i32_0 = arith.constant 0 : i32
    %c0_i32_1 = arith.constant 0 : i32
    %c0_i32_2 = arith.constant 0 : i32
    return %c0_i32, %c0_i32_0, %c0_i32_1 : i32, i32, i32
  }
  func.func @transform_9(%arg0: i32) -> (i32, i32, i32) {
    %c0_i32 = arith.constant 0 : i32
    %c0_i32_0 = arith.constant 0 : i32
    %c0_i32_1 = arith.constant 0 : i32
    %c0_i32_2 = arith.constant 0 : i32
    return %c0_i32, %c0_i32_0, %c0_i32_1 : i32, i32, i32
  }
  func.func @transform_10(%arg0: i32) -> (i32, i32) {
    %c0_i32 = arith.constant 0 : i32
    %c0_i32_0 = arith.constant 0 : i32
    %c0_i32_1 = arith.constant 0 : i32
    return %c0_i32, %c0_i32_0 : i32, i32
  }
  func.func @transform_11(%arg0: i32) -> (i32, i32) {
    %c0_i32 = arith.constant 0 : i32
    %c0_i32_0 = arith.constant 0 : i32
    return %arg0, %c0_i32 : i32, i32
  }
}

</mosaic_0001>

<bundles_post_ra>
// kernel: cnn_forward.1
= control target key start
LH: loop header
LB: loop body
LE: loop exit
PB: predicated region body
PF: predicated region fallthrough
CT: control target
= control target key end

     0   :  { %vm310_vm0 = vcmask 1043456   ;;  %vm38_vm1 = vcmask 228352   ;;  %v7816_v3 = vmov 0.0   ;;  %vm78_vm2 = vcmask 224256   ;;  %s7804_s1 = inlined_call_operand.vmem [shape: f32[3,28,224], index: 1, kind: input, shape index: {}]   ;;  %s7805_s0 = inlined_call_operand.vmem [shape: f32[8,28,28], index: 0, kind: input, shape index: {}]   ;;  %s7806_s2 = inlined_call_operand.vmem [shape: f32[1,224], index: 2, kind: input, shape index: {}]   ;;  %s7807_s3 = inlined_call_operand.vmem [shape: f32[216,112], index: 3, kind: input, shape index: {}]   ;;  %s7808_s4 = inlined_call_operand.vmem [shape: f32[128,239], index: 4, kind: input, shape index: {}]   ;;  %s7809_s5 = inlined_call_operand.vmem [shape: f32[3,112,224], index: 5, kind: input, shape index: {}]   ;;  %s7810_s6 = inlined_call_operand.vmem [shape: f32[1,224], index: 6, kind: input, shape index: {}]   ;;  %s7811_s7 = inlined_call_operand.vmem [shape: f32[208,112], index: 7, kind: input, shape index: {}]   ;;  %s7812_s8 = inlined_call_operand.vmem [shape: f32[7,8,127], index: 8, kind: input, shape index: {}]   ;;  %s7813_s9 = inlined_call_operand.vmem [shape: f32[7,112,10], index: 9, kind: input, shape index: {}]   ;;  %s7814_s10 = inlined_call_operand.vmem [shape: f32[1,10], index: 10, kind: input, shape index: {}]   ;;  %s7815_s11 = inlined_call_operand.vmem [shape: f32[8,10], index: 11, kind: output, shape index: {}]  }
   0x1   :  { %v4161_v0 = vld [vmem:[%s7804_s1 + $0x70] sm:$0xf]  ;;  %v4162_v1 = vld [vmem:[%s7804_s1 + $0x78] sm:$0xf]  ;;  %v4159_v2 = vld [vmem:[%s7804_s1 + $0x60] sm:$0xff]  ;;  %39 = vst.msk [vmem:[#allocation2] sm:$0xff] %vm38_vm1, %v7816_v3 }
   0x2   :  { %4163 = vmatpush.msk.msra.mxu0 %vm310_vm0, %v4161_v0  ;;  %4194 = vmatpush.msk.msra.mxu1 %vm310_vm0, %v4162_v1  ;;  %v4160_v4 = vld [vmem:[%s7804_s1 + $0x68] sm:$0xff]  ;;  %v179_v5 = vld [vmem:[%s7804_s1 + $0x30] sm:$0xf]  ;;  %40 = vst.msk [vmem:[#allocation2 + $0x8] sm:$0xff] %vm38_vm1, %v7816_v3  ;;  %v4158_v7 = vld [vmem:[%s7804_s1 + $0x58] sm:$0xff]  ;;  %vm69_vm3 = vcmask 222208  }
   0x3   :  { %4683 = vmatpush.msk.msra.mxu2 %vm310_vm0, %v179_v5  ;;  %v4157_v6 = vld [vmem:[%s7804_s1 + $0x50] sm:$0xff]  ;;  %v177_v8 = vld [vmem:[%s7804_s1 + $0x20] sm:$0xff]  ;;  %41 = vst.msk [vmem:[#allocation2 + $0x10] sm:$0xff] %vm38_vm1, %v7816_v3  ;;  %v4156_v12 = vld [vmem:[%s7804_s1 + $0x48] sm:$0xff]  ;;  %vm1556_vm4 = vcmask 982016   ;;  %vm1734_vm5 = vcmask 719872  }
   0x4   :  { %330 = vmatpush.msra.mxu0 %v4159_v2  ;;  %437 = vmatpush.msra.mxu1 %v4160_v4  ;;  %v175_v9 = vld [vmem:[%s7804_s1 + $0x10] sm:$0xff]  ;;  %v71_v10 = vld [vmem:[%s7805_s0] sm:$0xff]  ;;  %42 = vst.msk [vmem:[#allocation2 + $0x18] sm:$0xff] %vm38_vm1, %v7816_v3  ;;  %v180_v14 = vld [vmem:[%s7804_s1 + $0x38] sm:$0xf]  ;;  %vm2069_vm6 = vcmask 1046528  }
   0x5   :  { %4684 = vmatpush.msra.mxu2 %v177_v8  ;;  %v4155_v11 = vld [vmem:[%s7804_s1 + $0x40] sm:$0xff]  ;;  %75 = vst.msk [vmem:[#allocation2 + $0x1] sm:$0xff] %vm38_vm1, %v71_v10  ;;  %v178_v15 = vld [vmem:[%s7804_s1 + $0x28] sm:$0xff]  ;;  %4687 = vmatpush.msk.msra.mxu3 %vm310_vm0, %v180_v14  ;;  %v176_v16 = vld [vmem:[%s7804_s1 + $0x18] sm:$0xff]  ;;  %vm2240_vm7 = vcmask 908288   ;;  %vm2189_vm8 = vcmask 916480  }
   0x6   :  { %331 = vmatpush.msra.mxu0 %v4157_v6  ;;  %438 = vmatpush.msra.mxu1 %v4158_v7  ;;  %43 = vst.msk [vmem:[#allocation2 + $0x20] sm:$0xff] %vm38_vm1, %v7816_v3  ;;  %v173_v13 = vld [vmem:[%s7804_s1] sm:$0xff]  ;;  %v174_v18 = vld [vmem:[%s7804_s1 + $0x8] sm:$0xff]  ;;  %v73_v20 = vld [vmem:[%s7805_s0 + $0x10] sm:$0xff]  ;;  %vm2206_vm9 = vcmask 910336   ;;  %vm3410_vm10 = vcmask 654336  }
   0x7   :  { %4685 = vmatpush.msra.mxu2 %v175_v9  ;;  %44 = vst.msk [vmem:[#allocation2 + $0x28] sm:$0xff] %vm38_vm1, %v7816_v3  ;;  %4688 = vmatpush.msra.mxu3 %v178_v15  ;;  %v72_v19 = vld [vmem:[%s7805_s0 + $0x8] sm:$0xff]  ;;  %v74_v21 = vld [vmem:[%s7805_s0 + $0x18] sm:$0xf]  ;;  %v4127_v22 = vld [vmem:[%s7805_s0 + $0x20] sm:$0xff]  ;;  %vm3669_vm11 = vcmask 1039360  }
   0x8   :  { %332 = vmatpush.msra.mxu0 %v4155_v11  ;;  %439 = vmatpush.msra.mxu1 %v4156_v12  ;;  %45 = vst.msk [vmem:[#allocation2 + $0x30] sm:$0xff] %vm38_vm1, %v7816_v3  ;;  %v4128_v23 = vld [vmem:[%s7805_s0 + $0x28] sm:$0xff]  ;;  %v4129_v24 = vld [vmem:[%s7805_s0 + $0x30] sm:$0xff]  ;;  %v4130_v27 = vld [vmem:[%s7805_s0 + $0x38] sm:$0xf]  ;;  %vm4121_vm12 = vcmask 80896  }
   0x9   :  { %46 = vst.msk [vmem:[#allocation2 + $0x38] sm:$0xff] %vm38_vm1, %v7816_v3  ;;  %4686 = vmatpush.msra.mxu2 %v173_v13  ;;  %4689 = vmatpush.msra.mxu3 %v176_v16  ;;  %v4131_v30 = vld [vmem:[%s7805_s0 + $0x40] sm:$0xff]  ;;  %v4132_v33 = vld [vmem:[%s7805_s0 + $0x48] sm:$0xff]  ;;  %v4133_v36 = vld [vmem:[%s7805_s0 + $0x50] sm:$0xff] }
   0xa   :  { %47 = vst.msk [vmem:[#allocation2 + $0x40] sm:$0xff] %vm38_vm1, %v7816_v3  ;;  %4225 = vmatpush.msk.msrb.mxu0 %vm310_vm0, %v179_v5  ;;  %4256 = vmatpush.msk.msrb.mxu1 %vm310_vm0, %v180_v14  ;;  %v4134_v39 = vld [vmem:[%s7805_s0 + $0x58] sm:$0xf]  ;;  %v4135_v42 = vld [vmem:[%s7805_s0 + $0x60] sm:$0xff]  ;;  %v4136_v45 = vld [vmem:[%s7805_s0 + $0x68] sm:$0xff] }
   0xb   :  { %48 = vst.msk [vmem:[#allocation2 + $0x48] sm:$0xff] %vm38_vm1, %v7816_v3  ;;  %4690 = vmatpush.msra.mxu3 %v174_v18  ;;  %v4137_v48 = vld [vmem:[%s7805_s0 + $0x70] sm:$0xff]  ;;  %v4138_v51 = vld [vmem:[%s7805_s0 + $0x78] sm:$0xf]  ;;  %v4139_v54 = vld [vmem:[%s7805_s0 + $0x80] sm:$0xff] }
   0xc   :  { %v181_v17 = vld [vmem:[#allocation2 + $0x1] sm:$0xff]  ;;  %49 = vst.msk [vmem:[#allocation2 + $0x50] sm:$0xff] %vm38_vm1, %v7816_v3  ;;  %640 = vmatpush.msrb.mxu0 %v177_v8  ;;  %747 = vmatpush.msrb.mxu1 %v178_v15  ;;  %v4141_v60 = vld [vmem:[%s7805_s0 + $0x90] sm:$0xff]  ;;  %v4142_v63 = vld [vmem:[%s7805_s0 + $0x98] sm:$0xf] }
   0xd   :  { %4164 = vmatmul.msk.f32.vlgmr.msra.gmra.mxu0 %vm38_vm1, %v181_v17  ;;  %50 = vst.msk [vmem:[#allocation2 + $0x58] sm:$0xff] %vm38_vm1, %v7816_v3  ;;  %4195 = vmatmul.msk.f32.vlgmr.msra.gmra.mxu1 %vm38_vm1, %v181_v17  ;;  %v4140_v57 = vld [vmem:[%s7805_s0 + $0x88] sm:$0xff]  ;;  %v4143_v0 = vld [vmem:[%s7805_s0 + $0xa0] sm:$0xff]  ;;  %v4145_v7 = vld [vmem:[%s7805_s0 + $0xb0] sm:$0xff] }
   0xe   :  { %51 = vst.msk [vmem:[#allocation2 + $0x60] sm:$0xff] %vm38_vm1, %v7816_v3  ;;  %641 = vmatpush.msrb.mxu0 %v175_v9  ;;  %748 = vmatpush.msrb.mxu1 %v176_v16  ;;  %v4144_v4 = vld [vmem:[%s7805_s0 + $0xa8] sm:$0xff]  ;;  %v4146_v12 = vld [vmem:[%s7805_s0 + $0xb8] sm:$0xf]  ;;  %v4147_v17 = vld [vmem:[%s7805_s0 + $0xc0] sm:$0xff] }
   0xf   :  { %52 = vst.msk [vmem:[#allocation2 + $0x68] sm:$0xff] %vm38_vm1, %v7816_v3 }
  0x10   :  { %53 = vst.msk [vmem:[#allocation2 + $0x70] sm:$0xff] %vm38_vm1, %v7816_v3  ;;  %642 = vmatpush.msrb.mxu0 %v173_v13  ;;  %749 = vmatpush.msrb.mxu1 %v174_v18 }
  0x11   :  { %54 = vst.msk [vmem:[#allocation2 + $0x78] sm:$0xff] %vm38_vm1, %v7816_v3 }
  0x12   :  { %55 = vst.msk [vmem:[#allocation2 + $0x80] sm:$0xff] %vm38_vm1, %v7816_v3 }
  0x13   :  { %56 = vst.msk [vmem:[#allocation2 + $0x88] sm:$0xff] %vm38_vm1, %v7816_v3 }
  0x14   :  { %57 = vst.msk [vmem:[#allocation2 + $0x90] sm:$0xff] %vm38_vm1, %v7816_v3 }
  0x15   :  { %58 = vst.msk [vmem:[#allocation2 + $0x98] sm:$0xff] %vm38_vm1, %v7816_v3 }
  0x16   :  { %59 = vst.msk [vmem:[#allocation2 + $0xa0] sm:$0xff] %vm38_vm1, %v7816_v3 }
  0x17   :  { %60 = vst.msk [vmem:[#allocation2 + $0xa8] sm:$0xff] %vm38_vm1, %v7816_v3 }
  0x18   :  { %61 = vst.msk [vmem:[#allocation2 + $0xb0] sm:$0xff] %vm38_vm1, %v7816_v3 }
  0x19   :  { %62 = vst.msk [vmem:[#allocation2 + $0xb8] sm:$0xff] %vm38_vm1, %v7816_v3 }
  0x1a   :  { %63 = vst.msk [vmem:[#allocation2 + $0xc0] sm:$0xff] %vm38_vm1, %v7816_v3 }
  0x1b   :  { %64 = vst.msk [vmem:[#allocation2 + $0xc8] sm:$0xff] %vm38_vm1, %v7816_v3 }
  0x1c   :  { %65 = vst.msk [vmem:[#allocation2 + $0xd0] sm:$0xff] %vm38_vm1, %v7816_v3 }
  0x1d   :  { %66 = vst.msk [vmem:[#allocation2 + $0xd8] sm:$0xff] %vm38_vm1, %v7816_v3 }
  0x1e   :  { %67 = vst.msk [vmem:[#allocation2 + $0xe0] sm:$0xff] %vm38_vm1, %v7816_v3 }
  0x1f   :  { %68 = vst.msk [vmem:[#allocation2 + $0xe8] sm:$0xff] %vm38_vm1, %v7816_v3 }
  0x20   :  { %76 = vst.msk [vmem:[#allocation2 + $0x9] sm:$0xff] %vm38_vm1, %v72_v19 }
  0x21   :  { %77 = vst.msk [vmem:[#allocation2 + $0x11] sm:$0xff] %vm38_vm1, %v73_v20 }
  0x22   :  { %79 = vst.msk [vmem:[#allocation2 + $0x19] sm:$0xf] %vm78_vm2, %v74_v21 }
  0x23   :  { %85 = vst.msk [vmem:[#allocation2 + $0x1f] sm:$0xff] %vm38_vm1, %v4127_v22 }
  0x24   :  { %86 = vst.msk [vmem:[#allocation2 + $0x27] sm:$0xff] %vm38_vm1, %v4128_v23 }
  0x25   :  { %87 = vst.msk [vmem:[#allocation2 + $0x2f] sm:$0xff] %vm38_vm1, %v4129_v24 }
  0x26   :  { %88 = vst.msk [vmem:[#allocation2 + $0x37] sm:$0xf] %vm78_vm2, %v4130_v27 }
  0x27   :  { %v144_v25 = vld [vmem:[#allocation2 + $0x8] sm:$0xff]  ;;  %94 = vst.msk [vmem:[#allocation2 + $0x3d] sm:$0xff] %vm38_vm1, %v4131_v30 }
  0x28   :  { %v182_v26 = vld [vmem:[#allocation2 + $0x9] sm:$0xff]  ;;  %4227 = vmatmul.msk.f32.vlgmr.msra.gmra.mxu2 %vm38_vm1, %v144_v25  ;;  %4258 = vmatmul.msk.f32.vlgmr.msra.gmra.mxu3 %vm38_vm1, %v144_v25  ;;  %v183_v29 = vld [vmem:[#allocation2 + $0x11] sm:$0xff]  ;;  %95 = vst.msk [vmem:[#allocation2 + $0x45] sm:$0xff] %vm38_vm1, %v4132_v33 }
  0x29   :  { %4165 = vmatmul.msk.f32.gmra.mxu0 %vm38_vm1, %v182_v26  ;;  %4196 = vmatmul.msk.f32.gmra.mxu1 %vm38_vm1, %v182_v26  ;;  %v145_v28 = vld [vmem:[#allocation2 + $0x10] sm:$0xff]  ;;  %96 = vst.msk [vmem:[#allocation2 + $0x4d] sm:$0xff] %vm38_vm1, %v4133_v36  ;;  %v4148_v26 = vld [vmem:[%s7805_s0 + $0xc8] sm:$0xff] }
  0x2a   :  { %v146_v31 = vld [vmem:[#allocation2 + $0x18] sm:$0xff]  ;;  %97 = vst.msk [vmem:[#allocation2 + $0x55] sm:$0xf] %vm78_vm2, %v4134_v39 }
  0x2b   :  { %v184_v32 = vld [vmem:[#allocation2 + $0x19] sm:$0xff]  ;;  %v185_v35 = vld [vmem:[#allocation2 + $0x21] sm:$0xff]  ;;  %103 = vst.msk [vmem:[#allocation2 + $0x5b] sm:$0xff] %vm38_vm1, %v4135_v42 }
  0x2c   :  { %v147_v34 = vld [vmem:[#allocation2 + $0x20] sm:$0xff]  ;;  %v148_v37 = vld [vmem:[#allocation2 + $0x28] sm:$0xff]  ;;  %104 = vst.msk [vmem:[#allocation2 + $0x63] sm:$0xff] %vm38_vm1, %v4136_v45 }
  0x2d   :  { %v186_v38 = vld [vmem:[#allocation2 + $0x29] sm:$0xff]  ;;  %v187_v41 = vld [vmem:[#allocation2 + $0x31] sm:$0xff]  ;;  %105 = vst.msk [vmem:[#allocation2 + $0x6b] sm:$0xff] %vm38_vm1, %v4137_v48 }
  0x2e   :  { %v149_v40 = vld [vmem:[#allocation2 + $0x30] sm:$0xff]  ;;  %v150_v43 = vld [vmem:[#allocation2 + $0x38] sm:$0xff]  ;;  %106 = vst.msk [vmem:[#allocation2 + $0x73] sm:$0xf] %vm78_vm2, %v4138_v51 }
  0x2f   :  { %v188_v44 = vld [vmem:[#allocation2 + $0x39] sm:$0xff]  ;;  %v189_v47 = vld [vmem:[#allocation2 + $0x41] sm:$0xff]  ;;  %112 = vst.msk [vmem:[#allocation2 + $0x79] sm:$0xff] %vm38_vm1, %v4139_v54 }
  0x30   :  { %4228 = vmatmul.msk.f32.gmra.mxu2 %vm38_vm1, %v145_v28  ;;  %4259 = vmatmul.msk.f32.gmra.mxu3 %vm38_vm1, %v145_v28  ;;  %v151_v46 = vld [vmem:[#allocation2 + $0x40] sm:$0xff]  ;;  %v152_v49 = vld [vmem:[#allocation2 + $0x48] sm:$0xff]  ;;  %113 = vst.msk [vmem:[#allocation2 + $0x81] sm:$0xff] %vm38_vm1, %v4140_v57 }
  0x31   :  { %4166 = vmatmul.msk.f32.gmra.mxu0 %vm38_vm1, %v183_v29  ;;  %4197 = vmatmul.msk.f32.gmra.mxu1 %vm38_vm1, %v183_v29  ;;  %v190_v50 = vld [vmem:[#allocation2 + $0x49] sm:$0xff]  ;;  %v191_v53 = vld [vmem:[#allocation2 + $0x51] sm:$0xff]  ;;  %114 = vst.msk [vmem:[#allocation2 + $0x89] sm:$0xff] %vm38_vm1, %v4141_v60 }
  0x32   :  { %v153_v52 = vld [vmem:[#allocation2 + $0x50] sm:$0xff]  ;;  %v154_v55 = vld [vmem:[#allocation2 + $0x58] sm:$0xff]  ;;  %115 = vst.msk [vmem:[#allocation2 + $0x91] sm:$0xf] %vm78_vm2, %v4142_v63 }
  0x33   :  { %v192_v56 = vld [vmem:[#allocation2 + $0x59] sm:$0xff]  ;;  %v193_v59 = vld [vmem:[#allocation2 + $0x61] sm:$0xff]  ;;  %121 = vst.msk [vmem:[#allocation2 + $0x97] sm:$0xff] %vm38_vm1, %v4143_v0 }
  0x34   :  { %v155_v58 = vld [vmem:[#allocation2 + $0x60] sm:$0xff]  ;;  %v156_v61 = vld [vmem:[#allocation2 + $0x68] sm:$0xff]  ;;  %122 = vst.msk [vmem:[#allocation2 + $0x9f] sm:$0xff] %vm38_vm1, %v4144_v4  ;;  %v4153_v4 = vld [vmem:[%s7805_s0 + $0xf0] sm:$0xff] }
  0x35   :  { %v194_v62 = vld [vmem:[#allocation2 + $0x69] sm:$0xff]  ;;  %v195_v2 = vld [vmem:[#allocation2 + $0x71] sm:$0xff]  ;;  %123 = vst.msk [vmem:[#allocation2 + $0xa7] sm:$0xff] %vm38_vm1, %v4145_v7 }
  0x36   :  { %v157_v1 = vld [vmem:[#allocation2 + $0x70] sm:$0xff]  ;;  %v158_v5 = vld [vmem:[#allocation2 + $0x78] sm:$0xff]  ;;  %124 = vst.msk [vmem:[#allocation2 + $0xaf] sm:$0xf] %vm78_vm2, %v4146_v12 }
  0x37   :  { %v196_v6 = vld [vmem:[#allocation2 + $0x79] sm:$0xff]  ;;  %v197_v11 = vld [vmem:[#allocation2 + $0x81] sm:$0xff]  ;;  %130 = vst.msk [vmem:[#allocation2 + $0xb5] sm:$0xff] %vm38_vm1, %v4147_v17 }
  0x38   :  { %4229 = vmatmul.msk.f32.gmra.mxu2 %vm38_vm1, %v146_v31  ;;  %4260 = vmatmul.msk.f32.gmra.mxu3 %vm38_vm1, %v146_v31  ;;  %v159_v10 = vld [vmem:[#allocation2 + $0x80] sm:$0xff]  ;;  %v160_v13 = vld [vmem:[#allocation2 + $0x88] sm:$0xff]  ;;  %131 = vst.msk [vmem:[#allocation2 + $0xbd] sm:$0xff] %vm38_vm1, %v4148_v26 }
  0x39   :  { %4167 = vmatmul.msk.f32.gmra.mxu0 %vm38_vm1, %v184_v32  ;;  %4198 = vmatmul.msk.f32.gmra.mxu1 %vm38_vm1, %v184_v32  ;;  %v198_v15 = vld [vmem:[#allocation2 + $0x89] sm:$0xff]  ;;  %141 = vst.msk [vmem:[#allocation2 + $0xe3] sm:$0xff] %vm38_vm1, %v4153_v4  ;;  %v844_v4 = vld [vmem:[#allocation2 + $0x1a] sm:$0xff] }
  0x3a   :  { %v161_v21 = vld [vmem:[#allocation2 + $0x90] sm:$0xff]  ;;  %70 = vst.msk [vmem:[#allocation2 + $0xf0] sm:$0x3] %vm69_vm3, %v7816_v3 }
  0x3b   :  { %v199_v24 = vld [vmem:[#allocation2 + $0x91] sm:$0xff]  ;;  %v200_v33 = vld [vmem:[#allocation2 + $0x99] sm:$0xff] }
  0x3c   :  { %v162_v30 = vld [vmem:[#allocation2 + $0x98] sm:$0xff]  ;;  %v163_v39 = vld [vmem:[#allocation2 + $0xa0] sm:$0xff] }
  0x3d   :  { %v201_v42 = vld [vmem:[#allocation2 + $0xa1] sm:$0xff]  ;;  %v202_v51 = vld [vmem:[#allocation2 + $0xa9] sm:$0xff] }
  0x3e   :  { %v164_v48 = vld [vmem:[#allocation2 + $0xa8] sm:$0xff]  ;;  %v165_v57 = vld [vmem:[#allocation2 + $0xb0] sm:$0xff] }
  0x3f   :  { %v203_v60 = vld [vmem:[#allocation2 + $0xb1] sm:$0xff] }
  0x40   :  { %4230 = vmatmul.msk.f32.gmra.mxu2 %vm38_vm1, %v147_v34  ;;  %4261 = vmatmul.msk.f32.gmra.mxu3 %vm38_vm1, %v147_v34  ;;  %v166_v63 = vld [vmem:[#allocation2 + $0xb8] sm:$0xff] }
  0x41   :  { %4168 = vmatmul.msk.f32.gmra.mxu0 %vm38_vm1, %v185_v35  ;;  %4199 = vmatmul.msk.f32.gmra.mxu1 %vm38_vm1, %v185_v35  ;;  %v4149_v35 = vld [vmem:[%s7805_s0 + $0xd0] sm:$0xff] }
  0x42   :  { %132 = vst.msk [vmem:[#allocation2 + $0xc5] sm:$0xff] %vm38_vm1, %v4149_v35  ;;  %v4288_v35 = vld [vmem:[%s7804_s1 + $0x88] sm:$0xff] }
  0x48   :  { %4231 = vmatmul.msk.f32.gmra.mxu2 %vm38_vm1, %v148_v37  ;;  %4262 = vmatmul.msk.f32.gmra.mxu3 %vm38_vm1, %v148_v37 }
  0x49   :  { %4169 = vmatmul.msk.f32.gmra.mxu0 %vm38_vm1, %v186_v38  ;;  %4200 = vmatmul.msk.f32.gmra.mxu1 %vm38_vm1, %v186_v38  ;;  %v205_v7 = vld [vmem:[#allocation2 + $0xc1] sm:$0xff] }
  0x50   :  { %4232 = vmatmul.msk.f32.gmra.mxu2 %vm38_vm1, %v149_v40  ;;  %4263 = vmatmul.msk.f32.gmra.mxu3 %vm38_vm1, %v149_v40 }
  0x51   :  { %4170 = vmatmul.msk.f32.gmra.mxu0 %vm38_vm1, %v187_v41  ;;  %4201 = vmatmul.msk.f32.gmra.mxu1 %vm38_vm1, %v187_v41 }
  0x58   :  { %4233 = vmatmul.msk.f32.gmra.mxu2 %vm38_vm1, %v150_v43  ;;  %4264 = vmatmul.msk.f32.gmra.mxu3 %vm38_vm1, %v150_v43 }
  0x59   :  { %4171 = vmatmul.msk.f32.gmra.mxu0 %vm38_vm1, %v188_v44  ;;  %4202 = vmatmul.msk.f32.gmra.mxu1 %vm38_vm1, %v188_v44  ;;  %v4150_v44 = vld [vmem:[%s7805_s0 + $0xd8] sm:$0xf] }
  0x5a   :  { %133 = vst.msk [vmem:[#allocation2 + $0xcd] sm:$0xf] %vm78_vm2, %v4150_v44 }
  0x60   :  { %4234 = vmatmul.msk.f32.gmra.mxu2 %vm38_vm1, %v151_v46  ;;  %4265 = vmatmul.msk.f32.gmra.mxu3 %vm38_vm1, %v151_v46 }
  0x61   :  { %4172 = vmatmul.msk.f32.gmra.mxu0 %vm38_vm1, %v189_v47  ;;  %4203 = vmatmul.msk.f32.gmra.mxu1 %vm38_vm1, %v189_v47  ;;  %v168_v12 = vld [vmem:[#allocation2 + $0xc8] sm:$0xff] }
  0x68   :  { %4235 = vmatmul.msk.f32.gmra.mxu2 %vm38_vm1, %v152_v49  ;;  %4266 = vmatmul.msk.f32.gmra.mxu3 %vm38_vm1, %v152_v49 }
  0x69   :  { %4173 = vmatmul.msk.f32.gmra.mxu0 %vm38_vm1, %v190_v50  ;;  %4204 = vmatmul.msk.f32.gmra.mxu1 %vm38_vm1, %v190_v50 }
  0x70   :  { %4236 = vmatmul.msk.f32.gmra.mxu2 %vm38_vm1, %v153_v52  ;;  %4267 = vmatmul.msk.f32.gmra.mxu3 %vm38_vm1, %v153_v52 }
  0x71   :  { %4174 = vmatmul.msk.f32.gmra.mxu0 %vm38_vm1, %v191_v53  ;;  %4205 = vmatmul.msk.f32.gmra.mxu1 %vm38_vm1, %v191_v53  ;;  %v4151_v53 = vld [vmem:[%s7805_s0 + $0xe0] sm:$0xff] }
  0x72   :  { %139 = vst.msk [vmem:[#allocation2 + $0xd3] sm:$0xff] %vm38_vm1, %v4151_v53 }
  0x78   :  { %4237 = vmatmul.msk.f32.gmra.mxu2 %vm38_vm1, %v154_v55  ;;  %4268 = vmatmul.msk.f32.gmra.mxu3 %vm38_vm1, %v154_v55 }
  0x79   :  { %4175 = vmatmul.msk.f32.gmra.mxu0 %vm38_vm1, %v192_v56  ;;  %4206 = vmatmul.msk.f32.gmra.mxu1 %vm38_vm1, %v192_v56 }
  0x80   :  { %4238 = vmatmul.msk.f32.gmra.mxu2 %vm38_vm1, %v155_v58  ;;  %4269 = vmatmul.msk.f32.gmra.mxu3 %vm38_vm1, %v155_v58 }
  0x81   :  { %4176 = vmatmul.msk.f32.gmra.mxu0 %vm38_vm1, %v193_v59  ;;  %4207 = vmatmul.msk.f32.gmra.mxu1 %vm38_vm1, %v193_v59 }
  0x88   :  { %4239 = vmatmul.msk.f32.gmra.mxu2 %vm38_vm1, %v156_v61  ;;  %4270 = vmatmul.msk.f32.gmra.mxu3 %vm38_vm1, %v156_v61 }
  0x89   :  { %4177 = vmatmul.msk.f32.gmra.mxu0 %vm38_vm1, %v194_v62  ;;  %4208 = vmatmul.msk.f32.gmra.mxu1 %vm38_vm1, %v194_v62  ;;  %v4152_v62 = vld [vmem:[%s7805_s0 + $0xe8] sm:$0xff] }
  0x8a   :  { %v5026_v8 = vpop.f32.mrf.mxu0  ;;  %v5028_v9 = vpop.f32.mrf.mxu1  ;;  %140 = vst.msk [vmem:[#allocation2 + $0xdb] sm:$0xff] %vm38_vm1, %v4152_v62  ;;  %v843_v62 = vld [vmem:[#allocation2 + $0x12] sm:$0xff] }
  0x90   :  { %4240 = vmatmul.msk.f32.gmra.mxu2 %vm38_vm1, %v157_v1  ;;  %4271 = vmatmul.msk.f32.gmra.mxu3 %vm38_vm1, %v157_v1  ;;  %v204_v1 = vld [vmem:[#allocation2 + $0xb9] sm:$0xff] }
  0x91   :  { %4178 = vmatmul.msk.f32.gmra.mxu0 %vm38_vm1, %v195_v2  ;;  %4209 = vmatmul.msk.f32.gmra.mxu1 %vm38_vm1, %v195_v2  ;;  %v208_v26 = vld [vmem:[#allocation2 + $0xd9] sm:$0xff] }
  0x98   :  { %4241 = vmatmul.msk.f32.gmra.mxu2 %vm38_vm1, %v158_v5  ;;  %4272 = vmatmul.msk.f32.gmra.mxu3 %vm38_vm1, %v158_v5  ;;  %v167_v5 = vld [vmem:[#allocation2 + $0xc0] sm:$0xff] }
  0x99   :  { %4179 = vmatmul.msk.f32.gmra.mxu0 %vm38_vm1, %v196_v6  ;;  %4210 = vmatmul.msk.f32.gmra.mxu1 %vm38_vm1, %v196_v6 }
  0xa0   :  { %4242 = vmatmul.msk.f32.gmra.mxu2 %vm38_vm1, %v159_v10  ;;  %4273 = vmatmul.msk.f32.gmra.mxu3 %vm38_vm1, %v159_v10 }
  0xa1   :  { %4180 = vmatmul.msk.f32.gmra.mxu0 %vm38_vm1, %v197_v11  ;;  %4211 = vmatmul.msk.f32.gmra.mxu1 %vm38_vm1, %v197_v11  ;;  %v4154_v11 = vld [vmem:[%s7805_s0 + $0xf8] sm:$0xf] }
  0xa2   :  { %142 = vst.msk [vmem:[#allocation2 + $0xeb] sm:$0xf] %vm78_vm2, %v4154_v11  ;;  %v845_v11 = vld [vmem:[#allocation2 + $0x22] sm:$0xff] }
  0xa6   :  { %v337_v14 = vpop.f32.mrf.mxu0  ;;  %v444_v16 = vpop.f32.mrf.mxu1 }
  0xa8   :  { %4243 = vmatmul.msk.f32.gmra.mxu2 %vm38_vm1, %v160_v13  ;;  %4274 = vmatmul.msk.f32.gmra.mxu3 %vm38_vm1, %v160_v13 }
  0xa9   :  { %4181 = vmatmul.msk.f32.gmra.mxu0 %vm38_vm1, %v198_v15  ;;  %4212 = vmatmul.msk.f32.gmra.mxu1 %vm38_vm1, %v198_v15  ;;  %v210_v44 = vld [vmem:[#allocation2 + $0xe9] sm:$0xff] }
  0xab   :  { %v647_v18 = vpop.f32.mrf.mxu2  ;;  %v754_v20 = vpop.f32.mrf.mxu3 }
  0xac   :  { %v5046_v19 = vadd.f32 %v647_v18, %v337_v14  ;;  %v5048_v23 = vadd.f32 %v754_v20, %v444_v16  ;;  %v206_v14 = vld [vmem:[#allocation2 + $0xc9] sm:$0xff]  ;;  %v207_v18 = vld [vmem:[#allocation2 + $0xd1] sm:$0xff] }
  0xad   :  { %v169_v16 = vld [vmem:[#allocation2 + $0xd0] sm:$0xff] }
  0xae   :  { %v340_v22 = vpop.f32.mrf.mxu0  ;;  %v447_v25 = vpop.f32.mrf.mxu1 }
  0xb0   :  { %4244 = vmatmul.msk.f32.gmra.mxu2 %vm38_vm1, %v161_v21  ;;  %4275 = vmatmul.msk.f32.gmra.mxu3 %vm38_vm1, %v161_v21  ;;  %v170_v21 = vld [vmem:[#allocation2 + $0xd8] sm:$0xff] }
  0xb1   :  { %4182 = vmatmul.msk.f32.gmra.mxu0 %vm38_vm1, %v199_v24  ;;  %4213 = vmatmul.msk.f32.gmra.mxu1 %vm38_vm1, %v199_v24  ;;  %v4294_v24 = vld [vmem:[%s7804_s1 + $0xb8] sm:$0xf] }
  0xb2   :  { %4326 = vmatpush.msk.msra.mxu1 %vm310_vm0, %v4294_v24 }
  0xb3   :  { %v650_v27 = vpop.f32.mrf.mxu2  ;;  %v757_v29 = vpop.f32.mrf.mxu3 }
  0xb4   :  { %v5058_v28 = vadd.f32 %v650_v27, %v340_v22  ;;  %v5060_v32 = vadd.f32 %v757_v29, %v447_v25  ;;  %v4293_v22 = vld [vmem:[%s7804_s1 + $0xb0] sm:$0xf]  ;;  %v4291_v27 = vld [vmem:[%s7804_s1 + $0xa0] sm:$0xff]  ;;  %v4292_v29 = vld [vmem:[%s7804_s1 + $0xa8] sm:$0xff] }
  0xb5   :  { %4295 = vmatpush.msk.msra.mxu0 %vm310_vm0, %v4293_v22  ;;  %1096 = vmatpush.msra.mxu1 %v4292_v29  ;;  %v847_v22 = vld [vmem:[#allocation2 + $0x32] sm:$0xff] }
  0xb6   :  { %v343_v31 = vpop.f32.mrf.mxu0  ;;  %v450_v34 = vpop.f32.mrf.mxu1 }
  0xb7   :  { %989 = vmatpush.msra.mxu0 %v4291_v27  ;;  %v848_v27 = vld [vmem:[#allocation2 + $0x3a] sm:$0xff] }
  0xb8   :  { %4245 = vmatmul.msk.f32.gmra.mxu2 %vm38_vm1, %v162_v30  ;;  %4276 = vmatmul.msk.f32.gmra.mxu3 %vm38_vm1, %v162_v30 }
  0xb9   :  { %4183 = vmatmul.msk.f32.gmra.mxu0 %vm38_vm1, %v200_v33  ;;  %4214 = vmatmul.msk.f32.gmra.mxu1 %vm38_vm1, %v200_v33  ;;  %v4290_v33 = vld [vmem:[%s7804_s1 + $0x98] sm:$0xff] }
  0xba   :  { %1097 = vmatpush.msra.mxu1 %v4290_v33  ;;  %v849_v33 = vld [vmem:[#allocation2 + $0x42] sm:$0xff] }
  0xbb   :  { %v653_v36 = vpop.f32.mrf.mxu2  ;;  %v760_v38 = vpop.f32.mrf.mxu3 }
  0xbc   :  { %v5070_v37 = vadd.f32 %v653_v36, %v343_v31  ;;  %v5072_v41 = vadd.f32 %v760_v38, %v450_v34  ;;  %v4289_v31 = vld [vmem:[%s7804_s1 + $0x90] sm:$0xff]  ;;  %v4287_v34 = vld [vmem:[%s7804_s1 + $0x80] sm:$0xff]  ;;  %1098 = vmatpush.msra.mxu1 %v4288_v35 }
  0xbd   :  { %990 = vmatpush.msra.mxu0 %v4289_v31  ;;  %v171_v36 = vld [vmem:[#allocation2 + $0xe0] sm:$0xff] }
  0xbe   :  { %v346_v40 = vpop.f32.mrf.mxu0  ;;  %v453_v43 = vpop.f32.mrf.mxu1 }
  0xbf   :  { %991 = vmatpush.msra.mxu0 %v4287_v34 }
  0xc0   :  { %4246 = vmatmul.msk.f32.gmra.mxu2 %vm38_vm1, %v163_v39  ;;  %4277 = vmatmul.msk.f32.gmra.mxu3 %vm38_vm1, %v163_v39  ;;  %v209_v39 = vld [vmem:[#allocation2 + $0xe1] sm:$0xff] }
  0xc1   :  { %4184 = vmatmul.msk.f32.gmra.mxu0 %vm38_vm1, %v201_v42  ;;  %4215 = vmatmul.msk.f32.gmra.mxu1 %vm38_vm1, %v201_v42  ;;  %v172_v42 = vld [vmem:[#allocation2 + $0xe8] sm:$0xff] }
  0xc3   :  { %v656_v45 = vpop.f32.mrf.mxu2  ;;  %v763_v47 = vpop.f32.mrf.mxu3 }
  0xc4   :  { %v5082_v46 = vadd.f32 %v656_v45, %v346_v40  ;;  %v5084_v50 = vadd.f32 %v763_v47, %v453_v43 }
  0xc6   :  { %v349_v49 = vpop.f32.mrf.mxu0  ;;  %v456_v52 = vpop.f32.mrf.mxu1 }
  0xc8   :  { %4247 = vmatmul.msk.f32.gmra.mxu2 %vm38_vm1, %v164_v48  ;;  %4278 = vmatmul.msk.f32.gmra.mxu3 %vm38_vm1, %v164_v48  ;;  %v143_v48 = vld [vmem:[#allocation2] sm:$0xff] }
  0xc9   :  { %4185 = vmatmul.msk.f32.gmra.mxu0 %vm38_vm1, %v202_v51  ;;  %4216 = vmatmul.msk.f32.gmra.mxu1 %vm38_vm1, %v202_v51 }
  0xcb   :  { %v659_v54 = vpop.f32.mrf.mxu2  ;;  %v766_v56 = vpop.f32.mrf.mxu3 }
  0xcc   :  { %v5094_v55 = vadd.f32 %v659_v54, %v349_v49  ;;  %v5098_v59 = vadd.f32 %v766_v56, %v456_v52  ;;  %v841_v52 = vld [vmem:[#allocation2 + $0x2] sm:$0xff]  ;;  %v842_v56 = vld [vmem:[#allocation2 + $0xa] sm:$0xff] }
  0xce   :  { %v5096_v58 = vpop.f32.mrf.mxu0  ;;  %v5100_v61 = vpop.f32.mrf.mxu1 }
  0xd0   :  { %4248 = vmatmul.msk.f32.gmra.mxu2 %vm38_vm1, %v165_v57  ;;  %4279 = vmatmul.msk.f32.gmra.mxu3 %vm38_vm1, %v165_v57 }
  0xd1   :  { %4186 = vmatmul.msk.f32.gmra.mxu0 %vm38_vm1, %v203_v60  ;;  %4217 = vmatmul.msk.f32.gmra.mxu1 %vm38_vm1, %v203_v60 }
  0xd6   :  { %v5110_v0 = vpop.f32.mrf.mxu0  ;;  %v5112_v2 = vpop.f32.mrf.mxu1 }
  0xd8   :  { %4249 = vmatmul.msk.f32.gmra.mxu2 %vm38_vm1, %v166_v63  ;;  %4280 = vmatmul.msk.f32.gmra.mxu3 %vm38_vm1, %v166_v63 }
  0xd9   :  { %4187 = vmatmul.msk.f32.gmra.mxu0 %vm38_vm1, %v204_v1  ;;  %4218 = vmatmul.msk.f32.gmra.mxu1 %vm38_vm1, %v204_v1 }
  0xde   :  { %v5122_v6 = vpop.f32.mrf.mxu0  ;;  %v5124_v10 = vpop.f32.mrf.mxu1 }
  0xe0   :  { %4250 = vmatmul.msk.f32.gmra.mxu2 %vm38_vm1, %v167_v5  ;;  %4281 = vmatmul.msk.f32.gmra.mxu3 %vm38_vm1, %v167_v5 }
  0xe1   :  { %4188 = vmatmul.msk.f32.gmra.mxu0 %vm38_vm1, %v205_v7  ;;  %4219 = vmatmul.msk.f32.gmra.mxu1 %vm38_vm1, %v205_v7 }
  0xe6   :  { %v5134_v13 = vpop.f32.mrf.mxu0  ;;  %v5136_v15 = vpop.f32.mrf.mxu1 }
  0xe8   :  { %4251 = vmatmul.msk.f32.gmra.mxu2 %vm38_vm1, %v168_v12  ;;  %4282 = vmatmul.msk.f32.gmra.mxu3 %vm38_vm1, %v168_v12 }
  0xe9   :  { %4189 = vmatmul.msk.f32.gmra.mxu0 %vm38_vm1, %v206_v14  ;;  %4220 = vmatmul.msk.f32.gmra.mxu1 %vm38_vm1, %v206_v14 }
  0xee   :  { %v5143_v17 = vpop.f32.mrf.mxu0  ;;  %v5145_v20 = vpop.f32.mrf.mxu1 }
  0xf0   :  { %4252 = vmatmul.msk.f32.gmra.mxu2 %vm38_vm1, %v169_v16  ;;  %4283 = vmatmul.msk.f32.gmra.mxu3 %vm38_vm1, %v169_v16  ;;  %v846_v16 = vld [vmem:[#allocation2 + $0x2a] sm:$0xff] }
  0xf1   :  { %4190 = vmatmul.msk.f32.gmra.mxu0 %vm38_vm1, %v207_v18  ;;  %4221 = vmatmul.msk.f32.gmra.mxu1 %vm38_vm1, %v207_v18 }
  0xf6   :  { %v5157_v25 = vpop.f32.mrf.mxu0  ;;  %v5167_v30 = vpop.f32.mrf.mxu1 }
  0xf8   :  { %4253 = vmatmul.msk.f32.gmra.mxu2 %vm38_vm1, %v170_v21  ;;  %4284 = vmatmul.msk.f32.gmra.mxu3 %vm38_vm1, %v170_v21 }
  0xf9   :  { %4191 = vmatmul.msk.f32.gmra.mxu0 %vm38_vm1, %v208_v26  ;;  %4222 = vmatmul.msk.f32.gmra.mxu1 %vm38_vm1, %v208_v26 }
  0xfe   :  { %v5185_v38 = vpop.f32.mrf.mxu0  ;;  %v5187_v40 = vpop.f32.mrf.mxu1 }
 0x100   :  { %4254 = vmatmul.msk.f32.gmra.mxu2 %vm38_vm1, %v171_v36  ;;  %4285 = vmatmul.msk.f32.gmra.mxu3 %vm38_vm1, %v171_v36  ;;  %v850_v36 = vld [vmem:[#allocation2 + $0x4a] sm:$0xff] }
 0x101   :  { %4192 = vmatmul.msk.f32.gmra.mxu0 %vm38_vm1, %v209_v39  ;;  %4223 = vmatmul.msk.f32.gmra.mxu1 %vm38_vm1, %v209_v39 }
 0x106   :  { %v5193_v43 = vpop.f32.mrf.mxu0  ;;  %v5195_v45 = vpop.f32.mrf.mxu1 }
 0x108   :  { %4255 = vmatmul.msk.f32.gmra.mxu2 %vm38_vm1, %v172_v42  ;;  %4286 = vmatmul.msk.f32.gmra.mxu3 %vm38_vm1, %v172_v42 }
 0x109   :  { %4193 = vmatmul.msk.f32.gmra.mxu0 %vm38_vm1, %v210_v44  ;;  %4224 = vmatmul.msk.f32.gmra.mxu1 %vm38_vm1, %v210_v44  ;;  %v851_v44 = vld [vmem:[#allocation2 + $0x52] sm:$0xff] }
 0x10e   :  { %v5201_v47 = vpop.f32.mrf.mxu0  ;;  %v5203_v49 = vpop.f32.mrf.mxu1 }
 0x111   :  { %4226 = vmatmul.msk.f32.vlgmr.msrb.gmra.mxu0 %vm38_vm1, %v143_v48  ;;  %4257 = vmatmul.msk.f32.vlgmr.msrb.gmra.mxu1 %vm38_vm1, %v143_v48 }
 0x116   :  { %v5207_v51 = vpop.f32.mrf.mxu0  ;;  %v5209_v53 = vpop.f32.mrf.mxu1 }
 0x119   :  { %4296 = vmatmul.msk.f32.vlgmr.msra.gmra.mxu0 %vm38_vm1, %v841_v52  ;;  %4327 = vmatmul.msk.f32.vlgmr.msra.gmra.mxu1 %vm38_vm1, %v841_v52 }
 0x11e   :  { %v5213_v54 = vpop.f32.mrf.mxu0  ;;  %v5215_v57 = vpop.f32.mrf.mxu1 }
 0x121   :  { %4297 = vmatmul.msk.f32.gmra.mxu0 %vm38_vm1, %v842_v56  ;;  %4328 = vmatmul.msk.f32.gmra.mxu1 %vm38_vm1, %v842_v56  ;;  %v852_v56 = vld [vmem:[#allocation2 + $0x5a] sm:$0xff] }
 0x126   :  { %v5219_v60 = vpop.f32.mrf.mxu0  ;;  %v5221_v63 = vpop.f32.mrf.mxu1 }
 0x129   :  { %4298 = vmatmul.msk.f32.gmra.mxu0 %vm38_vm1, %v843_v62  ;;  %4329 = vmatmul.msk.f32.gmra.mxu1 %vm38_vm1, %v843_v62 }
 0x12e   :  { %v5225_v1 = vpop.f32.mrf.mxu0  ;;  %v5227_v5 = vpop.f32.mrf.mxu1 }
 0x131   :  { %4299 = vmatmul.msk.f32.gmra.mxu0 %vm38_vm1, %v844_v4  ;;  %4330 = vmatmul.msk.f32.gmra.mxu1 %vm38_vm1, %v844_v4 }
 0x136   :  { %v5231_v7 = vpop.f32.mrf.mxu0  ;;  %v5233_v12 = vpop.f32.mrf.mxu1 }
 0x139   :  { %4300 = vmatmul.msk.f32.gmra.mxu0 %vm38_vm1, %v845_v11  ;;  %4331 = vmatmul.msk.f32.gmra.mxu1 %vm38_vm1, %v845_v11  ;;  %v853_v11 = vld [vmem:[#allocation2 + $0x62] sm:$0xff] }
 0x13e   :  { %v5237_v14 = vpop.f32.mrf.mxu0  ;;  %v5239_v18 = vpop.f32.mrf.mxu1 }
 0x141   :  { %4301 = vmatmul.msk.f32.gmra.mxu0 %vm38_vm1, %v846_v16  ;;  %4332 = vmatmul.msk.f32.gmra.mxu1 %vm38_vm1, %v846_v16 }
 0x146   :  { %v5243_v21 = vpop.f32.mrf.mxu0  ;;  %v5245_v24 = vpop.f32.mrf.mxu1 }
 0x147   :  { %7873 = vst [vmem:[#allocation4_spill] sm:$0xff] %v5243_v21 }
 0x148   :  { %7874 = vst [vmem:[#allocation5_spill] sm:$0xff] %v5245_v24 }
 0x149   :  { %4302 = vmatmul.msk.f32.gmra.mxu0 %vm38_vm1, %v847_v22  ;;  %4333 = vmatmul.msk.f32.gmra.mxu1 %vm38_vm1, %v847_v22 }
 0x14e   :  { %v5249_v26 = vpop.f32.mrf.mxu0  ;;  %v5251_v29 = vpop.f32.mrf.mxu1 }
 0x14f   :  { %7875 = vst [vmem:[#allocation6_spill] sm:$0xff] %v5249_v26 }
 0x150   :  { %7876 = vst [vmem:[#allocation7_spill] sm:$0xff] %v5251_v29 }
 0x151   :  { %4303 = vmatmul.msk.f32.gmra.mxu0 %vm38_vm1, %v848_v27  ;;  %4334 = vmatmul.msk.f32.gmra.mxu1 %vm38_vm1, %v848_v27  ;;  %v854_v27 = vld [vmem:[#allocation2 + $0x6a] sm:$0xff] }
 0x156   :  { %v5255_v31 = vpop.f32.mrf.mxu0  ;;  %v5257_v34 = vpop.f32.mrf.mxu1 }
 0x157   :  { %7877 = vst [vmem:[#allocation8_spill] sm:$0xff] %v5255_v31 }
 0x158   :  { %7878 = vst [vmem:[#allocation9_spill] sm:$0xff] %v5257_v34 }
 0x159   :  { %4304 = vmatmul.msk.f32.gmra.mxu0 %vm38_vm1, %v849_v33  ;;  %4335 = vmatmul.msk.f32.gmra.mxu1 %vm38_vm1, %v849_v33 }
 0x15e   :  { %v5261_v35 = vpop.f32.mrf.mxu0  ;;  %v5263_v39 = vpop.f32.mrf.mxu1 }
 0x15f   :  { %7879 = vst [vmem:[#allocation10_spill] sm:$0xff] %v5261_v35 }
 0x160   :  { %7880 = vst [vmem:[#allocation11_spill] sm:$0xff] %v5263_v39 }
 0x161   :  { %4305 = vmatmul.msk.f32.gmra.mxu0 %vm38_vm1, %v850_v36  ;;  %4336 = vmatmul.msk.f32.gmra.mxu1 %vm38_vm1, %v850_v36 }
 0x166   :  { %v5267_v42 = vpop.f32.mrf.mxu0  ;;  %v5269_v48 = vpop.f32.mrf.mxu1 }
 0x167   :  { %7881 = vst [vmem:[#allocation12_spill] sm:$0xff] %v5267_v42 }
 0x168   :  { %7882 = vst [vmem:[#allocation13_spill] sm:$0xff] %v5269_v48 }
 0x169   :  { %4306 = vmatmul.msk.f32.gmra.mxu0 %vm38_vm1, %v851_v44  ;;  %4337 = vmatmul.msk.f32.gmra.mxu1 %vm38_vm1, %v851_v44  ;;  %v855_v44 = vld [vmem:[#allocation2 + $0x72] sm:$0xff] }
 0x16e   :  { %v5273_v52 = vpop.f32.mrf.mxu0  ;;  %v5275_v62 = vpop.f32.mrf.mxu1 }
 0x16f   :  { %7883 = vst [vmem:[#allocation14_spill] sm:$0xff] %v5273_v52 }
 0x170   :  { %7884 = vst [vmem:[#allocation15_spill] sm:$0xff] %v5275_v62 }
 0x171   :  { %4307 = vmatmul.msk.f32.gmra.mxu0 %vm38_vm1, %v852_v56  ;;  %4338 = vmatmul.msk.f32.gmra.mxu1 %vm38_vm1, %v852_v56 }
 0x176   :  { %v5279_v4 = vpop.f32.mrf.mxu0  ;;  %v5281_v16 = vpop.f32.mrf.mxu1 }
 0x177   :  { %7885 = vst [vmem:[#allocation16_spill] sm:$0xff] %v5279_v4  ;;  %v857_v4 = vld [vmem:[#allocation2 + $0x82] sm:$0xff] }
 0x178   :  { %7886 = vst [vmem:[#allocation17_spill] sm:$0xff] %v5281_v16 }
 0x179   :  { %4308 = vmatmul.msk.f32.gmra.mxu0 %vm38_vm1, %v853_v11  ;;  %4339 = vmatmul.msk.f32.gmra.mxu1 %vm38_vm1, %v853_v11  ;;  %v856_v11 = vld [vmem:[#allocation2 + $0x7a] sm:$0xff] }
 0x17e   :  { %v5285_v22 = vpop.f32.mrf.mxu0  ;;  %v5287_v33 = vpop.f32.mrf.mxu1 }
 0x17f   :  { %7887 = vst [vmem:[#allocation18_spill] sm:$0xff] %v5285_v22  ;;  %v5298_v22 = vpop.f32.mrf.mxu2 }
 0x180   :  { %7888 = vst [vmem:[#allocation19_spill] sm:$0xff] %v5287_v33 }
 0x181   :  { %4309 = vmatmul.msk.f32.gmra.mxu0 %vm38_vm1, %v854_v27  ;;  %4340 = vmatmul.msk.f32.gmra.mxu1 %vm38_vm1, %v854_v27  ;;  %v1250_v27 = vld [vmem:[%s7806_s2] sm:$0x3]  ;;  %s4696_s2 = smov 120  }
 0x182   :  { %v5307_v33 = vperm.slane %v1250_v27, 0  ;;  %v5315_v39 = vperm.slane %v1250_v27, 1 }
 0x186   :  { %v5291_v36 = vpop.f32.mrf.mxu0  ;;  %v5293_v56 = vpop.f32.mrf.mxu1 }
 0x187   :  { %7889 = vst [vmem:[#allocation20_spill] sm:$0xff] %v5291_v36  ;;  %v5304_v36 = vpop.f32.mrf.mxu3 }
 0x188   :  { %7890 = vst [vmem:[#allocation21_spill] sm:$0xff] %v5293_v56 }
 0x189   :  { %4310 = vmatmul.msk.f32.gmra.mxu0 %vm38_vm1, %v855_v44  ;;  %4341 = vmatmul.msk.f32.gmra.mxu1 %vm38_vm1, %v855_v44 }
 0x18e   :  { %v644_v3 = vpop.f32.mrf.mxu0  ;;  %v751_v16 = vpop.f32.mrf.mxu1 }
 0x18f   :  { %v645_v56 = vadd.f32 %v644_v3, %v5026_v8  ;;  %v752_v48 = vadd.f32 %v751_v16, %v5028_v9  ;;  %v5318_v8 = vpop.f32.mrf.mxu2  ;;  %v5323_v9 = vpop.f32.mrf.mxu3 }
 0x191   :  { %4311 = vmatmul.msk.f32.gmra.mxu0 %vm38_vm1, %v856_v11  ;;  %4342 = vmatmul.msk.f32.gmra.mxu1 %vm38_vm1, %v856_v11 }
 0x196   :  { %v993_v44 = vpop.f32.mrf.mxu0  ;;  %v1100_v52 = vpop.f32.mrf.mxu1 }
 0x197   :  { %v1190_v62 = vadd.f32 %v993_v44, %v645_v56  ;;  %v1191_v42 = vadd.f32 %v1100_v52, %v752_v48  ;;  %v858_v56 = vld [vmem:[#allocation2 + $0x8a] sm:$0xff] }
 0x199   :  { %4312 = vmatmul.msk.f32.gmra.mxu0 %vm38_vm1, %v857_v4  ;;  %v5312_v11 = vadd.f32 %v5307_v33, %v1190_v62  ;;  %4343 = vmatmul.msk.f32.gmra.mxu1 %vm38_vm1, %v857_v4  ;;  %v5326_v62 = vadd.f32 %v5315_v39, %v1191_v42 }
 0x19b   :  { %v7818_v3 = vmax.f32 %v5312_v11, 0.0 }
 0x19d   :  { %1436 = vrot.lane.b32.xlu0 %v7818_v3, %s4696_s2  ;;  %v7820_v3 = vmax.f32 %v5326_v62, 0.0 }
 0x19e   :  { %v996_v16 = vpop.f32.mrf.mxu0  ;;  %v1103_v52 = vpop.f32.mrf.mxu1 }
 0x19f   :  { %v1192_v48 = vadd.f32 %v996_v16, %v5046_v19  ;;  %v1193_v27 = vadd.f32 %v1103_v52, %v5048_v23  ;;  %v5343_v19 = vpop.f32.mrf.mxu2  ;;  %v859_v16 = vld [vmem:[#allocation2 + $0x92] sm:$0xff]  ;;  %v5349_v52 = vpop.f32.mrf.mxu3 }
 0x1a1   :  { %4313 = vmatmul.msk.f32.gmra.mxu0 %vm38_vm1, %v858_v56  ;;  %v5331_v4 = vadd.f32 %v5307_v33, %v1192_v48  ;;  %4344 = vmatmul.msk.f32.gmra.mxu1 %vm38_vm1, %v858_v56  ;;  %v5346_v56 = vadd.f32 %v5315_v39, %v1193_v27  ;;  %v860_v27 = vld [vmem:[#allocation2 + $0x9a] sm:$0xff] }
 0x1a3   :  { %v7819_v44 = vmax.f32 %v5331_v4, 0.0  ;;  %v7821_v35 = vmax.f32 %v5346_v56, 0.0 }
 0x1a5   :  { %1440 = vrot.lane.b32.xlu1 %v7819_v44, %s4696_s2  ;;  %1438 = vrot.lane.b32.xlu0 %v7820_v3, %s4696_s2 }
 0x1a6   :  { %v999_v42 = vpop.f32.mrf.mxu0  ;;  %v1106_v48 = vpop.f32.mrf.mxu1 }
 0x1a7   :  { %v1194_v23 = vadd.f32 %v999_v42, %v5058_v28  ;;  %v1195_v3 = vadd.f32 %v1106_v48, %v5060_v32 }
 0x1a9   :  { %4314 = vmatmul.msk.f32.gmra.mxu0 %vm38_vm1, %v859_v16  ;;  %v5353_v44 = vadd.f32 %v5307_v33, %v1194_v23  ;;  %4345 = vmatmul.msk.f32.gmra.mxu1 %vm38_vm1, %v859_v16  ;;  %v5366_v42 = vadd.f32 %v5315_v39, %v1195_v3  ;;  %v5369_v23 = vpop.f32.mrf.mxu2 }
 0x1ab   :  { %v7822_v34 = vmax.f32 %v5353_v44, 0.0  ;;  %v7823_v3 = vmax.f32 %v5366_v42, 0.0 }
 0x1ad   :  { %1442 = vrot.lane.b32.xlu1 %v7821_v35, %s4696_s2  ;;  %1444 = vrot.lane.b32.xlu2 %v7822_v34, %s4696_s2  ;;  %v5376_v35 = vpop.f32.mrf.mxu3 }
 0x1ae   :  { %v1002_v28 = vpop.f32.mrf.mxu0  ;;  %v1109_v32 = vpop.f32.mrf.mxu1 }
 0x1af   :  { %v1196_v16 = vadd.f32 %v1002_v28, %v5070_v37  ;;  %v1197_v48 = vadd.f32 %v1109_v32, %v5072_v41 }
 0x1b1   :  { %v5373_v31 = vadd.f32 %v5307_v33, %v1196_v16  ;;  %4315 = vmatmul.msk.f32.gmra.mxu0 %vm38_vm1, %v860_v27  ;;  %v5379_v34 = vadd.f32 %v5315_v39, %v1197_v48  ;;  %4346 = vmatmul.msk.f32.gmra.mxu1 %vm38_vm1, %v860_v27  ;;  %v861_v27 = vld [vmem:[#allocation2 + $0xa2] sm:$0xff] }
 0x1b3   :  { %v7824_v37 = vmax.f32 %v5373_v31, 0.0  ;;  %v7825_v28 = vmax.f32 %v5379_v34, 0.0 }
 0x1b5   :  { %1446 = vrot.lane.b32.xlu2 %v7823_v3, %s4696_s2  ;;  %1448 = vrot.lane.b32.xlu0 %v7824_v37, %s4696_s2  ;;  %v5400_v3 = vpop.f32.mrf.mxu2  ;;  %v5407_v26 = vpop.f32.mrf.mxu3 }
 0x1b6   :  { %1450 = vrot.lane.b32.xlu1 %v7825_v28, %s4696_s2  ;;  %v1005_v41 = vpop.f32.mrf.mxu0  ;;  %v1112_v32 = vpop.f32.mrf.mxu1 }
 0x1b7   :  { %v1198_v16 = vadd.f32 %v1005_v41, %v5082_v46  ;;  %v1199_v48 = vadd.f32 %v1112_v32, %v5084_v50  ;;  %v862_v41 = vld [vmem:[#allocation2 + $0xaa] sm:$0xff] }
 0x1b9   :  { %v5397_v29 = vadd.f32 %v5307_v33, %v1198_v16  ;;  %4316 = vmatmul.msk.f32.gmra.mxu0 %vm38_vm1, %v861_v27  ;;  %v5403_v37 = vadd.f32 %v5315_v39, %v1199_v48  ;;  %4347 = vmatmul.msk.f32.gmra.mxu1 %vm38_vm1, %v861_v27 }
 0x1bb   :  { %7891 = vst [vmem:[#allocation22_spill] sm:$0xff] %v5397_v29  ;;  %v7826_v28 = vmax.f32 %v5397_v29, 0.0  ;;  %v7827_v46 = vmax.f32 %v5403_v37, 0.0 }
 0x1bd   :  { %1452 = vrot.lane.b32.xlu2 %v7826_v28, %s4696_s2  ;;  %1454 = vrot.lane.b32.xlu0 %v7827_v46, %s4696_s2  ;;  %v5427_v46 = vpop.f32.mrf.mxu2 }
 0x1be   :  { %v1008_v50 = vpop.f32.mrf.mxu0  ;;  %v1115_v32 = vpop.f32.mrf.mxu1 }
 0x1bf   :  { %v1200_v16 = vadd.f32 %v1008_v50, %v5094_v55  ;;  %v1201_v27 = vadd.f32 %v1115_v32, %v5098_v59  ;;  %v663_v55 = vadd.f32 %v5298_v22, %v5096_v58  ;;  %v770_v59 = vadd.f32 %v5304_v36, %v5100_v61  ;;  %v5437_v50 = vpop.f32.mrf.mxu3 }
 0x1c1   :  { %v5419_v48 = vadd.f32 %v5307_v33, %v1200_v16  ;;  %4317 = vmatmul.msk.f32.gmra.mxu0 %vm38_vm1, %v862_v41  ;;  %v5423_v24 = vadd.f32 %v5315_v39, %v1201_v27  ;;  %4348 = vmatmul.msk.f32.gmra.mxu1 %vm38_vm1, %v862_v41  ;;  %v863_v16 = vld [vmem:[#allocation2 + $0xb2] sm:$0xff] }
 0x1c3   :  { %v7829_v28 = vmax.f32 %v5419_v48, 0.0  ;;  %v1327_v21 = vmax.f32 %v5423_v24, 0.0  ;;  %v7906_v24 = vld [vmem:[#allocation6_spill] sm:$0xff] }
 0x1c5   :  { %1456 = vrot.lane.b32.xlu1 %v7829_v28, %s4696_s2  ;;  %1458 = vrot.lane.b32.xlu2 %v1327_v21, %s4696_s2  ;;  %v666_v28 = vadd.f32 %v5318_v8, %v5110_v0 }
 0x1c6   :  { %v1011_v41 = vpop.f32.mrf.mxu0  ;;  %v1118_v27 = vpop.f32.mrf.mxu1 }
 0x1c7   :  { %v1202_v32 = vadd.f32 %v1011_v41, %v663_v55  ;;  %v1203_v29 = vadd.f32 %v1118_v27, %v770_v59  ;;  %v773_v55 = vadd.f32 %v5323_v9, %v5112_v2  ;;  %v5459_v59 = vpop.f32.mrf.mxu2  ;;  %v864_v41 = vld [vmem:[#allocation2 + $0xba] sm:$0xff]  ;;  %v5464_v27 = vpop.f32.mrf.mxu3 }
 0x1c9   :  { %v5443_v58 = vadd.f32 %v5307_v33, %v1202_v32  ;;  %4318 = vmatmul.msk.f32.gmra.mxu0 %vm38_vm1, %v863_v16  ;;  %v5447_v22 = vadd.f32 %v5315_v39, %v1203_v29  ;;  %4349 = vmatmul.msk.f32.gmra.mxu1 %vm38_vm1, %v863_v16 }
 0x1cb   :  { %v7830_v61 = vmax.f32 %v5443_v58, 0.0  ;;  %v7831_v36 = vmax.f32 %v5447_v22, 0.0 }
 0x1cd   :  { %1460 = vrot.lane.b32.xlu0 %v7830_v61, %s4696_s2  ;;  %1462 = vrot.lane.b32.xlu1 %v7831_v36, %s4696_s2 }
 0x1ce   :  { %v1014_v29 = vpop.f32.mrf.mxu0  ;;  %v1121_v32 = vpop.f32.mrf.mxu1 }
 0x1cf   :  { %v1204_v16 = vadd.f32 %v1014_v29, %v666_v28  ;;  %v1205_v0 = vadd.f32 %v1121_v32, %v773_v55  ;;  %v669_v28 = vadd.f32 %v5343_v19, %v5122_v6  ;;  %v776_v55 = vadd.f32 %v5349_v52, %v5124_v10  ;;  %v5492_v19 = vpop.f32.mrf.mxu3  ;;  %v1722_v52 = vld [vmem:[%s7807_s3 + $0x78] sm:$0xff] }
 0x1d0   :  { %1825 = vmatpush.msrb.mxu2 %v1722_v52 }
 0x1d1   :  { %v5467_v8 = vadd.f32 %v5307_v33, %v1204_v16  ;;  %4319 = vmatmul.msk.f32.gmra.mxu0 %vm38_vm1, %v864_v41  ;;  %v5471_v2 = vadd.f32 %v5315_v39, %v1205_v0  ;;  %4350 = vmatmul.msk.f32.gmra.mxu1 %vm38_vm1, %v864_v41  ;;  %v865_v41 = vld [vmem:[#allocation2 + $0xc2] sm:$0xff]  ;;  %v5486_v0 = vpop.f32.mrf.mxu2 }
 0x1d3   :  { %v7832_v9 = vmax.f32 %v5467_v8, 0.0  ;;  %v7833_v61 = vmax.f32 %v5471_v2, 0.0 }
 0x1d5   :  { %1464 = vrot.lane.b32.xlu2 %v7832_v9, %s4696_s2  ;;  %1466 = vrot.lane.b32.xlu0 %v7833_v61, %s4696_s2 }
 0x1d6   :  { %v1017_v29 = vpop.f32.mrf.mxu0  ;;  %v1124_v32 = vpop.f32.mrf.mxu1 }
 0x1d7   :  { %v1206_v16 = vadd.f32 %v1017_v29, %v669_v28  ;;  %v1207_v36 = vadd.f32 %v1124_v32, %v776_v55  ;;  %v672_v29 = vadd.f32 %v5369_v23, %v5134_v13 }
 0x1d9   :  { %v5489_v6 = vadd.f32 %v5307_v33, %v1206_v16  ;;  %4320 = vmatmul.msk.f32.gmra.mxu0 %vm38_vm1, %v865_v41  ;;  %v5495_v10 = vadd.f32 %v5315_v39, %v1207_v36  ;;  %4351 = vmatmul.msk.f32.gmra.mxu1 %vm38_vm1, %v865_v41  ;;  %v779_v36 = vadd.f32 %v5376_v35, %v5136_v15  ;;  %v866_v16 = vld [vmem:[#allocation2 + $0xca] sm:$0xff]  ;;  %v5517_v13 = vpop.f32.mrf.mxu2 }
 0x1da   :  { %v1721_v15 = vld [vmem:[%s7807_s3 + $0x70] sm:$0xff]  ;;  %v1720_v35 = vld [vmem:[%s7807_s3 + $0x68] sm:$0xff] }
 0x1db   :  { %v7834_v28 = vmax.f32 %v5489_v6, 0.0  ;;  %v7835_v55 = vmax.f32 %v5495_v10, 0.0  ;;  %1826 = vmatpush.msrb.mxu2 %v1721_v15 }
 0x1dd   :  { %1468 = vrot.lane.b32.xlu1 %v7834_v28, %s4696_s2  ;;  %1470 = vrot.lane.b32.xlu2 %v7835_v55, %s4696_s2  ;;  %v867_v28 = vld [vmem:[#allocation2 + $0xd2] sm:$0xff] }
 0x1de   :  { %v1020_v41 = vpop.f32.mrf.mxu0  ;;  %v1127_v52 = vpop.f32.mrf.mxu1  ;;  %1827 = vmatpush.msrb.mxu2 %v1720_v35  ;;  %v1732_v35 = vld [vmem:[%s7807_s3 + $0xc8] sm:$0xff] }
 0x1df   :  { %v1208_v32 = vadd.f32 %v1020_v41, %v672_v29  ;;  %v1209_v9 = vadd.f32 %v1127_v52, %v779_v36  ;;  %v1733_v36 = vld [vmem:[%s7807_s3 + $0xd0] sm:$0xff]  ;;  %v5533_v41 = vpop.f32.mrf.mxu3  ;;  %v782_v52 = vadd.f32 %v5407_v26, %v5145_v20 }
 0x1e0   :  { %1937 = vmatpush.msrb.mxu3 %v1733_v36  ;;  %v1718_v36 = vld [vmem:[%s7807_s3 + $0x58] sm:$0xff]  ;;  %v1717_v26 = vld [vmem:[%s7807_s3 + $0x50] sm:$0xff] }
 0x1e1   :  { %v5514_v61 = vadd.f32 %v5307_v33, %v1208_v32  ;;  %4321 = vmatmul.msk.f32.gmra.mxu0 %vm38_vm1, %v866_v16  ;;  %v5520_v23 = vadd.f32 %v5315_v39, %v1209_v9  ;;  %4352 = vmatmul.msk.f32.gmra.mxu1 %vm38_vm1, %v866_v16  ;;  %v1719_v16 = vld [vmem:[%s7807_s3 + $0x60] sm:$0xff]  ;;  %v675_v32 = vadd.f32 %v5400_v3, %v5143_v17 }
 0x1e2   :  { %1828 = vmatpush.msrb.mxu2 %v1719_v16  ;;  %1938 = vmatpush.msrb.mxu3 %v1732_v35 }
 0x1e3   :  { %v7836_v29 = vmax.f32 %v5514_v61, 0.0  ;;  %v7838_v9 = vmax.f32 %v5520_v23, 0.0 }
 0x1e4   :  { %1829 = vmatpush.msrb.mxu2 %v1718_v36  ;;  %v678_v36 = vadd.f32 %v5427_v46, %v5157_v25  ;;  %v868_v25 = vld [vmem:[#allocation2 + $0xda] sm:$0xff] }
 0x1e5   :  { %1472 = vrot.lane.b32.xlu0 %v7836_v29, %s4696_s2  ;;  %1474 = vrot.lane.b32.xlu1 %v7838_v9, %s4696_s2  ;;  %v1714_v46 = vld [vmem:[%s7807_s3 + $0x38] sm:$0xff] }
 0x1e6   :  { %v1023_v15 = vpop.f32.mrf.mxu0  ;;  %v1130_v17 = vpop.f32.mrf.mxu1  ;;  %1830 = vmatpush.msrb.mxu2 %v1717_v26 }
 0x1e7   :  { %v1210_v55 = vadd.f32 %v1023_v15, %v675_v32  ;;  %v1211_v3 = vadd.f32 %v1130_v17, %v782_v52  ;;  %v5573_v32 = vpop.f32.mrf.mxu2  ;;  %v1715_v15 = vld [vmem:[%s7807_s3 + $0x40] sm:$0xff]  ;;  %v1730_v17 = vld [vmem:[%s7807_s3 + $0xb8] sm:$0xff]  ;;  %v5589_v26 = vpop.f32.mrf.mxu3 }
 0x1e9   :  { %v5553_v29 = vadd.f32 %v5307_v33, %v1210_v55  ;;  %4322 = vmatmul.msk.f32.gmra.mxu0 %vm38_vm1, %v867_v28  ;;  %v5557_v20 = vadd.f32 %v5315_v39, %v1211_v3  ;;  %4353 = vmatmul.msk.f32.gmra.mxu1 %vm38_vm1, %v867_v28  ;;  %v1716_v55 = vld [vmem:[%s7807_s3 + $0x48] sm:$0xff]  ;;  %v1731_v28 = vld [vmem:[%s7807_s3 + $0xc0] sm:$0xff]  ;;  %v785_v3 = vadd.f32 %v5437_v50, %v5167_v30  ;;  %v1729_v30 = vld [vmem:[%s7807_s3 + $0xb0] sm:$0xff] }
 0x1ea   :  { %1831 = vmatpush.msrb.mxu2 %v1716_v55  ;;  %1939 = vmatpush.msrb.mxu3 %v1731_v28 }
 0x1eb   :  { %v7837_v16 = vmax.f32 %v5553_v29, 0.0  ;;  %v7841_v52 = vmax.f32 %v5557_v20, 0.0 }
 0x1ec   :  { %1832 = vmatpush.msrb.mxu2 %v1715_v15  ;;  %1940 = vmatpush.msrb.mxu3 %v1730_v17  ;;  %v1713_v15 = vld [vmem:[%s7807_s3 + $0x30] sm:$0xff] }
 0x1ed   :  { %1476 = vrot.lane.b32.xlu2 %v7837_v16, %s4696_s2  ;;  %1478 = vrot.lane.b32.xlu0 %v7841_v52, %s4696_s2 }
 0x1ee   :  { %v1026_v35 = vpop.f32.mrf.mxu0  ;;  %v1133_v16 = vpop.f32.mrf.mxu1  ;;  %1833 = vmatpush.msrb.mxu2 %v1714_v46  ;;  %1941 = vmatpush.msrb.mxu3 %v1729_v30  ;;  %v681_v46 = vadd.f32 %v5459_v59, %v5185_v38  ;;  %v788_v30 = vadd.f32 %v5464_v27, %v5187_v40  ;;  %v869_v38 = vld [vmem:[#allocation2 + $0xe2] sm:$0xff]  ;;  %v1710_v59 = vld [vmem:[%s7807_s3 + $0x18] sm:$0xff]  ;;  %v1725_v40 = vld [vmem:[%s7807_s3 + $0x90] sm:$0xff] }
 0x1ef   :  { %v1212_v55 = vadd.f32 %v1026_v35, %v678_v36  ;;  %v1213_v50 = vadd.f32 %v1133_v16, %v785_v3  ;;  %v1728_v16 = vld [vmem:[%s7807_s3 + $0xa8] sm:$0xff]  ;;  %v1727_v3 = vld [vmem:[%s7807_s3 + $0xa0] sm:$0xff]  ;;  %v5646_v27 = vpop.f32.mrf.mxu3 }
 0x1f0   :  { %v1712_v36 = vld [vmem:[%s7807_s3 + $0x28] sm:$0xff]  ;;  %1834 = vmatpush.msrb.mxu2 %v1713_v15  ;;  %1942 = vmatpush.msrb.mxu3 %v1728_v16 }
 0x1f1   :  { %v5601_v9 = vadd.f32 %v5307_v33, %v1212_v55  ;;  %4323 = vmatmul.msk.f32.gmra.mxu0 %vm38_vm1, %v868_v25  ;;  %v5605_v28 = vadd.f32 %v5315_v39, %v1213_v50  ;;  %4354 = vmatmul.msk.f32.gmra.mxu1 %vm38_vm1, %v868_v25  ;;  %v1711_v25 = vld [vmem:[%s7807_s3 + $0x20] sm:$0xff]  ;;  %v1726_v55 = vld [vmem:[%s7807_s3 + $0x98] sm:$0xff]  ;;  %v5635_v50 = vpop.f32.mrf.mxu2 }
 0x1f2   :  { %1835 = vmatpush.msrb.mxu2 %v1712_v36  ;;  %1943 = vmatpush.msrb.mxu3 %v1727_v3 }
 0x1f3   :  { %v7839_v17 = vmax.f32 %v5601_v9, 0.0  ;;  %v7840_v35 = vmax.f32 %v5605_v28, 0.0 }
 0x1f4   :  { %1836 = vmatpush.msrb.mxu2 %v1711_v25  ;;  %1944 = vmatpush.msrb.mxu3 %v1726_v55  ;;  %v1709_v25 = vld [vmem:[%s7807_s3 + $0x10] sm:$0xff]  ;;  %v1708_v55 = vld [vmem:[%s7807_s3 + $0x8] sm:$0xff] }
 0x1f5   :  { %1480 = vrot.lane.b32.xlu1 %v7839_v17, %s4696_s2  ;;  %1482 = vrot.lane.b32.xlu2 %v7840_v35, %s4696_s2 }
 0x1f6   :  { %v1029_v15 = vpop.f32.mrf.mxu0  ;;  %v1136_v36 = vpop.f32.mrf.mxu1  ;;  %1837 = vmatpush.msrb.mxu2 %v1710_v59  ;;  %1945 = vmatpush.msrb.mxu3 %v1725_v40  ;;  %v684_v59 = vadd.f32 %v5486_v0, %v5193_v43  ;;  %v870_v40 = vld [vmem:[#allocation2 + $0xea] sm:$0xff] }
 0x1f7   :  { %v1214_v16 = vadd.f32 %v1029_v15, %v681_v46  ;;  %v1215_v17 = vadd.f32 %v1136_v36, %v788_v30  ;;  %v1724_v46 = vld [vmem:[%s7807_s3 + $0x88] sm:$0xff] }
 0x1f8   :  { %1838 = vmatpush.msrb.mxu2 %v1709_v25  ;;  %1946 = vmatpush.msrb.mxu3 %v1724_v46 }
 0x1f9   :  { %v5649_v35 = vadd.f32 %v5307_v33, %v1214_v16  ;;  %4324 = vmatmul.msk.f32.gmra.mxu0 %vm38_vm1, %v869_v38  ;;  %v5653_v3 = vadd.f32 %v5315_v39, %v1215_v17  ;;  %4355 = vmatmul.msk.f32.gmra.mxu1 %vm38_vm1, %v869_v38  ;;  %v1723_v17 = vld [vmem:[%s7807_s3 + $0x80] sm:$0xff]  ;;  %v791_v16 = vadd.f32 %v5492_v19, %v5195_v45  ;;  %v695_v52 = vpop.f32.mrf.mxu2 }
 0x1fa   :  { %v1707_v38 = vld [vmem:[%s7807_s3] sm:$0xff]  ;;  %1839 = vmatpush.msrb.mxu2 %v1708_v55  ;;  %1947 = vmatpush.msrb.mxu3 %v1723_v17  ;;  %v802_v55 = vpop.f32.mrf.mxu3 }
 0x1fb   :  { %v7847_v30 = vmax.f32 %v5649_v35, 0.0  ;;  %v7848_v15 = vmax.f32 %v5653_v3, 0.0 }
 0x1fc   :  { %1840 = vmatpush.msrb.mxu2 %v1707_v38  ;;  %v687_v38 = vadd.f32 %v5517_v13, %v5201_v47 }
 0x1fd   :  { %1484 = vrot.lane.b32.xlu0 %v7847_v30, %s4696_s2  ;;  %1486 = vrot.lane.b32.xlu1 %v7848_v15, %s4696_s2 }
 0x1fe   :  { %v1032_v36 = vpop.f32.mrf.mxu0  ;;  %v1139_v46 = vpop.f32.mrf.mxu1 }
 0x1ff   :  { %v1216_v25 = vadd.f32 %v1032_v36, %v684_v59  ;;  %v1217_v43 = vadd.f32 %v1139_v46, %v791_v16  ;;  %v794_v59 = vadd.f32 %v5533_v41, %v5203_v49  ;;  %v690_v41 = vadd.f32 %v5573_v32, %v5207_v51 }
 0x201   :  { %v5684_v0 = vadd.f32 %v5307_v33, %v1216_v25  ;;  %4325 = vmatmul.msk.f32.gmra.mxu0 %vm38_vm1, %v870_v40  ;;  %v5688_v45 = vadd.f32 %v5315_v39, %v1217_v43  ;;  %4356 = vmatmul.msk.f32.gmra.mxu1 %vm38_vm1, %v870_v40  ;;  %v5706_v43 = vpop.f32.mrf.mxu2 }
 0x203   :  { %v7842_v19 = vmax.f32 %v5684_v0, 0.0  ;;  %v7843_v17 = vmax.f32 %v5688_v45, 0.0 }
 0x205   :  { %1488 = vrot.lane.b32.xlu2 %v7842_v19, %s4696_s2  ;;  %1490 = vrot.lane.b32.xlu0 %v7843_v17, %s4696_s2  ;;  %v805_v19 = vpop.f32.mrf.mxu3 }
 0x206   :  { %v1035_v16 = vpop.f32.mrf.mxu0  ;;  %v1142_v40 = vpop.f32.mrf.mxu1 }
 0x207   :  { %v1218_v36 = vadd.f32 %v1035_v16, %v687_v38  ;;  %v1219_v25 = vadd.f32 %v1142_v40, %v794_v59  ;;  %v797_v38 = vadd.f32 %v5589_v26, %v5209_v53  ;;  %v693_v26 = vadd.f32 %v5635_v50, %v5213_v54  ;;  %v1445_v30 = vpop.permute.xlu2 %1444 }
 0x209   :  { %v5704_v46 = vadd.f32 %v5307_v33, %v1218_v36  ;;  %v5709_v47 = vadd.f32 %v5315_v39, %v1219_v25 }
 0x20b   :  { %v7844_v13 = vmax.f32 %v5704_v46, 0.0  ;;  %v7845_v49 = vmax.f32 %v5709_v47, 0.0 }
 0x20d   :  { %1492 = vrot.lane.b32.xlu1 %v7844_v13, %s4696_s2  ;;  %1494 = vrot.lane.b32.xlu2 %v7845_v49, %s4696_s2  ;;  %v5730_v13 = vpop.f32.mrf.mxu2 }
 0x20e   :  { %v1038_v59 = vpop.f32.mrf.mxu0  ;;  %v1145_v36 = vpop.f32.mrf.mxu1 }
 0x20f   :  { %v1220_v16 = vadd.f32 %v1038_v59, %v690_v41  ;;  %v1221_v40 = vadd.f32 %v1145_v36, %v797_v38  ;;  %v1437_v25 = vpop.permute.xlu0 %1436  ;;  %v800_v41 = vadd.f32 %v5646_v27, %v5215_v57  ;;  %v5740_v38 = vpop.f32.mrf.mxu3  ;;  %v7892_v57 = vmax.f32 %v5326_v62, 0.0 }
 0x210   :  { %v803_v62 = vadd.f32 %v802_v55, %v5221_v63  ;;  %v7895_v63 = vmax.f32 %v5331_v4, 0.0  ;;  %v806_v4 = vadd.f32 %v805_v19, %v5227_v5 }
 0x211   :  { %v5724_v17 = vadd.f32 %v5307_v33, %v1220_v16  ;;  %v5727_v51 = vadd.f32 %v5315_v39, %v1221_v40 }
 0x213   :  { %v7846_v32 = vmax.f32 %v5724_v17, 0.0  ;;  %v1347_v53 = vmax.f32 %v5727_v51, 0.0 }
 0x215   :  { %1496 = vrot.lane.b32.xlu0 %v7846_v32, %s4696_s2  ;;  %1498 = vrot.lane.b32.xlu1 %v1347_v53, %s4696_s2 }
 0x216   :  { %v1041_v59 = vpop.f32.mrf.mxu0  ;;  %v1148_v36 = vpop.f32.mrf.mxu1 }
 0x217   :  { %v1222_v16 = vadd.f32 %v1041_v59, %v693_v26  ;;  %v1441_v40 = vpop.permute.xlu1 %1440  ;;  %v1223_v49 = vadd.f32 %v1148_v36, %v800_v41  ;;  %v1439_v54 = vpop.permute.xlu0 %1438  ;;  %v7893_v26 = vmax.f32 %v5312_v11, 0.0  ;;  %v696_v36 = vadd.f32 %v695_v52, %v5219_v60 }
 0x218   :  { %v1557_v32 = vsel %vm1556_vm4, %v1437_v25, %v1439_v54  ;;  %v1648_v27 = vmax.f32 %v7892_v57, %v1439_v54  ;;  %v7894_v60 = vmax.f32 %v5346_v56, 0.0  ;;  %v699_v56 = vadd.f32 %v5706_v43, %v5225_v1 }
 0x219   :  { %v5746_v50 = vadd.f32 %v5307_v33, %v1222_v16  ;;  %v5752_v15 = vadd.f32 %v5315_v39, %v1223_v49  ;;  %v1647_v59 = vmax.f32 %v7893_v26, %v1557_v32  ;;  %v704_v49 = vpop.f32.mrf.mxu2  ;;  %v811_v26 = vpop.f32.mrf.mxu3 }
 0x21a   :  { %4357 = vmatmul.msk.f32.vlgmr.msrb.gmra.mxu3 %vm1734_vm5, %v1648_v27 }
 0x21b   :  { %v7849_v41 = vmax.f32 %v5746_v50, 0.0  ;;  %1841 = vmatmul.f32.vlgmr.msrb.gmra.mxu2 %v1647_v59  ;;  %v1349_v16 = vmax.f32 %v5752_v15, 0.0 }
 0x21d   :  { %1500 = vrot.lane.b32.xlu2 %v7849_v41, %s4696_s2  ;;  %1502 = vrot.lane.b32.xlu0 %v1349_v16, %s4696_s2 }
 0x21e   :  { %v1044_v11 = vpop.f32.mrf.mxu0  ;;  %v1151_v32 = vpop.f32.mrf.mxu1 }
 0x21f   :  { %v1224_v25 = vadd.f32 %v1044_v11, %v696_v36  ;;  %v1443_v54 = vpop.permute.xlu1 %1442  ;;  %v1225_v57 = vadd.f32 %v1151_v32, %v803_v62  ;;  %v1447_v62 = vpop.permute.xlu2 %1446 }
 0x220   :  { %v1558_v27 = vsel %vm1556_vm4, %v1441_v40, %v1443_v54  ;;  %v1650_v52 = vmax.f32 %v7894_v60, %v1443_v54  ;;  %v7896_v60 = vmax.f32 %v5366_v42, 0.0 }
 0x221   :  { %v5771_v59 = vadd.f32 %v5307_v33, %v1224_v25  ;;  %v1649_v55 = vmax.f32 %v7895_v63, %v1558_v27  ;;  %v5776_v41 = vadd.f32 %v5315_v39, %v1225_v57  ;;  %v1559_v25 = vsel %vm1556_vm4, %v1445_v30, %v1447_v62  ;;  %v707_v27 = vpop.f32.mrf.mxu2 }
 0x222   :  { %4358 = vmatmul.msk.f32.gmra.mxu3 %vm1734_vm5, %v1650_v52  ;;  %v1652_v1 = vmax.f32 %v7896_v60, %v1447_v62  ;;  %v7897_v52 = vmax.f32 %v5353_v44, 0.0  ;;  %v702_v62 = vadd.f32 %v5730_v13, %v5231_v7  ;;  %v809_v44 = vadd.f32 %v5740_v38, %v5233_v12 }
 0x223   :  { %v1350_v36 = vmax.f32 %v5771_v59, 0.0  ;;  %1844 = vmatmul.f32.gmra.mxu2 %v1649_v55  ;;  %v1351_v40 = vmax.f32 %v5776_v41, 0.0  ;;  %v814_v55 = vpop.f32.mrf.mxu3  ;;  %v7899_v60 = vmax.f32 %v5373_v31, 0.0  ;;  %v812_v31 = vadd.f32 %v811_v26, %v5239_v18 }
 0x224   :  { %v1651_v5 = vmax.f32 %v7897_v52, %v1559_v25 }
 0x225   :  { %1504 = vrot.lane.b32.xlu1 %v1350_v36, %s4696_s2  ;;  %1506 = vrot.lane.b32.xlu2 %v1351_v40, %s4696_s2 }
 0x226   :  { %v1047_v11 = vpop.f32.mrf.mxu0  ;;  %v1154_v54 = vpop.f32.mrf.mxu1 }
 0x227   :  { %v1226_v32 = vadd.f32 %v1047_v11, %v699_v56  ;;  %v1227_v57 = vadd.f32 %v1154_v54, %v806_v4  ;;  %v1449_v63 = vpop.permute.xlu0 %1448 }
 0x228   :  { %v1451_v56 = vpop.permute.xlu1 %1450 }
 0x229   :  { %v5794_v43 = vadd.f32 %v5307_v33, %v1226_v32  ;;  %v5799_v19 = vadd.f32 %v5315_v39, %v1227_v57  ;;  %v1560_v11 = vsel %vm1556_vm4, %v1449_v63, %v1451_v56  ;;  %v7898_v57 = vmax.f32 %v5379_v34, 0.0  ;;  %v710_v38 = vpop.f32.mrf.mxu2 }
 0x22a   :  { %4359 = vmatmul.msk.f32.gmra.mxu3 %vm1734_vm5, %v1652_v1  ;;  %v1653_v1 = vmax.f32 %v7899_v60, %v1560_v11 }
 0x22b   :  { %v1352_v30 = vmax.f32 %v5794_v43, 0.0  ;;  %1847 = vmatmul.f32.gmra.mxu2 %v1651_v5  ;;  %v1353_v42 = vmax.f32 %v5799_v19, 0.0  ;;  %v1654_v7 = vmax.f32 %v7898_v57, %v1451_v56  ;;  %v1453_v5 = vpop.permute.xlu2 %1452  ;;  %v705_v56 = vadd.f32 %v704_v49, %v5237_v14  ;;  %v7901_v57 = vld [vmem:[#allocation22_spill] sm:$0xff] }
 0x22d   :  { %1508 = vrot.lane.b32.xlu0 %v1352_v30, %s4696_s2  ;;  %1510 = vrot.lane.b32.xlu1 %v1353_v42, %s4696_s2 }
 0x22e   :  { %v1050_v4 = vpop.f32.mrf.mxu0  ;;  %v1157_v32 = vpop.f32.mrf.mxu1 }
 0x22f   :  { %v1228_v25 = vadd.f32 %v1050_v4, %v702_v62  ;;  %v1229_v54 = vadd.f32 %v1157_v32, %v809_v44  ;;  %v1455_v63 = vpop.permute.xlu0 %1454  ;;  %v817_v62 = vpop.f32.mrf.mxu3 }
 0x230   :  { %v1561_v4 = vsel %vm1556_vm4, %v1453_v5, %v1455_v63 }
 0x231   :  { %v5818_v13 = vadd.f32 %v5307_v33, %v1228_v25  ;;  %v5823_v12 = vadd.f32 %v5315_v39, %v1229_v54  ;;  %v7900_v54 = vmax.f32 %v5403_v37, 0.0 }
 0x232   :  { %4360 = vmatmul.msk.f32.gmra.mxu3 %vm1734_vm5, %v1654_v7  ;;  %v7902_v7 = vmax.f32 %v7901_v57, 0.0 }
 0x233   :  { %v1354_v52 = vmax.f32 %v5818_v13, 0.0  ;;  %1850 = vmatmul.f32.gmra.mxu2 %v1653_v1  ;;  %v1355_v34 = vmax.f32 %v5823_v12, 0.0  ;;  %v1656_v14 = vmax.f32 %v7900_v54, %v1455_v63  ;;  %v713_v63 = vpop.f32.mrf.mxu2 }
 0x234   :  { %v1655_v60 = vmax.f32 %v7902_v7, %v1561_v4  ;;  %v1459_v4 = vpop.permute.xlu2 %1458 }
 0x235   :  { %1512 = vrot.lane.b32.xlu2 %v1354_v52, %s4696_s2  ;;  %1514 = vrot.lane.b32.xlu0 %v1355_v34, %s4696_s2 }
 0x236   :  { %v1053_v44 = vpop.f32.mrf.mxu0  ;;  %v1160_v25 = vpop.f32.mrf.mxu1 }
 0x237   :  { %v1230_v11 = vadd.f32 %v1053_v44, %v705_v56  ;;  %v1231_v32 = vadd.f32 %v1160_v25, %v812_v31  ;;  %v1457_v26 = vpop.permute.xlu1 %1456  ;;  %v7903_v56 = vld [vmem:[#allocation4_spill] sm:$0xff]  ;;  %v7904_v31 = vld [vmem:[#allocation5_spill] sm:$0xff]  ;;  %v820_v25 = vpop.f32.mrf.mxu3 }
 0x238   :  { %v708_v37 = vadd.f32 %v707_v27, %v7903_v56  ;;  %v815_v44 = vadd.f32 %v814_v55, %v7904_v31  ;;  %v1658_v27 = vmax.f32 %v1327_v21, %v1459_v4  ;;  %v7905_v55 = vmax.f32 %v5419_v48, 0.0  ;;  %v7907_v48 = vld [vmem:[#allocation7_spill] sm:$0xff] }
 0x239   :  { %v5840_v49 = vadd.f32 %v5307_v33, %v1230_v11  ;;  %v5845_v18 = vadd.f32 %v5315_v39, %v1231_v32  ;;  %v1562_v32 = vsel %vm1556_vm4, %v1457_v26, %v1459_v4  ;;  %v711_v21 = vadd.f32 %v710_v38, %v7906_v24 }
 0x23a   :  { %4361 = vmatmul.msk.f32.gmra.mxu3 %vm1734_vm5, %v1656_v14  ;;  %v818_v4 = vadd.f32 %v817_v62, %v7907_v48  ;;  %v7908_v38 = vmax.f32 %v5447_v22, 0.0  ;;  %v7909_v62 = vmax.f32 %v5443_v58, 0.0  ;;  %v7910_v22 = vld [vmem:[#allocation8_spill] sm:$0xff]  ;;  %v7911_v58 = vld [vmem:[#allocation9_spill] sm:$0xff] }
 0x23b   :  { %v1356_v1 = vmax.f32 %v5840_v49, 0.0  ;;  %1853 = vmatmul.f32.gmra.mxu2 %v1655_v60  ;;  %v1357_v5 = vmax.f32 %v5845_v18, 0.0  ;;  %v1657_v60 = vmax.f32 %v7905_v55, %v1562_v32 }
 0x23d   :  { %1516 = vrot.lane.b32.xlu1 %v1356_v1, %s4696_s2  ;;  %1518 = vrot.lane.b32.xlu2 %v1357_v5, %s4696_s2 }
 0x23e   :  { %v1056_v11 = vpop.f32.mrf.mxu0  ;;  %v1163_v14 = vpop.f32.mrf.mxu1 }
 0x23f   :  { %v1232_v54 = vadd.f32 %v1056_v11, %v708_v37  ;;  %v1233_v57 = vadd.f32 %v1163_v14, %v815_v44  ;;  %v1461_v31 = vpop.permute.xlu0 %1460  ;;  %v1463_v37 = vpop.permute.xlu1 %1462 }
 0x240   :  { %v1563_v32 = vsel %vm1556_vm4, %v1461_v31, %v1463_v37  ;;  %v823_v55 = vpop.f32.mrf.mxu3 }
 0x241   :  { %v5862_v7 = vadd.f32 %v5307_v33, %v1232_v54  ;;  %v5867_v56 = vadd.f32 %v5315_v39, %v1233_v57  ;;  %v716_v57 = vpop.f32.mrf.mxu2  ;;  %v1659_v48 = vmax.f32 %v7909_v62, %v1563_v32  ;;  %v821_v32 = vadd.f32 %v820_v25, %v7911_v58 }
 0x242   :  { %4362 = vmatmul.msk.f32.gmra.mxu3 %vm1734_vm5, %v1658_v27  ;;  %v7912_v62 = vmax.f32 %v5471_v2, 0.0 }
 0x243   :  { %v7850_v26 = vmax.f32 %v5862_v7, 0.0  ;;  %1856 = vmatmul.f32.gmra.mxu2 %v1657_v60  ;;  %v7853_v44 = vmax.f32 %v5867_v56, 0.0  ;;  %v1660_v60 = vmax.f32 %v7908_v38, %v1463_v37  ;;  %v714_v37 = vadd.f32 %v713_v63, %v7910_v22 }
 0x244   :  { %v7942_v49 = vmax.f32 %v5867_v56, 0.0 }
 0x245   :  { %1520 = vrot.lane.b32.xlu0 %v7850_v26, %s4696_s2  ;;  %1522 = vrot.lane.b32.xlu1 %v7853_v44, %s4696_s2 }
 0x246   :  { %v1059_v11 = vpop.f32.mrf.mxu0  ;;  %v1166_v14 = vpop.f32.mrf.mxu1 }
 0x247   :  { %v1234_v54 = vadd.f32 %v1059_v11, %v711_v21  ;;  %v1235_v27 = vadd.f32 %v1166_v14, %v818_v4  ;;  %v1465_v21 = vpop.permute.xlu2 %1464  ;;  %v1467_v11 = vpop.permute.xlu0 %1466 }
 0x248   :  { %v1564_v14 = vsel %vm1556_vm4, %v1465_v21, %v1467_v11  ;;  %v826_v44 = vpop.f32.mrf.mxu3 }
 0x249   :  { %v5884_v24 = vadd.f32 %v5307_v33, %v1234_v54  ;;  %v5889_v26 = vadd.f32 %v5315_v39, %v1235_v27  ;;  %v719_v22 = vpop.f32.mrf.mxu2 }
 0x24a   :  { %4363 = vmatmul.msk.f32.gmra.mxu3 %vm1734_vm5, %v1660_v60 }
 0x24b   :  { %v7851_v31 = vmax.f32 %v5884_v24, 0.0  ;;  %1859 = vmatmul.f32.gmra.mxu2 %v1659_v48  ;;  %v7852_v4 = vmax.f32 %v5889_v26, 0.0  ;;  %v1662_v48 = vmax.f32 %v7912_v62, %v1467_v11  ;;  %v7914_v11 = vld [vmem:[#allocation10_spill] sm:$0xff]  ;;  %v7916_v62 = vmax.f32 %v5495_v10, 0.0 }
 0x24d   :  { %1524 = vrot.lane.b32.xlu2 %v7851_v31, %s4696_s2  ;;  %1526 = vrot.lane.b32.xlu0 %v7852_v4, %s4696_s2  ;;  %v7913_v31 = vmax.f32 %v5467_v8, 0.0  ;;  %v7915_v8 = vld [vmem:[#allocation11_spill] sm:$0xff] }
 0x24e   :  { %v1062_v54 = vpop.f32.mrf.mxu0  ;;  %v1169_v38 = vpop.f32.mrf.mxu1 }
 0x24f   :  { %v1236_v27 = vadd.f32 %v1062_v54, %v714_v37  ;;  %v1237_v60 = vadd.f32 %v1169_v38, %v821_v32  ;;  %v1661_v25 = vmax.f32 %v7913_v31, %v1564_v14  ;;  %v1469_v4 = vpop.permute.xlu1 %1468  ;;  %v717_v37 = vadd.f32 %v716_v57, %v7914_v11  ;;  %v1471_v32 = vpop.permute.xlu2 %1470 }
 0x250   :  { %v824_v31 = vadd.f32 %v823_v55, %v7915_v8  ;;  %v1565_v14 = vsel %vm1556_vm4, %v1469_v4, %v1471_v32  ;;  %v1664_v57 = vmax.f32 %v7916_v62, %v1471_v32 }
 0x251   :  { %v5906_v63 = vadd.f32 %v5307_v33, %v1236_v27  ;;  %v5911_v58 = vadd.f32 %v5315_v39, %v1237_v60 }
 0x252   :  { %4364 = vmatmul.msk.f32.gmra.mxu3 %vm1734_vm5, %v1662_v48 }
 0x253   :  { %v7855_v21 = vmax.f32 %v5906_v63, 0.0  ;;  %1862 = vmatmul.f32.gmra.mxu2 %v1661_v25  ;;  %v1363_v2 = vmax.f32 %v5911_v58, 0.0  ;;  %v7917_v25 = vmax.f32 %v5489_v6, 0.0  ;;  %v7919_v6 = vld [vmem:[#allocation13_spill] sm:$0xff] }
 0x255   :  { %1528 = vrot.lane.b32.xlu1 %v7855_v21, %s4696_s2  ;;  %1530 = vrot.lane.b32.xlu2 %v1363_v2, %s4696_s2  ;;  %v1663_v55 = vmax.f32 %v7917_v25, %v1565_v14  ;;  %v827_v14 = vadd.f32 %v826_v44, %v7919_v6 }
 0x256   :  { %v1065_v54 = vpop.f32.mrf.mxu0  ;;  %v1172_v38 = vpop.f32.mrf.mxu1 }
 0x257   :  { %v1238_v27 = vadd.f32 %v1065_v54, %v717_v37  ;;  %v1239_v60 = vadd.f32 %v1172_v38, %v824_v31  ;;  %v1473_v8 = vpop.permute.xlu0 %1472  ;;  %v722_v37 = vpop.f32.mrf.mxu2  ;;  %v7918_v31 = vld [vmem:[#allocation12_spill] sm:$0xff] }
 0x258   :  { %v1475_v54 = vpop.permute.xlu1 %1474  ;;  %v720_v32 = vadd.f32 %v719_v22, %v7918_v31 }
 0x259   :  { %v5928_v48 = vadd.f32 %v5307_v33, %v1238_v27  ;;  %v5933_v11 = vadd.f32 %v5315_v39, %v1239_v60  ;;  %v829_v27 = vpop.f32.mrf.mxu3  ;;  %v1566_v60 = vsel %vm1556_vm4, %v1473_v8, %v1475_v54  ;;  %v1477_v8 = vpop.permute.xlu2 %1476 }
 0x25a   :  { %4365 = vmatmul.msk.f32.gmra.mxu3 %vm1734_vm5, %v1664_v57 }
 0x25b   :  { %v7854_v4 = vmax.f32 %v5928_v48, 0.0  ;;  %1865 = vmatmul.f32.gmra.mxu2 %v1663_v55  ;;  %v1365_v10 = vmax.f32 %v5933_v11, 0.0  ;;  %v7920_v55 = vmax.f32 %v5520_v23, 0.0  ;;  %v7922_v23 = vld [vmem:[#allocation14_spill] sm:$0xff]  ;;  %v7947_v58 = vmax.f32 %v5928_v48, 0.0 }
 0x25d   :  { %1532 = vrot.lane.b32.xlu0 %v7854_v4, %s4696_s2  ;;  %1534 = vrot.lane.b32.xlu1 %v1365_v10, %s4696_s2  ;;  %v1666_v22 = vmax.f32 %v7920_v55, %v1475_v54  ;;  %v7921_v4 = vmax.f32 %v5514_v61, 0.0  ;;  %v723_v54 = vadd.f32 %v722_v37, %v7922_v23  ;;  %v7924_v37 = vmax.f32 %v5557_v20, 0.0 }
 0x25e   :  { %v1068_v38 = vpop.f32.mrf.mxu0  ;;  %v1175_v57 = vpop.f32.mrf.mxu1 }
 0x25f   :  { %v1240_v62 = vadd.f32 %v1068_v38, %v720_v32  ;;  %v1241_v25 = vadd.f32 %v1175_v57, %v827_v14  ;;  %v1665_v21 = vmax.f32 %v7921_v4, %v1566_v60  ;;  %v1479_v32 = vpop.permute.xlu0 %1478  ;;  %v725_v61 = vpop.f32.mrf.mxu2  ;;  %v7923_v4 = vld [vmem:[#allocation15_spill] sm:$0xff] }
 0x260   :  { %v830_v38 = vadd.f32 %v829_v27, %v7923_v4  ;;  %v1567_v57 = vsel %vm1556_vm4, %v1477_v8, %v1479_v32 }
 0x261   :  { %v5950_v31 = vadd.f32 %v5307_v33, %v1240_v62  ;;  %v5955_v44 = vadd.f32 %v5315_v39, %v1241_v25  ;;  %v832_v62 = vpop.f32.mrf.mxu3 }
 0x262   :  { %4366 = vmatmul.msk.f32.gmra.mxu3 %vm1734_vm5, %v1666_v22  ;;  %v1668_v22 = vmax.f32 %v7924_v37, %v1479_v32  ;;  %v7927_v32 = vld [vmem:[#allocation17_spill] sm:$0xff] }
 0x263   :  { %v7856_v6 = vmax.f32 %v5950_v31, 0.0  ;;  %1868 = vmatmul.f32.gmra.mxu2 %v1665_v21  ;;  %v7857_v14 = vmax.f32 %v5955_v44, 0.0  ;;  %v7949_v11 = vmax.f32 %v5950_v31, 0.0 }
 0x265   :  { %1536 = vrot.lane.b32.xlu2 %v7856_v6, %s4696_s2  ;;  %1538 = vrot.lane.b32.xlu0 %v7857_v14, %s4696_s2  ;;  %v7925_v6 = vmax.f32 %v5553_v29, 0.0  ;;  %v833_v29 = vadd.f32 %v832_v62, %v7927_v32  ;;  %v7929_v62 = vmax.f32 %v5601_v9, 0.0  ;;  %v7931_v9 = vld [vmem:[#allocation19_spill] sm:$0xff] }
 0x266   :  { %v1071_v60 = vpop.f32.mrf.mxu0  ;;  %v1178_v25 = vpop.f32.mrf.mxu1 }
 0x267   :  { %v1242_v21 = vadd.f32 %v1071_v60, %v723_v54  ;;  %v1243_v55 = vadd.f32 %v1178_v25, %v830_v38  ;;  %v1667_v27 = vmax.f32 %v7925_v6, %v1567_v57  ;;  %v1481_v14 = vpop.permute.xlu1 %1480  ;;  %v7926_v38 = vld [vmem:[#allocation16_spill] sm:$0xff]  ;;  %v1483_v6 = vpop.permute.xlu2 %1482 }
 0x268   :  { %v726_v20 = vadd.f32 %v725_v61, %v7926_v38  ;;  %v1568_v57 = vsel %vm1556_vm4, %v1481_v14, %v1483_v6  ;;  %v7928_v61 = vmax.f32 %v5605_v28, 0.0  ;;  %v7930_v28 = vld [vmem:[#allocation18_spill] sm:$0xff] }
 0x269   :  { %v5972_v23 = vadd.f32 %v5307_v33, %v1242_v21  ;;  %v5977_v4 = vadd.f32 %v5315_v39, %v1243_v55  ;;  %v728_v55 = vpop.f32.mrf.mxu2  ;;  %v1669_v32 = vmax.f32 %v7929_v62, %v1568_v57 }
 0x26a   :  { %4367 = vmatmul.msk.f32.gmra.mxu3 %vm1734_vm5, %v1668_v22  ;;  %v835_v22 = vpop.f32.mrf.mxu3 }
 0x26b   :  { %v7858_v8 = vmax.f32 %v5972_v23, 0.0  ;;  %1871 = vmatmul.f32.gmra.mxu2 %v1667_v27  ;;  %v7859_v54 = vmax.f32 %v5977_v4, 0.0  ;;  %v1670_v27 = vmax.f32 %v7928_v61, %v1483_v6  ;;  %v729_v6 = vadd.f32 %v728_v55, %v7930_v28 }
 0x26c   :  { %v7933_v28 = vmax.f32 %v5649_v35, 0.0  ;;  %v7935_v35 = vld [vmem:[#allocation21_spill] sm:$0xff] }
 0x26d   :  { %1540 = vrot.lane.b32.xlu1 %v7858_v8, %s4696_s2  ;;  %1542 = vrot.lane.b32.xlu2 %v7859_v54, %s4696_s2 }
 0x26e   :  { %v1074_v60 = vpop.f32.mrf.mxu0  ;;  %v1181_v25 = vpop.f32.mrf.mxu1 }
 0x26f   :  { %v1244_v21 = vadd.f32 %v1074_v60, %v726_v20  ;;  %v1245_v37 = vadd.f32 %v1181_v25, %v833_v29  ;;  %v1485_v54 = vpop.permute.xlu0 %1484  ;;  %v1487_v20 = vpop.permute.xlu1 %1486  ;;  %v836_v60 = vadd.f32 %v835_v22, %v7931_v9 }
 0x271   :  { %v5994_v38 = vadd.f32 %v5307_v33, %v1244_v21  ;;  %v5999_v8 = vadd.f32 %v5315_v39, %v1245_v37  ;;  %v1569_v21 = vsel %vm1556_vm4, %v1485_v54, %v1487_v20 }
 0x272   :  { %4368 = vmatmul.msk.f32.gmra.mxu3 %vm1734_vm5, %v1670_v27  ;;  %v7932_v27 = vmax.f32 %v5653_v3, 0.0  ;;  %v1671_v22 = vmax.f32 %v7933_v28, %v1569_v21  ;;  %v7936_v28 = vmax.f32 %v5688_v45, 0.0 }
 0x273   :  { %v7860_v14 = vmax.f32 %v5994_v38, 0.0  ;;  %1874 = vmatmul.f32.gmra.mxu2 %v1669_v32  ;;  %v1371_v29 = vmax.f32 %v5999_v8, 0.0  ;;  %v731_v32 = vpop.f32.mrf.mxu2 }
 0x274   :  { %v1672_v62 = vmax.f32 %v7932_v27, %v1487_v20  ;;  %v7934_v20 = vld [vmem:[#allocation20_spill] sm:$0xff] }
 0x275   :  { %1544 = vrot.lane.b32.xlu0 %v7860_v14, %s4696_s2  ;;  %1546 = vrot.lane.b32.xlu1 %v1371_v29, %s4696_s2  ;;  %v838_v14 = vpop.f32.mrf.mxu3 }
 0x276   :  { %v1077_v57 = vpop.f32.mrf.mxu0  ;;  %v1184_v37 = vpop.f32.mrf.mxu1  ;;  %v839_v21 = vadd.f32 %v838_v14, %v7935_v35 }
 0x277   :  { %v1246_v25 = vadd.f32 %v1077_v57, %v729_v6  ;;  %v1247_v61 = vadd.f32 %v1184_v37, %v836_v60  ;;  %v1489_v6 = vpop.permute.xlu2 %1488  ;;  %v1491_v60 = vpop.permute.xlu0 %1490  ;;  %v732_v57 = vadd.f32 %v731_v32, %v7934_v20  ;;  %v7937_v20 = vmax.f32 %v5684_v0, 0.0 }
 0x278   :  { %v1570_v37 = vsel %vm1556_vm4, %v1489_v6, %v1491_v60  ;;  %v7938_v0 = vmax.f32 %v5709_v47, 0.0 }
 0x279   :  { %v6016_v55 = vadd.f32 %v5307_v33, %v1246_v25  ;;  %v6021_v9 = vadd.f32 %v5315_v39, %v1247_v61 }
 0x27a   :  { %4369 = vmatmul.msk.f32.gmra.mxu3 %vm1734_vm5, %v1672_v62 }
 0x27b   :  { %v7861_v54 = vmax.f32 %v6016_v55, 0.0  ;;  %1877 = vmatmul.f32.gmra.mxu2 %v1671_v22  ;;  %v1373_v3 = vmax.f32 %v6021_v9, 0.0  ;;  %v1674_v22 = vmax.f32 %v7936_v28, %v1491_v60  ;;  %v7939_v60 = vmax.f32 %v5704_v46, 0.0 }
 0x27d   :  { %1548 = vrot.lane.b32.xlu2 %v7861_v54, %s4696_s2  ;;  %1550 = vrot.lane.b32.xlu0 %v1373_v3, %s4696_s2  ;;  %v1673_v54 = vmax.f32 %v7937_v20, %v1570_v37  ;;  %v7941_v20 = vmax.f32 %v5746_v50, 0.0 }
 0x27e   :  { %v1080_v25 = vpop.f32.mrf.mxu0  ;;  %v1187_v27 = vpop.f32.mrf.mxu1 }
 0x27f   :  { %v1248_v61 = vadd.f32 %v1080_v25, %v732_v57  ;;  %v1249_v62 = vadd.f32 %v1187_v27, %v839_v21  ;;  %v1493_v35 = vpop.permute.xlu1 %1492  ;;  %v7940_v27 = vmax.f32 %v5724_v17, 0.0 }
 0x281   :  { %v6038_v32 = vadd.f32 %v5307_v33, %v1248_v61  ;;  %v6043_v14 = vadd.f32 %v5315_v39, %v1249_v62  ;;  %v1495_v33 = vpop.permute.xlu2 %1494 }
 0x282   :  { %4370 = vmatmul.msk.f32.gmra.mxu3 %vm1734_vm5, %v1674_v22  ;;  %v1571_v39 = vsel %vm1556_vm4, %v1493_v35, %v1495_v33  ;;  %v1676_v45 = vmax.f32 %v7938_v0, %v1495_v33 }
 0x283   :  { %v1374_v6 = vmax.f32 %v6038_v32, 0.0  ;;  %1880 = vmatmul.f32.gmra.mxu2 %v1673_v54  ;;  %v1375_v57 = vmax.f32 %v6043_v14, 0.0  ;;  %v1675_v21 = vmax.f32 %v7939_v60, %v1571_v39 }
 0x285   :  { %1552 = vrot.lane.b32.xlu1 %v1374_v6, %s4696_s2  ;;  %1554 = vrot.lane.b32.xlu2 %v1375_v57, %s4696_s2 }
 0x287   :  { %v1497_v54 = vpop.permute.xlu0 %1496  ;;  %v1499_v25 = vpop.permute.xlu1 %1498 }
 0x288   :  { %v1572_v37 = vsel %vm1556_vm4, %v1497_v54, %v1499_v25  ;;  %v1678_v61 = vmax.f32 %v1347_v53, %v1499_v25 }
 0x289   :  { %v1677_v62 = vmax.f32 %v7940_v27, %v1572_v37  ;;  %v1501_v47 = vpop.permute.xlu2 %1500 }
 0x28a   :  { %4371 = vmatmul.msk.f32.gmra.mxu3 %vm1734_vm5, %v1676_v45 }
 0x28b   :  { %1883 = vmatmul.f32.gmra.mxu2 %v1675_v21 }
 0x28f   :  { %v1503_v28 = vpop.permute.xlu0 %1502 }
 0x290   :  { %v1573_v46 = vsel %vm1556_vm4, %v1501_v47, %v1503_v28  ;;  %v1680_v22 = vmax.f32 %v1349_v16, %v1503_v28 }
 0x291   :  { %v1679_v35 = vmax.f32 %v7941_v20, %v1573_v46  ;;  %v1507_v51 = vpop.permute.xlu2 %1506 }
 0x292   :  { %4372 = vmatmul.msk.f32.gmra.mxu3 %vm1734_vm5, %v1678_v61  ;;  %v1682_v45 = vmax.f32 %v1351_v40, %v1507_v51 }
 0x293   :  { %1886 = vmatmul.f32.gmra.mxu2 %v1677_v62 }
 0x297   :  { %v1505_v33 = vpop.permute.xlu1 %1504 }
 0x298   :  { %v1574_v53 = vsel %vm1556_vm4, %v1505_v33, %v1507_v51 }
 0x299   :  { %v1681_v15 = vmax.f32 %v1350_v36, %v1574_v53  ;;  %v1513_v40 = vpop.permute.xlu2 %1512 }
 0x29a   :  { %4373 = vmatmul.msk.f32.gmra.mxu3 %vm1734_vm5, %v1680_v22 }
 0x29b   :  { %1889 = vmatmul.f32.gmra.mxu2 %v1679_v35 }
 0x29d   :  { %v1949_v17 = vpop.f32.mrf.mxu3 }
 0x29e   :  { %v1842_v39 = vpop.f32.mrf.mxu2 }
 0x29f   :  { %v6073_v0 = vadd.f32 %v1949_v17, %v1842_v39  ;;  %v1509_v16 = vpop.permute.xlu0 %1508  ;;  %v1511_v50 = vpop.permute.xlu1 %1510 }
 0x2a0   :  { %v1575_v21 = vsel %vm1556_vm4, %v1509_v16, %v1511_v50  ;;  %v1684_v37 = vmax.f32 %v1353_v42, %v1511_v50 }
 0x2a1   :  { %v2070_v41 = vrot.slane %v6073_v0, 1  ;;  %v1683_v59 = vmax.f32 %v1352_v30, %v1575_v21  ;;  %v1519_v33 = vpop.permute.xlu2 %1518  ;;  %v7943_v21 = vmax.f32 %v5862_v7, 0.0  ;;  %v7944_v7 = vmax.f32 %v5889_v26, 0.0 }
 0x2a2   :  { %4374 = vmatmul.msk.f32.gmra.mxu3 %vm1734_vm5, %v1682_v45  ;;  %v1688_v13 = vmax.f32 %v1357_v5, %v1519_v33 }
 0x2a3   :  { %1892 = vmatmul.f32.gmra.mxu2 %v1681_v15 }
 0x2a5   :  { %v1952_v60 = vpop.f32.mrf.mxu3 }
 0x2a6   :  { %v1845_v54 = vpop.f32.mrf.mxu2 }
 0x2a7   :  { %v6081_v25 = vadd.f32 %v1952_v60, %v1845_v54  ;;  %v1515_v61 = vpop.permute.xlu0 %1514 }
 0x2a8   :  { %v1576_v62 = vsel %vm1556_vm4, %v1513_v40, %v1515_v61  ;;  %v1686_v43 = vmax.f32 %v1355_v34, %v1515_v61 }
 0x2a9   :  { %v2071_v36 = vrot.slane %v6081_v25, 1  ;;  %v1685_v30 = vmax.f32 %v1354_v52, %v1576_v62 }
 0x2aa   :  { %4375 = vmatmul.msk.f32.gmra.mxu3 %vm1734_vm5, %v1684_v37 }
 0x2ab   :  { %1895 = vmatmul.f32.gmra.mxu2 %v1683_v59  ;;  %v6091_v27 = vsel %vm2069_vm6, %v2070_v41, %v2071_v36  ;;  %v1525_v41 = vpop.permute.xlu2 %1524 }
 0x2ac   :  { %v2159_v19 = vmax.f32 %v6073_v0, %v6091_v27 }
 0x2ad   :  { %v1955_v42 = vpop.f32.mrf.mxu3 }
 0x2ae   :  { %v1848_v47 = vpop.f32.mrf.mxu2 }
 0x2af   :  { %v6096_v28 = vadd.f32 %v1955_v42, %v1848_v47  ;;  %v1517_v22 = vpop.permute.xlu1 %1516 }
 0x2b0   :  { %v1577_v12 = vsel %vm1556_vm4, %v1517_v22, %v1519_v33 }
 0x2b1   :  { %v2073_v46 = vrot.slane %v6096_v28, 1  ;;  %v1687_v52 = vmax.f32 %v1356_v1, %v1577_v12 }
 0x2b2   :  { %4376 = vmatmul.msk.f32.gmra.mxu3 %vm1734_vm5, %v1686_v43  ;;  %v7945_v43 = vmax.f32 %v5884_v24, 0.0 }
 0x2b3   :  { %1898 = vmatmul.f32.gmra.mxu2 %v1685_v30  ;;  %v6105_v20 = vsel %vm2069_vm6, %v2071_v36, %v2073_v46  ;;  %v1531_v12 = vpop.permute.xlu2 %1530 }
 0x2b4   :  { %v2160_v35 = vmax.f32 %v6081_v25, %v6105_v20 }
 0x2b5   :  { %v1958_v51 = vpop.f32.mrf.mxu3 }
 0x2b6   :  { %v1851_v34 = vpop.f32.mrf.mxu2 }
 0x2b7   :  { %v6110_v17 = vadd.f32 %v1958_v51, %v1851_v34  ;;  %v1521_v39 = vpop.permute.xlu0 %1520  ;;  %v1523_v45 = vpop.permute.xlu1 %1522 }
 0x2b8   :  { %v1578_v18 = vsel %vm1556_vm4, %v1521_v39, %v1523_v45  ;;  %v1690_v1 = vmax.f32 %v7942_v49, %v1523_v45 }
 0x2b9   :  { %v2075_v53 = vrot.slane %v6110_v17, 1  ;;  %v1689_v54 = vmax.f32 %v7943_v21, %v1578_v18 }
 0x2ba   :  { %4377 = vmatmul.msk.f32.gmra.mxu3 %vm1734_vm5, %v1688_v13  ;;  %v1694_v13 = vmax.f32 %v1363_v2, %v1531_v12 }
 0x2bb   :  { %1901 = vmatmul.f32.gmra.mxu2 %v1687_v52  ;;  %v6119_v15 = vsel %vm2069_vm6, %v2073_v46, %v2075_v53  ;;  %v7946_v52 = vmax.f32 %v5906_v63, 0.0 }
 0x2bc   :  { %v2161_v16 = vmax.f32 %v6096_v28, %v6119_v15 }
 0x2bd   :  { %v1961_v50 = vpop.f32.mrf.mxu3 }
 0x2be   :  { %v1854_v5 = vpop.f32.mrf.mxu2 }
 0x2bf   :  { %v6124_v60 = vadd.f32 %v1961_v50, %v1854_v5  ;;  %v1527_v59 = vpop.permute.xlu0 %1526  ;;  %v1537_v63 = vpop.permute.xlu2 %1536 }
 0x2c0   :  { %v1579_v56 = vsel %vm1556_vm4, %v1525_v41, %v1527_v59  ;;  %v1692_v47 = vmax.f32 %v7944_v7, %v1527_v59  ;;  %v7948_v41 = vmax.f32 %v5955_v44, 0.0 }
 0x2c1   :  { %v2077_v37 = vrot.slane %v6124_v60, 1  ;;  %v1691_v30 = vmax.f32 %v7945_v43, %v1579_v56 }
 0x2c2   :  { %4378 = vmatmul.msk.f32.gmra.mxu3 %vm1734_vm5, %v1690_v1 }
 0x2c3   :  { %1904 = vmatmul.f32.gmra.mxu2 %v1689_v54  ;;  %v6133_v36 = vsel %vm2069_vm6, %v2075_v53, %v2077_v37 }
 0x2c4   :  { %v2162_v40 = vmax.f32 %v6110_v17, %v6133_v36 }
 0x2c5   :  { %v1964_v61 = vpop.f32.mrf.mxu3 }
 0x2c6   :  { %v1857_v42 = vpop.f32.mrf.mxu2 }
 0x2c7   :  { %v6138_v62 = vadd.f32 %v1964_v61, %v1857_v42  ;;  %v1529_v22 = vpop.permute.xlu1 %1528  ;;  %v1543_v48 = vpop.permute.xlu2 %1542 }
 0x2c8   :  { %v1580_v24 = vsel %vm1556_vm4, %v1529_v22, %v1531_v12 }
 0x2c9   :  { %v2079_v46 = vrot.slane %v6138_v62, 1  ;;  %v1693_v53 = vmax.f32 %v7946_v52, %v1580_v24 }
 0x2ca   :  { %4379 = vmatmul.msk.f32.gmra.mxu3 %vm1734_vm5, %v1692_v47  ;;  %v7950_v47 = vmax.f32 %v5977_v4, 0.0 }
 0x2cb   :  { %1907 = vmatmul.f32.gmra.mxu2 %v1691_v30  ;;  %v6149_v33 = vsel %vm2069_vm6, %v2077_v37, %v2079_v46  ;;  %v7951_v30 = vmax.f32 %v5972_v23, 0.0 }
 0x2cc   :  { %v2163_v51 = vmax.f32 %v6124_v60, %v6149_v33  ;;  %v1700_v43 = vmax.f32 %v7950_v47, %v1543_v48 }
 0x2cd   :  { %v6153_v26 = vpop.f32.mrf.mxu3 }
 0x2ce   :  { %v6156_v34 = vpop.f32.mrf.mxu2 }
 0x2cf   :  { %v1533_v39 = vpop.permute.xlu0 %1532  ;;  %v1535_v45 = vpop.permute.xlu1 %1534 }
 0x2d0   :  { %v1581_v18 = vsel %vm1556_vm4, %v1533_v39, %v1535_v45  ;;  %v1696_v49 = vmax.f32 %v1365_v10, %v1535_v45 }
 0x2d1   :  { %v1695_v2 = vmax.f32 %v7947_v58, %v1581_v18 }
 0x2d2   :  { %4380 = vmatmul.msk.f32.gmra.mxu3 %vm1734_vm5, %v1694_v13 }
 0x2d3   :  { %1910 = vmatmul.f32.gmra.mxu2 %v1693_v53  ;;  %v7952_v53 = vmax.f32 %v5994_v38, 0.0 }
 0x2d5   :  { %v6163_v50 = vpop.f32.mrf.mxu3 }
 0x2d6   :  { %v6166_v5 = vpop.f32.mrf.mxu2 }
 0x2d7   :  { %v1539_v1 = vpop.permute.xlu0 %1538  ;;  %v1549_v4 = vpop.permute.xlu2 %1548 }
 0x2d8   :  { %v1582_v54 = vsel %vm1556_vm4, %v1537_v63, %v1539_v1  ;;  %v1698_v59 = vmax.f32 %v7948_v41, %v1539_v1 }
 0x2d9   :  { %v1697_v10 = vmax.f32 %v7949_v11, %v1582_v54 }
 0x2da   :  { %4381 = vmatmul.msk.f32.gmra.mxu3 %vm1734_vm5, %v1696_v49 }
 0x2db   :  { %1913 = vmatmul.f32.gmra.mxu2 %v1695_v2  ;;  %v7953_v2 = vmax.f32 %v6016_v55, 0.0 }
 0x2dd   :  { %v6173_v21 = vpop.f32.mrf.mxu3 }
 0x2de   :  { %v6176_v37 = vpop.f32.mrf.mxu2 }
 0x2df   :  { %v1541_v61 = vpop.permute.xlu1 %1540  ;;  %v1555_v38 = vpop.permute.xlu2 %1554 }
 0x2e0   :  { %v1583_v42 = vsel %vm1556_vm4, %v1541_v61, %v1543_v48  ;;  %v1706_v41 = vmax.f32 %v1375_v57, %v1555_v38 }
 0x2e1   :  { %v1699_v22 = vmax.f32 %v7951_v30, %v1583_v42 }
 0x2e2   :  { %4382 = vmatmul.msk.f32.gmra.mxu3 %vm1734_vm5, %v1698_v59 }
 0x2e3   :  { %1916 = vmatmul.f32.gmra.mxu2 %v1697_v10 }
 0x2e5   :  { %v1976_v56 = vpop.f32.mrf.mxu3 }
 0x2e6   :  { %v1869_v7 = vpop.f32.mrf.mxu2 }
 0x2e7   :  { %v1545_v44 = vpop.permute.xlu0 %1544  ;;  %v1547_v31 = vpop.permute.xlu1 %1546 }
 0x2e8   :  { %v1584_v24 = vsel %vm1556_vm4, %v1545_v44, %v1547_v31  ;;  %v1702_v52 = vmax.f32 %v1371_v29, %v1547_v31 }
 0x2e9   :  { %v1701_v39 = vmax.f32 %v7952_v53, %v1584_v24 }
 0x2ea   :  { %4383 = vmatmul.msk.f32.gmra.mxu3 %vm1734_vm5, %v1700_v43 }
 0x2eb   :  { %1919 = vmatmul.f32.gmra.mxu2 %v1699_v22 }
 0x2ed   :  { %v1979_v12 = vpop.f32.mrf.mxu3 }
 0x2ee   :  { %v1872_v13 = vpop.f32.mrf.mxu2 }
 0x2ef   :  { %v1551_v23 = vpop.permute.xlu0 %1550 }
 0x2f0   :  { %v1585_v18 = vsel %vm1556_vm4, %v1549_v4, %v1551_v23  ;;  %v1704_v58 = vmax.f32 %v1373_v3, %v1551_v23 }
 0x2f1   :  { %v1703_v63 = vmax.f32 %v7953_v2, %v1585_v18 }
 0x2f2   :  { %4384 = vmatmul.msk.f32.gmra.mxu3 %vm1734_vm5, %v1702_v52 }
 0x2f3   :  { %1922 = vmatmul.f32.gmra.mxu2 %v1701_v39  ;;  %v1980_v39 = vadd.f32 %v1979_v12, %v1872_v13 }
 0x2f5   :  { %v1982_v45 = vpop.f32.mrf.mxu3 }
 0x2f6   :  { %v1875_v49 = vpop.f32.mrf.mxu2 }
 0x2f7   :  { %v1553_v8 = vpop.permute.xlu1 %1552  ;;  %v1983_v44 = vadd.f32 %v1982_v45, %v1875_v49 }
 0x2f8   :  { %v1586_v1 = vsel %vm1556_vm4, %v1553_v8, %v1555_v38 }
 0x2f9   :  { %v1705_v59 = vmax.f32 %v1374_v6, %v1586_v1  ;;  %v2091_v8 = vrot.slane %v1983_v44, 1  ;;  %v2089_v1 = vrot.slane %v1980_v39, 1 }
 0x2fa   :  { %4385 = vmatmul.msk.f32.gmra.mxu3 %vm1734_vm5, %v1704_v58 }
 0x2fb   :  { %1925 = vmatmul.f32.gmra.mxu2 %v1703_v63  ;;  %v1977_v63 = vadd.f32 %v1976_v56, %v1869_v7  ;;  %v1971_v56 = vadd.f32 %v6163_v50, %v6166_v5 }
 0x2fd   :  { %v1985_v29 = vpop.f32.mrf.mxu3  ;;  %v2087_v7 = vrot.slane %v1977_v63, 1 }
 0x2fe   :  { %v1878_v54 = vpop.f32.mrf.mxu2 }
 0x2ff   :  { %v1986_v57 = vadd.f32 %v1985_v29, %v1878_v54  ;;  %v1974_v29 = vadd.f32 %v6173_v21, %v6176_v37  ;;  %v2090_v50 = vsel %vm2069_vm6, %v2087_v7, %v2089_v1 }
 0x301   :  { %v2093_v4 = vrot.slane %v1986_v57, 1 }
 0x302   :  { %4386 = vmatmul.msk.f32.gmra.mxu3 %vm1734_vm5, %v1706_v41  ;;  %v2092_v41 = vsel %vm2069_vm6, %v2089_v1, %v2091_v8 }
 0x303   :  { %1928 = vmatmul.f32.gmra.mxu2 %v1705_v59  ;;  %v2094_v13 = vsel %vm2069_vm6, %v2091_v8, %v2093_v4 }
 0x304   :  { %v2170_v21 = vmax.f32 %v1983_v44, %v2094_v13 }
 0x305   :  { %v1988_v55 = vpop.f32.mrf.mxu3 }
 0x306   :  { %v1881_v9 = vpop.f32.mrf.mxu2 }
 0x307   :  { %v1989_v30 = vadd.f32 %v1988_v55, %v1881_v9  ;;  %v1968_v55 = vadd.f32 %v6153_v26, %v6156_v34  ;;  %v2085_v9 = vrot.slane %v1974_v29, 1 }
 0x309   :  { %v2095_v31 = vrot.slane %v1989_v30, 1 }
 0x30b   :  { %v2096_v45 = vsel %vm2069_vm6, %v2093_v4, %v2095_v31  ;;  %v2208_v4 = vld [vmem:[%s7808_s4] sm:$0xff] }
 0x30c   :  { %v2171_v54 = vmax.f32 %v1986_v57, %v2096_v45 }
 0x30d   :  { %v1991_v3 = vpop.f32.mrf.mxu3 }
 0x30e   :  { %v1884_v11 = vpop.f32.mrf.mxu2 }
 0x30f   :  { %v1992_v42 = vadd.f32 %v1991_v3, %v1884_v11  ;;  %v2169_v11 = vmax.f32 %v1980_v39, %v2092_v41 }
 0x311   :  { %v2097_v32 = vrot.slane %v1992_v42, 1 }
 0x313   :  { %v2098_v18 = vsel %vm2069_vm6, %v2095_v31, %v2097_v32 }
 0x314   :  { %v2172_v49 = vmax.f32 %v1989_v30, %v2098_v18 }
 0x315   :  { %v1994_v10 = vpop.f32.mrf.mxu3 }
 0x316   :  { %v1887_v61 = vpop.f32.mrf.mxu2 }
 0x317   :  { %v1995_v48 = vadd.f32 %v1994_v10, %v1887_v61  ;;  %v2083_v10 = vrot.slane %v1971_v56, 1  ;;  %v2088_v61 = vsel %vm2069_vm6, %v2085_v9, %v2087_v7 }
 0x319   :  { %v2099_v22 = vrot.slane %v1995_v48, 1 }
 0x31b   :  { %v2100_v52 = vsel %vm2069_vm6, %v2097_v32, %v2099_v22 }
 0x31c   :  { %v2173_v2 = vmax.f32 %v1992_v42, %v2100_v52  ;;  %v2081_v42 = vrot.slane %v1968_v55, 1 }
 0x31d   :  { %v1997_v47 = vpop.f32.mrf.mxu3 }
 0x31e   :  { %v1890_v43 = vpop.f32.mrf.mxu2  ;;  %v2084_v26 = vsel %vm2069_vm6, %v2081_v42, %v2083_v10 }
 0x31f   :  { %v6207_v14 = vadd.f32 %v1997_v47, %v1890_v43  ;;  %v2086_v47 = vsel %vm2069_vm6, %v2083_v10, %v2085_v9  ;;  %v2167_v43 = vmax.f32 %v1974_v29, %v2088_v61  ;;  %v2165_v32 = vmax.f32 %v1968_v55, %v2084_v26 }
 0x320   :  { %v2166_v34 = vmax.f32 %v1971_v56, %v2086_v47 }
 0x321   :  { %v2101_v6 = vrot.slane %v6207_v14, 1 }
 0x323   :  { %v2102_v24 = vsel %vm2069_vm6, %v2099_v22, %v2101_v6  ;;  %v2082_v22 = vsel %vm2069_vm6, %v2079_v46, %v2081_v42 }
 0x324   :  { %v2174_v53 = vmax.f32 %v1995_v48, %v2102_v24  ;;  %v2168_v48 = vmax.f32 %v1977_v63, %v2090_v50 }
 0x325   :  { %v2000_v23 = vpop.f32.mrf.mxu3 }
 0x326   :  { %v1893_v58 = vpop.f32.mrf.mxu2  ;;  %2292 = vmatpush.msrb.mxu0 %v2174_v53 }
 0x327   :  { %v6213_v38 = vadd.f32 %v2000_v23, %v1893_v58 }
 0x328   :  { %2293 = vmatpush.msrb.mxu0 %v2173_v2 }
 0x329   :  { %v2103_v12 = vrot.slane %v6213_v38, 1 }
 0x32a   :  { %2294 = vmatpush.msrb.mxu0 %v2172_v49 }
 0x32b   :  { %v6226_v59 = vsel %vm2069_vm6, %v2101_v6, %v2103_v12  ;;  %v2164_v6 = vmax.f32 %v6138_v62, %v2082_v22  ;;  %v2212_v22 = vld [vmem:[%s7808_s4 + $0x20] sm:$0xff] }
 0x32c   :  { %2295 = vmatpush.msrb.mxu0 %v2171_v54  ;;  %v2175_v37 = vmax.f32 %v6207_v14, %v6226_v59  ;;  %v2210_v54 = vld [vmem:[%s7808_s4 + $0x10] sm:$0xff]  ;;  %v2220_v14 = vld [vmem:[%s7808_s4 + $0x60] sm:$0xff]  ;;  %v2215_v59 = vld [vmem:[%s7808_s4 + $0x38] sm:$0xff] }
 0x32d   :  { %v6232_v3 = vpop.f32.mrf.mxu3 }
 0x32e   :  { %v6235_v5 = vpop.f32.mrf.mxu2  ;;  %2296 = vmatpush.msrb.mxu0 %v2170_v21 }
 0x330   :  { %2297 = vmatpush.msrb.mxu0 %v2169_v11 }
 0x332   :  { %2298 = vmatpush.msrb.mxu0 %v2168_v48 }
 0x334   :  { %2299 = vmatpush.msrb.mxu0 %v2167_v43 }
 0x335   :  { %v6240_v30 = vpop.f32.mrf.mxu3 }
 0x336   :  { %v6245_v57 = vpop.f32.mrf.mxu2  ;;  %2300 = vmatpush.msrb.mxu0 %v2166_v34 }
 0x338   :  { %2301 = vmatpush.msrb.mxu0 %v2165_v32  ;;  %v2007_v32 = vadd.f32 %v6240_v30, %v6245_v57 }
 0x33a   :  { %2302 = vmatpush.msrb.mxu0 %v2164_v6 }
 0x33c   :  { %2303 = vmatpush.msrb.mxu0 %v2163_v51 }
 0x33d   :  { %v2009_v44 = vpop.f32.mrf.mxu3 }
 0x33e   :  { %v1902_v31 = vpop.f32.mrf.mxu2  ;;  %2304 = vmatpush.msrb.mxu0 %v2162_v40 }
 0x33f   :  { %v2010_v47 = vadd.f32 %v2009_v44, %v1902_v31  ;;  %v2004_v44 = vadd.f32 %v6232_v3, %v6235_v5  ;;  %v2214_v3 = vld [vmem:[%s7808_s4 + $0x30] sm:$0xff] }
 0x340   :  { %2305 = vmatpush.msrb.mxu0 %v2161_v16 }
 0x341   :  { %v2109_v31 = vrot.slane %v2010_v47, 1  ;;  %v2105_v30 = vrot.slane %v2004_v44, 1 }
 0x342   :  { %2306 = vmatpush.msrb.mxu0 %v2160_v35 }
 0x344   :  { %2307 = vmatpush.msrb.mxu0 %v2159_v19 }
 0x345   :  { %v2012_v60 = vpop.f32.mrf.mxu3  ;;  %2308 = vmatmul.f32.vlgmr.msrb.gmra.mxu0 %v2208_v4  ;;  %v2223_v4 = vld [vmem:[%s7808_s4 + $0x78] sm:$0xff] }
 0x346   :  { %v1905_v62 = vpop.f32.mrf.mxu2 }
 0x347   :  { %v2013_v10 = vadd.f32 %v2012_v60, %v1905_v62 }
 0x349   :  { %v2111_v6 = vrot.slane %v2013_v10, 1 }
 0x34d   :  { %v2015_v46 = vpop.f32.mrf.mxu3  ;;  %2311 = vmatmul.f32.gmra.mxu0 %v2210_v54  ;;  %v2480_v54 = vld [vmem:[%s7809_s5 + $0xd0] sm:$0xff] }
 0x34e   :  { %v1908_v33 = vpop.f32.mrf.mxu2  ;;  %2755 = vmatpush.msra.mxu0 %v2480_v54 }
 0x34f   :  { %v2016_v55 = vadd.f32 %v2015_v46, %v1908_v33 }
 0x351   :  { %v2113_v43 = vrot.slane %v2016_v55, 1 }
 0x353   :  { %v2114_v46 = vsel %vm2069_vm6, %v2111_v6, %v2113_v43 }
 0x355   :  { %v2018_v51 = vpop.f32.mrf.mxu3  ;;  %2314 = vmatmul.f32.gmra.mxu0 %v2212_v22  ;;  %v2233_v22 = vld [vmem:[%s7808_s4 + $0xc8] sm:$0xff] }
 0x356   :  { %v1911_v24 = vpop.f32.mrf.mxu2 }
 0x357   :  { %v2019_v56 = vadd.f32 %v2018_v51, %v1911_v24  ;;  %v2107_v51 = vrot.slane %v2007_v32, 1  ;;  %v2112_v24 = vsel %vm2069_vm6, %v2109_v31, %v2111_v6  ;;  %v2470_v6 = vld [vmem:[%s7809_s5 + $0x80] sm:$0xff] }
 0x359   :  { %v2115_v61 = vrot.slane %v2019_v56, 1  ;;  %v2110_v57 = vsel %vm2069_vm6, %v2107_v51, %v2109_v31  ;;  %v2108_v5 = vsel %vm2069_vm6, %v2105_v30, %v2107_v51  ;;  %v4423_v31 = vld [vmem:[%s7809_s5 + $0x178] sm:$0xff] }
 0x35a   :  { %v2469_v51 = vld [vmem:[%s7809_s5 + $0x78] sm:$0xff] }
 0x35b   :  { %v2116_v60 = vsel %vm2069_vm6, %v2113_v43, %v2115_v61  ;;  %v2475_v43 = vld [vmem:[%s7809_s5 + $0xa8] sm:$0xff] }
 0x35c   :  { %v2181_v33 = vmax.f32 %v2016_v55, %v2116_v60  ;;  %v2238_v55 = vld [vmem:[%s7808_s4 + $0xf0] sm:$0xff]  ;;  %v2471_v60 = vld [vmem:[%s7809_s5 + $0x88] sm:$0xff] }
 0x35d   :  { %v2021_v17 = vpop.f32.mrf.mxu3  ;;  %2317 = vmatmul.f32.gmra.mxu0 %v2214_v3  ;;  %v4416_v3 = vld [vmem:[%s7809_s5 + $0x140] sm:$0xff] }
 0x35e   :  { %v1914_v36 = vpop.f32.mrf.mxu2 }
 0x35f   :  { %v2022_v49 = vadd.f32 %v2021_v17, %v1914_v36  ;;  %v2180_v17 = vmax.f32 %v2013_v10, %v2114_v46  ;;  %v2179_v36 = vmax.f32 %v2010_v47, %v2112_v24  ;;  %v4427_v10 = vld [vmem:[%s7809_s5 + $0x198] sm:$0xff]  ;;  %v2474_v47 = vld [vmem:[%s7809_s5 + $0xa0] sm:$0xff] }
 0x360   :  { %v4420_v46 = vld [vmem:[%s7809_s5 + $0x160] sm:$0xff] }
 0x361   :  { %v2117_v9 = vrot.slane %v2022_v49, 1  ;;  %v2466_v24 = vld [vmem:[%s7809_s5 + $0x60] sm:$0xff] }
 0x363   :  { %v2118_v26 = vsel %vm2069_vm6, %v2115_v61, %v2117_v9  ;;  %v4424_v61 = vld [vmem:[%s7809_s5 + $0x180] sm:$0xff] }
 0x364   :  { %v2182_v62 = vmax.f32 %v2019_v56, %v2118_v26  ;;  %v2481_v56 = vld [vmem:[%s7809_s5 + $0xd8] sm:$0xff]  ;;  %v2472_v26 = vld [vmem:[%s7809_s5 + $0x90] sm:$0xff] }
 0x365   :  { %v2024_v40 = vpop.f32.mrf.mxu3 }
 0x366   :  { %v1917_v52 = vpop.f32.mrf.mxu2 }
 0x367   :  { %v2025_v2 = vadd.f32 %v2024_v40, %v1917_v52  ;;  %v2178_v40 = vmax.f32 %v2007_v32, %v2110_v57  ;;  %v2106_v52 = vsel %vm2069_vm6, %v2103_v12, %v2105_v30  ;;  %v2218_v12 = vld [vmem:[%s7808_s4 + $0x50] sm:$0xff]  ;;  %v4419_v30 = vld [vmem:[%s7809_s5 + $0x158] sm:$0xff]  ;;  %v2467_v57 = vld [vmem:[%s7809_s5 + $0x68] sm:$0xff] }
 0x369   :  { %v2119_v7 = vrot.slane %v2025_v2, 1 }
 0x36b   :  { %v2120_v48 = vsel %vm2069_vm6, %v2117_v9, %v2119_v7  ;;  %v2476_v9 = vld [vmem:[%s7809_s5 + $0xb0] sm:$0xff] }
 0x36c   :  { %v2183_v34 = vmax.f32 %v2022_v49, %v2120_v48  ;;  %v4430_v49 = vld [vmem:[%s7809_s5 + $0x1b0] sm:$0xff]  ;;  %v4425_v48 = vld [vmem:[%s7809_s5 + $0x188] sm:$0xff] }
 0x36d   :  { %v2027_v28 = vpop.f32.mrf.mxu3  ;;  %2577 = vmatpush.msra.mxu2 %v4430_v49  ;;  %v2455_v49 = vld [vmem:[%s7809_s5 + $0x8] sm:$0xff] }
 0x36e   :  { %v1920_v15 = vpop.f32.mrf.mxu2 }
 0x36f   :  { %v2028_v23 = vadd.f32 %v2027_v28, %v1920_v15  ;;  %v2177_v28 = vmax.f32 %v2004_v44, %v2108_v5  ;;  %v2176_v15 = vmax.f32 %v6213_v38, %v2106_v52  ;;  %v2211_v38 = vld [vmem:[%s7808_s4 + $0x18] sm:$0xff]  ;;  %v4422_v44 = vld [vmem:[%s7809_s5 + $0x170] sm:$0xff]  ;;  %v4417_v5 = vld [vmem:[%s7809_s5 + $0x148] sm:$0xff] }
 0x370   :  { %v2462_v52 = vld [vmem:[%s7809_s5 + $0x40] sm:$0xff] }
 0x371   :  { %v2121_v29 = vrot.slane %v2028_v23, 1 }
 0x373   :  { %v2122_v50 = vsel %vm2069_vm6, %v2119_v7, %v2121_v29  ;;  %v2478_v7 = vld [vmem:[%s7809_s5 + $0xc0] sm:$0xff] }
 0x374   :  { %v2184_v42 = vmax.f32 %v2025_v2, %v2122_v50  ;;  %v2227_v2 = vld [vmem:[%s7808_s4 + $0x98] sm:$0xff]  ;;  %2756 = vmatpush.msra.mxu0 %v2478_v7 }
 0x375   :  { %v2030_v16 = vpop.f32.mrf.mxu3  ;;  %v2477_v50 = vld [vmem:[%s7809_s5 + $0xb8] sm:$0xff] }
 0x376   :  { %v1923_v53 = vpop.f32.mrf.mxu2  ;;  %2757 = vmatpush.msra.mxu0 %v2476_v9 }
 0x377   :  { %v2031_v0 = vadd.f32 %v2030_v16, %v1923_v53  ;;  %v2209_v16 = vld [vmem:[%s7808_s4 + $0x8] sm:$0xff]  ;;  %v2216_v53 = vld [vmem:[%s7808_s4 + $0x40] sm:$0xff] }
 0x378   :  { %2320 = vmatmul.f32.gmra.mxu0 %v2216_v53  ;;  %v4414_v53 = vld [vmem:[%s7809_s5 + $0x130] sm:$0xff] }
 0x379   :  { %v2123_v63 = vrot.slane %v2031_v0, 1  ;;  %2758 = vmatpush.msra.mxu0 %v2474_v47 }
 0x37b   :  { %v2124_v41 = vsel %vm2069_vm6, %v2121_v29, %v2123_v63  ;;  %v4431_v29 = vld [vmem:[%s7809_s5 + $0x1b8] sm:$0xff]  ;;  %2759 = vmatpush.msra.mxu0 %v2472_v26 }
 0x37c   :  { %v2185_v11 = vmax.f32 %v2028_v23, %v2124_v41  ;;  %v2230_v23 = vld [vmem:[%s7808_s4 + $0xb0] sm:$0xff]  ;;  %2642 = vmatpush.msra.mxu3 %v4431_v29  ;;  %v2479_v41 = vld [vmem:[%s7809_s5 + $0xc8] sm:$0xff]  ;;  %v2239_v29 = vld [vmem:[%s7808_s4 + $0xf8] sm:$0xff] }
 0x37d   :  { %v2033_v25 = vpop.f32.mrf.mxu3  ;;  %2760 = vmatpush.msra.mxu0 %v2470_v6 }
 0x37e   :  { %v1926_v20 = vpop.f32.mrf.mxu2 }
 0x37f   :  { %v2034_v35 = vadd.f32 %v2033_v25, %v1926_v20  ;;  %v2213_v25 = vld [vmem:[%s7808_s4 + $0x28] sm:$0xff] }
 0x380   :  { %2323 = vmatmul.f32.gmra.mxu0 %v2218_v12  ;;  %v2217_v20 = vld [vmem:[%s7808_s4 + $0x48] sm:$0xff]  ;;  %v4412_v12 = vld [vmem:[%s7809_s5 + $0x120] sm:$0xff] }
 0x381   :  { %v2125_v18 = vrot.slane %v2034_v35, 1 }
 0x383   :  { %v2126_v13 = vsel %vm2069_vm6, %v2123_v63, %v2125_v18  ;;  %v2234_v63 = vld [vmem:[%s7808_s4 + $0xd0] sm:$0xff] }
 0x384   :  { %v2186_v21 = vmax.f32 %v2031_v0, %v2126_v13  ;;  %v2226_v0 = vld [vmem:[%s7808_s4 + $0x90] sm:$0xff]  ;;  %v4429_v13 = vld [vmem:[%s7809_s5 + $0x1a8] sm:$0xff] }
 0x385   :  { %v2036_v39 = vpop.f32.mrf.mxu3  ;;  %2643 = vmatpush.msra.mxu3 %v4429_v13 }
 0x386   :  { %v1929_v27 = vpop.f32.mrf.mxu2 }
 0x387   :  { %v2037_v19 = vadd.f32 %v2036_v39, %v1929_v27  ;;  %v2219_v39 = vld [vmem:[%s7808_s4 + $0x58] sm:$0xff]  ;;  %v2221_v27 = vld [vmem:[%s7808_s4 + $0x68] sm:$0xff]  ;;  %2644 = vmatpush.msra.mxu3 %v4427_v10 }
 0x388   :  { %2326 = vmatmul.f32.gmra.mxu0 %v2220_v14  ;;  %v2463_v14 = vld [vmem:[%s7809_s5 + $0x48] sm:$0xff] }
 0x389   :  { %v2127_v58 = vrot.slane %v2037_v19, 1  ;;  %2645 = vmatpush.msra.mxu3 %v4425_v48 }
 0x38b   :  { %v2188_v8 = vmax.f32 %v2037_v19, %v2127_v58  ;;  %v2128_v45 = vsel %vm2069_vm6, %v2125_v18, %v2127_v58  ;;  %v2228_v19 = vld [vmem:[%s7808_s4 + $0xa0] sm:$0xff]  ;;  %v2225_v18 = vld [vmem:[%s7808_s4 + $0x88] sm:$0xff]  ;;  %2646 = vmatpush.msra.mxu3 %v4423_v31 }
 0x38c   :  { %v2187_v1 = vmax.f32 %v2034_v35, %v2128_v45  ;;  %v2224_v35 = vld [vmem:[%s7808_s4 + $0x80] sm:$0xff] }
 0x38d   :  { %4387 = vmatpush.msk.msrb.mxu1 %vm2069_vm6, %v2188_v8  ;;  %v2232_v58 = vld [vmem:[%s7808_s4 + $0xc0] sm:$0xff]  ;;  %v2229_v8 = vld [vmem:[%s7808_s4 + $0xa8] sm:$0xff] }
 0x38e   :  { %v2236_v45 = vld [vmem:[%s7808_s4 + $0xe0] sm:$0xff] }
 0x38f   :  { %2360 = vmatpush.msrb.mxu1 %v2187_v1  ;;  %v4428_v1 = vld [vmem:[%s7809_s5 + $0x1a0] sm:$0xff] }
 0x390   :  { %2578 = vmatpush.msra.mxu2 %v4428_v1 }
 0x391   :  { %2361 = vmatpush.msrb.mxu1 %v2186_v21  ;;  %v2231_v21 = vld [vmem:[%s7808_s4 + $0xb8] sm:$0xff] }
 0x393   :  { %2362 = vmatpush.msrb.mxu1 %v2185_v11  ;;  %v4426_v11 = vld [vmem:[%s7809_s5 + $0x190] sm:$0xff] }
 0x394   :  { %2579 = vmatpush.msra.mxu2 %v4426_v11 }
 0x395   :  { %2363 = vmatpush.msrb.mxu1 %v2184_v42  ;;  %v7954_v42 = vmov 0.0  }
 0x396   :  { %2190 = vst.msk [vmem:[#allocation3] sm:$0xff] %vm2189_vm8, %v7954_v42  ;;  %2580 = vmatpush.msra.mxu2 %v4424_v61 }
 0x397   :  { %2364 = vmatpush.msrb.mxu1 %v2183_v34  ;;  %2191 = vst.msk [vmem:[#allocation3 + $0x8] sm:$0xff] %vm2189_vm8, %v7954_v42  ;;  %v2473_v34 = vld [vmem:[%s7809_s5 + $0x98] sm:$0xff] }
 0x398   :  { %2192 = vst.msk [vmem:[#allocation3 + $0x10] sm:$0xff] %vm2189_vm8, %v7954_v42  ;;  %2581 = vmatpush.msra.mxu2 %v4422_v44 }
 0x399   :  { %2365 = vmatpush.msrb.mxu1 %v2182_v62  ;;  %2193 = vst.msk [vmem:[#allocation3 + $0x18] sm:$0xff] %vm2189_vm8, %v7954_v42  ;;  %v2468_v62 = vld [vmem:[%s7809_s5 + $0x70] sm:$0xff] }
 0x39a   :  { %2194 = vst.msk [vmem:[#allocation3 + $0x20] sm:$0xff] %vm2189_vm8, %v7954_v42  ;;  %2761 = vmatpush.msra.mxu0 %v2468_v62  ;;  %2582 = vmatpush.msra.mxu2 %v4420_v46 }
 0x39b   :  { %2366 = vmatpush.msrb.mxu1 %v2181_v33  ;;  %2195 = vst.msk [vmem:[#allocation3 + $0x28] sm:$0xff] %vm2189_vm8, %v7954_v42  ;;  %v4421_v33 = vld [vmem:[%s7809_s5 + $0x168] sm:$0xff] }
 0x39c   :  { %2196 = vst.msk [vmem:[#allocation3 + $0x30] sm:$0xff] %vm2189_vm8, %v7954_v42  ;;  %2647 = vmatpush.msra.mxu3 %v4421_v33  ;;  %2762 = vmatpush.msra.mxu0 %v2466_v24 }
 0x39d   :  { %2367 = vmatpush.msrb.mxu1 %v2180_v17  ;;  %2197 = vst.msk [vmem:[#allocation3 + $0x38] sm:$0xff] %vm2189_vm8, %v7954_v42  ;;  %v4418_v17 = vld [vmem:[%s7809_s5 + $0x150] sm:$0xff] }
 0x39e   :  { %2198 = vst.msk [vmem:[#allocation3 + $0x40] sm:$0xff] %vm2189_vm8, %v7954_v42  ;;  %2583 = vmatpush.msra.mxu2 %v4418_v17  ;;  %2648 = vmatpush.msra.mxu3 %v4419_v30 }
 0x39f   :  { %2368 = vmatpush.msrb.mxu1 %v2179_v36  ;;  %2199 = vst.msk [vmem:[#allocation3 + $0x48] sm:$0xff] %vm2189_vm8, %v7954_v42  ;;  %v2464_v36 = vld [vmem:[%s7809_s5 + $0x50] sm:$0xff] }
 0x3a0   :  { %2200 = vst.msk [vmem:[#allocation3 + $0x50] sm:$0xff] %vm2189_vm8, %v7954_v42  ;;  %2763 = vmatpush.msra.mxu0 %v2464_v36  ;;  %2584 = vmatpush.msra.mxu2 %v4416_v3 }
 0x3a1   :  { %2369 = vmatpush.msrb.mxu1 %v2178_v40  ;;  %2201 = vst.msk [vmem:[#allocation3 + $0x58] sm:$0xff] %vm2189_vm8, %v7954_v42  ;;  %v2235_v40 = vld [vmem:[%s7808_s4 + $0xd8] sm:$0xff]  ;;  %2649 = vmatpush.msra.mxu3 %v4417_v5 }
 0x3a2   :  { %2202 = vst.msk [vmem:[#allocation3 + $0x60] sm:$0xff] %vm2189_vm8, %v7954_v42  ;;  %2764 = vmatpush.msra.mxu0 %v2462_v52  ;;  %2585 = vmatpush.msra.mxu2 %v4414_v53 }
 0x3a3   :  { %2370 = vmatpush.msrb.mxu1 %v2177_v28  ;;  %2203 = vst.msk [vmem:[#allocation3 + $0x68] sm:$0xff] %vm2189_vm8, %v7954_v42 }
 0x3a4   :  { %2204 = vst.msk [vmem:[#allocation3 + $0x70] sm:$0xff] %vm2189_vm8, %v7954_v42  ;;  %2586 = vmatpush.msra.mxu2 %v4412_v12 }
 0x3a5   :  { %2371 = vmatpush.msrb.mxu1 %v2176_v15  ;;  %v2465_v15 = vld [vmem:[%s7809_s5 + $0x58] sm:$0xff]  ;;  %2205 = vst.msk [vmem:[#allocation3 + $0x78] sm:$0xff] %vm2189_vm8, %v7954_v42 }
 0x3a6   :  { %2207 = vst.msk [vmem:[#allocation3 + $0x80] sm:$0x3] %vm2206_vm9, %v7954_v42  ;;  %v4512_v42 = vld [vmem:[%s7809_s5 + $0x240] sm:$0xff] }
 0x3a7   :  { %2372 = vmatpush.msrb.mxu1 %v2175_v37  ;;  %v2222_v37 = vld [vmem:[%s7808_s4 + $0x70] sm:$0xff] }
 0x3a8   :  { %4388 = vmatmul.msk.f32.vlgmr.msrb.gmra.mxu1 %vm2240_vm7, %v2209_v16  ;;  %2329 = vmatmul.f32.gmra.mxu0 %v2222_v37  ;;  %v2460_v16 = vld [vmem:[%s7809_s5 + $0x30] sm:$0xff] }
 0x3a9   :  { %2820 = vmatpush.msra.mxu1 %v2481_v56  ;;  %v4410_v37 = vld [vmem:[%s7809_s5 + $0x110] sm:$0xff]  ;;  %2765 = vmatpush.msra.mxu0 %v2460_v16 }
 0x3aa   :  { %2587 = vmatpush.msra.mxu2 %v4410_v37 }
 0x3ab   :  { %2821 = vmatpush.msra.mxu1 %v2479_v41 }
 0x3ad   :  { %2822 = vmatpush.msra.mxu1 %v2477_v50 }
 0x3af   :  { %2823 = vmatpush.msra.mxu1 %v2475_v43 }
 0x3b0   :  { %4389 = vmatmul.msk.f32.gmra.mxu1 %vm2240_vm7, %v2211_v38  ;;  %2332 = vmatmul.f32.gmra.mxu0 %v2224_v35  ;;  %v4415_v38 = vld [vmem:[%s7809_s5 + $0x138] sm:$0xff] }
 0x3b1   :  { %2824 = vmatpush.msra.mxu1 %v2473_v34  ;;  %2650 = vmatpush.msra.mxu3 %v4415_v38  ;;  %v2461_v35 = vld [vmem:[%s7809_s5 + $0x38] sm:$0xff] }
 0x3b3   :  { %2825 = vmatpush.msra.mxu1 %v2471_v60 }
 0x3b5   :  { %2826 = vmatpush.msra.mxu1 %v2469_v51 }
 0x3b7   :  { %2827 = vmatpush.msra.mxu1 %v2467_v57 }
 0x3b8   :  { %4390 = vmatmul.msk.f32.gmra.mxu1 %vm2240_vm7, %v2213_v25  ;;  %2335 = vmatmul.f32.gmra.mxu0 %v2226_v0  ;;  %v4413_v25 = vld [vmem:[%s7809_s5 + $0x128] sm:$0xff]  ;;  %v4408_v0 = vld [vmem:[%s7809_s5 + $0x100] sm:$0xff] }
 0x3b9   :  { %2828 = vmatpush.msra.mxu1 %v2465_v15  ;;  %2651 = vmatpush.msra.mxu3 %v4413_v25 }
 0x3ba   :  { %2588 = vmatpush.msra.mxu2 %v4408_v0 }
 0x3bb   :  { %2829 = vmatpush.msra.mxu1 %v2463_v14 }
 0x3bd   :  { %2830 = vmatpush.msra.mxu1 %v2461_v35 }
 0x3c0   :  { %4391 = vmatmul.msk.f32.gmra.mxu1 %vm2240_vm7, %v2215_v59  ;;  %2338 = vmatmul.f32.gmra.mxu0 %v2228_v19  ;;  %v2458_v59 = vld [vmem:[%s7809_s5 + $0x20] sm:$0xff]  ;;  %v2237_v19 = vld [vmem:[%s7808_s4 + $0xe8] sm:$0xff] }
 0x3c1   :  { %2766 = vmatpush.msra.mxu0 %v2458_v59 }
 0x3c2   :  { %v6447_v32 = vpop.f32.mrf.mxu0 }
 0x3c8   :  { %4392 = vmatmul.msk.f32.gmra.mxu1 %vm2240_vm7, %v2217_v20  ;;  %2341 = vmatmul.f32.gmra.mxu0 %v2230_v23  ;;  %v4411_v20 = vld [vmem:[%s7809_s5 + $0x118] sm:$0xff]  ;;  %v2459_v23 = vld [vmem:[%s7809_s5 + $0x28] sm:$0xff] }
 0x3c9   :  { %2652 = vmatpush.msra.mxu3 %v4411_v20  ;;  %2831 = vmatpush.msra.mxu1 %v2459_v23 }
 0x3ca   :  { %v2312_v28 = vpop.f32.mrf.mxu0 }
 0x3d0   :  { %4393 = vmatmul.msk.f32.gmra.mxu1 %vm2240_vm7, %v2219_v39  ;;  %2344 = vmatmul.f32.gmra.mxu0 %v2232_v58  ;;  %v2456_v39 = vld [vmem:[%s7809_s5 + $0x10] sm:$0xff]  ;;  %v4407_v58 = vld [vmem:[%s7809_s5 + $0xf8] sm:$0xff] }
 0x3d1   :  { %2767 = vmatpush.msra.mxu0 %v2456_v39 }
 0x3d8   :  { %4394 = vmatmul.msk.f32.gmra.mxu1 %vm2240_vm7, %v2221_v27  ;;  %2347 = vmatmul.f32.gmra.mxu0 %v2234_v63  ;;  %v4409_v27 = vld [vmem:[%s7809_s5 + $0x108] sm:$0xff]  ;;  %v2315_v63 = vpop.f32.mrf.mxu0 }
 0x3d9   :  { %2653 = vmatpush.msra.mxu3 %v4409_v27 }
 0x3db   :  { %2654 = vmatpush.msra.mxu3 %v4407_v58  ;;  %v4523_v58 = vld [vmem:[%s7809_s5 + $0x298] sm:$0xff] }
 0x3e0   :  { %4395 = vmatmul.msk.f32.gmra.mxu1 %vm2240_vm7, %v2223_v4  ;;  %2350 = vmatmul.f32.gmra.mxu0 %v2236_v45  ;;  %v2454_v4 = vld [vmem:[%s7809_s5] sm:$0xff]  ;;  %v2457_v45 = vld [vmem:[%s7809_s5 + $0x18] sm:$0xff]  ;;  %v2318_v1 = vpop.f32.mrf.mxu0 }
 0x3e1   :  { %2768 = vmatpush.msra.mxu0 %v2454_v4  ;;  %2832 = vmatpush.msra.mxu1 %v2457_v45  ;;  %v4519_v45 = vld [vmem:[%s7809_s5 + $0x278] sm:$0xff] }
 0x3e3   :  { %2833 = vmatpush.msra.mxu1 %v2455_v49  ;;  %v4516_v49 = vld [vmem:[%s7809_s5 + $0x260] sm:$0xff] }
 0x3e8   :  { %4396 = vmatmul.msk.f32.gmra.mxu1 %vm2240_vm7, %v2225_v18  ;;  %2353 = vmatmul.f32.gmra.mxu0 %v2238_v55  ;;  %v4406_v18 = vld [vmem:[%s7809_s5 + $0xf0] sm:$0xff] }
 0x3e9   :  { %2589 = vmatpush.msra.mxu2 %v4406_v18  ;;  %v4522_v18 = vld [vmem:[%s7809_s5 + $0x290] sm:$0xff] }
 0x3f0   :  { %4397 = vmatmul.msk.f32.gmra.mxu1 %vm2240_vm7, %v2227_v2  ;;  %v4404_v2 = vld [vmem:[%s7809_s5 + $0xe0] sm:$0xff] }
 0x3f1   :  { %2590 = vmatpush.msra.mxu2 %v4404_v2  ;;  %v4520_v2 = vld [vmem:[%s7809_s5 + $0x280] sm:$0xff] }
 0x3f3   :  { %2978 = vmatpush.msrb.mxu2 %v4522_v18 }
 0x3f5   :  { %v2321_v7 = vpop.f32.mrf.mxu0  ;;  %2979 = vmatpush.msrb.mxu2 %v4520_v2 }
 0x3f8   :  { %4398 = vmatmul.msk.f32.gmra.mxu1 %vm2240_vm7, %v2229_v8  ;;  %v4405_v8 = vld [vmem:[%s7809_s5 + $0xe8] sm:$0xff] }
 0x3f9   :  { %2655 = vmatpush.msra.mxu3 %v4405_v8  ;;  %v4518_v8 = vld [vmem:[%s7809_s5 + $0x270] sm:$0xff] }
 0x3fa   :  { %2980 = vmatpush.msrb.mxu2 %v4518_v8 }
 0x3fb   :  { %3043 = vmatpush.msrb.mxu3 %v4523_v58 }
 0x3fc   :  { %2981 = vmatpush.msrb.mxu2 %v4516_v49 }
 0x3fd   :  { %v2324_v11 = vpop.f32.mrf.mxu0 }
 0x400   :  { %4399 = vmatmul.msk.f32.gmra.mxu1 %vm2240_vm7, %v2231_v21 }
 0x405   :  { %v2327_v26 = vpop.f32.mrf.mxu0 }
 0x408   :  { %4400 = vmatmul.msk.f32.gmra.mxu1 %vm2240_vm7, %v2233_v22 }
 0x410   :  { %4401 = vmatmul.msk.f32.gmra.mxu1 %vm2240_vm7, %v2235_v40 }
 0x418   :  { %4402 = vmatmul.msk.f32.gmra.mxu1 %vm2240_vm7, %v2237_v19 }
 0x420   :  { %4403 = vmatmul.msk.f32.gmra.mxu1 %vm2240_vm7, %v2239_v29  ;;  %v4517_v29 = vld [vmem:[%s7809_s5 + $0x268] sm:$0xff] }
 0x425   :  { %v2374_v13 = vpop.f32.mrf.mxu1  ;;  %v2330_v60 = vpop.f32.mrf.mxu0 }
 0x426   :  { %v2375_v54 = vadd.f32 %v2374_v13, %v6447_v32 }
 0x428   :  { %2422 = vst.msk [vmem:[#allocation3] sm:$0xff] %vm2189_vm8, %v2375_v54  ;;  %v4514_v54 = vld [vmem:[%s7809_s5 + $0x250] sm:$0xff] }
 0x429   :  { %2982 = vmatpush.msrb.mxu2 %v4514_v54 }
 0x42b   :  { %2983 = vmatpush.msrb.mxu2 %v4512_v42 }
 0x42d   :  { %v2377_v56 = vpop.f32.mrf.mxu1  ;;  %v2333_v51 = vpop.f32.mrf.mxu0 }
 0x42e   :  { %v2378_v41 = vadd.f32 %v2377_v56, %v2312_v28  ;;  %v4515_v56 = vld [vmem:[%s7809_s5 + $0x258] sm:$0xff] }
 0x42f   :  { %v2438_v21 = vld [vmem:[#allocation3] sm:$0xff] }
 0x430   :  { %2423 = vst.msk [vmem:[#allocation3 + $0x8] sm:$0xff] %vm2189_vm8, %v2378_v41  ;;  %4464 = vmatmul.msk.f32.vlgmr.msra.gmra.mxu0 %vm2189_vm8, %v2438_v21  ;;  %4480 = vmatmul.msk.f32.vlgmr.msra.gmra.mxu1 %vm2189_vm8, %v2438_v21 }
 0x435   :  { %v2380_v55 = vpop.f32.mrf.mxu1  ;;  %v2336_v5 = vpop.f32.mrf.mxu0 }
 0x436   :  { %v2381_v9 = vadd.f32 %v2380_v55, %v2315_v63  ;;  %v4521_v63 = vld [vmem:[%s7809_s5 + $0x288] sm:$0xff] }
 0x437   :  { %v2482_v50 = vld [vmem:[#allocation3 + $0x1] sm:$0xff]  ;;  %3044 = vmatpush.msrb.mxu3 %v4521_v63  ;;  %v4513_v55 = vld [vmem:[%s7809_s5 + $0x248] sm:$0xff] }
 0x438   :  { %v2439_v10 = vld [vmem:[#allocation3 + $0x8] sm:$0xff]  ;;  %2424 = vst.msk [vmem:[#allocation3 + $0x10] sm:$0xff] %vm2189_vm8, %v2381_v9  ;;  %4432 = vmatmul.msk.f32.vlgmr.msra.gmra.mxu2 %vm2189_vm8, %v2482_v50  ;;  %4448 = vmatmul.msk.f32.vlgmr.msra.gmra.mxu3 %vm2189_vm8, %v2482_v50  ;;  %v4510_v9 = vld [vmem:[%s7809_s5 + $0x230] sm:$0xff]  ;;  %v4511_v50 = vld [vmem:[%s7809_s5 + $0x238] sm:$0xff] }
 0x439   :  { %4465 = vmatmul.msk.f32.gmra.mxu0 %vm2189_vm8, %v2439_v10  ;;  %4481 = vmatmul.msk.f32.gmra.mxu1 %vm2189_vm8, %v2439_v10  ;;  %v4509_v10 = vld [vmem:[%s7809_s5 + $0x228] sm:$0xff] }
 0x43a   :  { %3045 = vmatpush.msrb.mxu3 %v4519_v45  ;;  %2984 = vmatpush.msrb.mxu2 %v4510_v9 }
 0x43c   :  { %3046 = vmatpush.msrb.mxu3 %v4517_v29 }
 0x43d   :  { %v2383_v61 = vpop.f32.mrf.mxu1  ;;  %v2339_v53 = vpop.f32.mrf.mxu0 }
 0x43e   :  { %v2384_v48 = vadd.f32 %v2383_v61, %v2318_v1  ;;  %3047 = vmatpush.msrb.mxu3 %v4515_v56 }
 0x43f   :  { %v2483_v47 = vld [vmem:[#allocation3 + $0x9] sm:$0xff] }
 0x440   :  { %v2440_v43 = vld [vmem:[#allocation3 + $0x10] sm:$0xff]  ;;  %2425 = vst.msk [vmem:[#allocation3 + $0x18] sm:$0xff] %vm2189_vm8, %v2384_v48  ;;  %4433 = vmatmul.msk.f32.gmra.mxu2 %vm2189_vm8, %v2483_v47  ;;  %4449 = vmatmul.msk.f32.gmra.mxu3 %vm2189_vm8, %v2483_v47  ;;  %v4506_v47 = vld [vmem:[%s7809_s5 + $0x210] sm:$0xff] }
 0x441   :  { %4466 = vmatmul.msk.f32.gmra.mxu0 %vm2189_vm8, %v2440_v43  ;;  %4482 = vmatmul.msk.f32.gmra.mxu1 %vm2189_vm8, %v2440_v43  ;;  %v4507_v43 = vld [vmem:[%s7809_s5 + $0x218] sm:$0xff] }
 0x442   :  { %3048 = vmatpush.msrb.mxu3 %v4513_v55 }
 0x444   :  { %3049 = vmatpush.msrb.mxu3 %v4511_v50 }
 0x445   :  { %v2386_v34 = vpop.f32.mrf.mxu1  ;;  %v2342_v59 = vpop.f32.mrf.mxu0 }
 0x446   :  { %v2387_v22 = vadd.f32 %v2386_v34, %v2321_v7  ;;  %3050 = vmatpush.msrb.mxu3 %v4509_v10 }
 0x447   :  { %v2484_v32 = vld [vmem:[#allocation3 + $0x11] sm:$0xff] }
 0x448   :  { %v2441_v6 = vld [vmem:[#allocation3 + $0x18] sm:$0xff]  ;;  %2426 = vst.msk [vmem:[#allocation3 + $0x20] sm:$0xff] %vm2189_vm8, %v2387_v22  ;;  %4434 = vmatmul.msk.f32.gmra.mxu2 %vm2189_vm8, %v2484_v32  ;;  %4450 = vmatmul.msk.f32.gmra.mxu3 %vm2189_vm8, %v2484_v32  ;;  %v4504_v22 = vld [vmem:[%s7809_s5 + $0x200] sm:$0xff]  ;;  %v4505_v32 = vld [vmem:[%s7809_s5 + $0x208] sm:$0xff] }
 0x449   :  { %4467 = vmatmul.msk.f32.gmra.mxu0 %vm2189_vm8, %v2441_v6  ;;  %4483 = vmatmul.msk.f32.gmra.mxu1 %vm2189_vm8, %v2441_v6 }
 0x44a   :  { %3051 = vmatpush.msrb.mxu3 %v4507_v43 }
 0x44c   :  { %3052 = vmatpush.msrb.mxu3 %v4505_v32 }
 0x44d   :  { %v2389_v62 = vpop.f32.mrf.mxu1  ;;  %v2345_v27 = vpop.f32.mrf.mxu0 }
 0x44e   :  { %v2390_v44 = vadd.f32 %v2389_v62, %v2324_v11  ;;  %v4508_v11 = vld [vmem:[%s7809_s5 + $0x220] sm:$0xff]  ;;  %v4503_v62 = vld [vmem:[%s7809_s5 + $0x1f8] sm:$0xff] }
 0x44f   :  { %v2485_v31 = vld [vmem:[#allocation3 + $0x19] sm:$0xff]  ;;  %2985 = vmatpush.msrb.mxu2 %v4508_v11  ;;  %3053 = vmatpush.msrb.mxu3 %v4503_v62 }
 0x450   :  { %v2442_v46 = vld [vmem:[#allocation3 + $0x20] sm:$0xff]  ;;  %2427 = vst.msk [vmem:[#allocation3 + $0x28] sm:$0xff] %vm2189_vm8, %v2390_v44  ;;  %4435 = vmatmul.msk.f32.gmra.mxu2 %vm2189_vm8, %v2485_v31  ;;  %4451 = vmatmul.msk.f32.gmra.mxu3 %vm2189_vm8, %v2485_v31  ;;  %v4500_v44 = vld [vmem:[%s7809_s5 + $0x1e0] sm:$0xff]  ;;  %v4501_v31 = vld [vmem:[%s7809_s5 + $0x1e8] sm:$0xff] }
 0x451   :  { %4468 = vmatmul.msk.f32.gmra.mxu0 %vm2189_vm8, %v2442_v46  ;;  %4484 = vmatmul.msk.f32.gmra.mxu1 %vm2189_vm8, %v2442_v46 }
 0x452   :  { %2986 = vmatpush.msrb.mxu2 %v4506_v47  ;;  %3054 = vmatpush.msrb.mxu3 %v4501_v31 }
 0x454   :  { %2987 = vmatpush.msrb.mxu2 %v4504_v22 }
 0x455   :  { %v2392_v33 = vpop.f32.mrf.mxu1  ;;  %v2348_v41 = vpop.f32.mrf.mxu0 }
 0x456   :  { %v2393_v24 = vadd.f32 %v2392_v33, %v2327_v26 }
 0x457   :  { %v2486_v17 = vld [vmem:[#allocation3 + $0x21] sm:$0xff] }
 0x458   :  { %v2443_v30 = vld [vmem:[#allocation3 + $0x28] sm:$0xff]  ;;  %2428 = vst.msk [vmem:[#allocation3 + $0x30] sm:$0xff] %vm2189_vm8, %v2393_v24  ;;  %4436 = vmatmul.msk.f32.gmra.mxu2 %vm2189_vm8, %v2486_v17  ;;  %4452 = vmatmul.msk.f32.gmra.mxu3 %vm2189_vm8, %v2486_v17  ;;  %v4499_v24 = vld [vmem:[%s7809_s5 + $0x1d8] sm:$0xff] }
 0x459   :  { %4469 = vmatmul.msk.f32.gmra.mxu0 %vm2189_vm8, %v2443_v30  ;;  %4485 = vmatmul.msk.f32.gmra.mxu1 %vm2189_vm8, %v2443_v30 }
 0x45a   :  { %3055 = vmatpush.msrb.mxu3 %v4499_v24 }
 0x45d   :  { %v2395_v57 = vpop.f32.mrf.mxu1  ;;  %v2351_v6 = vpop.f32.mrf.mxu0 }
 0x45e   :  { %v2396_v36 = vadd.f32 %v2395_v57, %v2330_v60  ;;  %v4502_v60 = vld [vmem:[%s7809_s5 + $0x1f0] sm:$0xff]  ;;  %v4496_v57 = vld [vmem:[%s7809_s5 + $0x1c0] sm:$0xff] }
 0x45f   :  { %v2487_v3 = vld [vmem:[#allocation3 + $0x29] sm:$0xff]  ;;  %2988 = vmatpush.msrb.mxu2 %v4502_v60 }
 0x460   :  { %v2444_v40 = vld [vmem:[#allocation3 + $0x30] sm:$0xff]  ;;  %2429 = vst.msk [vmem:[#allocation3 + $0x38] sm:$0xff] %vm2189_vm8, %v2396_v36  ;;  %4437 = vmatmul.msk.f32.gmra.mxu2 %vm2189_vm8, %v2487_v3  ;;  %4453 = vmatmul.msk.f32.gmra.mxu3 %vm2189_vm8, %v2487_v3 }
 0x461   :  { %4470 = vmatmul.msk.f32.gmra.mxu0 %vm2189_vm8, %v2444_v40  ;;  %4486 = vmatmul.msk.f32.gmra.mxu1 %vm2189_vm8, %v2444_v40  ;;  %v4497_v36 = vld [vmem:[%s7809_s5 + $0x1c8] sm:$0xff] }
 0x462   :  { %2989 = vmatpush.msrb.mxu2 %v4500_v44  ;;  %3056 = vmatpush.msrb.mxu3 %v4497_v36  ;;  %v2888_v58 = vld [vmem:[#allocation3 + $0x2a] sm:$0xff] }
 0x465   :  { %v2398_v52 = vpop.f32.mrf.mxu1  ;;  %v2354_v3 = vpop.f32.mrf.mxu0 }
 0x466   :  { %v2399_v28 = vadd.f32 %v2398_v52, %v2333_v51  ;;  %v4498_v51 = vld [vmem:[%s7809_s5 + $0x1d0] sm:$0xff] }
 0x467   :  { %v2488_v15 = vld [vmem:[#allocation3 + $0x31] sm:$0xff]  ;;  %2990 = vmatpush.msrb.mxu2 %v4498_v51 }
 0x468   :  { %v2445_v16 = vld [vmem:[#allocation3 + $0x38] sm:$0xff]  ;;  %2430 = vst.msk [vmem:[#allocation3 + $0x40] sm:$0xff] %vm2189_vm8, %v2399_v28  ;;  %4438 = vmatmul.msk.f32.gmra.mxu2 %vm2189_vm8, %v2488_v15  ;;  %4454 = vmatmul.msk.f32.gmra.mxu3 %vm2189_vm8, %v2488_v15 }
 0x469   :  { %4471 = vmatmul.msk.f32.gmra.mxu0 %vm2189_vm8, %v2445_v16  ;;  %4487 = vmatmul.msk.f32.gmra.mxu1 %vm2189_vm8, %v2445_v16  ;;  %v2889_v8 = vld [vmem:[#allocation3 + $0x32] sm:$0xff] }
 0x46a   :  { %2991 = vmatpush.msrb.mxu2 %v4496_v57  ;;  %v3138_v57 = vld [vmem:[%s7810_s6] sm:$0x3]  ;;  %s4697_s6 = smov 112  }
 0x46d   :  { %v2401_v38 = vpop.f32.mrf.mxu1 }
 0x46e   :  { %v2402_v12 = vadd.f32 %v2401_v38, %v2336_v5  ;;  %v2883_v38 = vld [vmem:[#allocation3 + $0x2] sm:$0xff] }
 0x46f   :  { %v2489_v25 = vld [vmem:[#allocation3 + $0x39] sm:$0xff] }
 0x470   :  { %v2446_v14 = vld [vmem:[#allocation3 + $0x40] sm:$0xff]  ;;  %2431 = vst.msk [vmem:[#allocation3 + $0x48] sm:$0xff] %vm2189_vm8, %v2402_v12  ;;  %4439 = vmatmul.msk.f32.gmra.mxu2 %vm2189_vm8, %v2489_v25  ;;  %4455 = vmatmul.msk.f32.gmra.mxu3 %vm2189_vm8, %v2489_v25 }
 0x471   :  { %4472 = vmatmul.msk.f32.gmra.mxu0 %vm2189_vm8, %v2446_v14  ;;  %4488 = vmatmul.msk.f32.gmra.mxu1 %vm2189_vm8, %v2446_v14  ;;  %v2884_v14 = vld [vmem:[#allocation3 + $0xa] sm:$0xff]  ;;  %v2890_v29 = vld [vmem:[#allocation3 + $0x3a] sm:$0xff] }
 0x475   :  { %v2404_v37 = vpop.f32.mrf.mxu1 }
 0x476   :  { %v2405_v20 = vadd.f32 %v2404_v37, %v2339_v53 }
 0x477   :  { %v2490_v35 = vld [vmem:[#allocation3 + $0x41] sm:$0xff] }
 0x478   :  { %v2447_v39 = vld [vmem:[#allocation3 + $0x48] sm:$0xff]  ;;  %2432 = vst.msk [vmem:[#allocation3 + $0x50] sm:$0xff] %vm2189_vm8, %v2405_v20  ;;  %4440 = vmatmul.msk.f32.gmra.mxu2 %vm2189_vm8, %v2490_v35  ;;  %4456 = vmatmul.msk.f32.gmra.mxu3 %vm2189_vm8, %v2490_v35  ;;  %v2885_v20 = vld [vmem:[#allocation3 + $0x12] sm:$0xff] }
 0x479   :  { %4473 = vmatmul.msk.f32.gmra.mxu0 %vm2189_vm8, %v2447_v39  ;;  %4489 = vmatmul.msk.f32.gmra.mxu1 %vm2189_vm8, %v2447_v39  ;;  %v2891_v54 = vld [vmem:[#allocation3 + $0x42] sm:$0xff] }
 0x47d   :  { %v2407_v0 = vpop.f32.mrf.mxu1 }
 0x47e   :  { %v2408_v19 = vadd.f32 %v2407_v0, %v2342_v59  ;;  %v2886_v0 = vld [vmem:[#allocation3 + $0x1a] sm:$0xff] }
 0x47f   :  { %v2491_v4 = vld [vmem:[#allocation3 + $0x49] sm:$0xff] }
 0x480   :  { %v2448_v23 = vld [vmem:[#allocation3 + $0x50] sm:$0xff]  ;;  %2433 = vst.msk [vmem:[#allocation3 + $0x58] sm:$0xff] %vm2189_vm8, %v2408_v19  ;;  %4441 = vmatmul.msk.f32.gmra.mxu2 %vm2189_vm8, %v2491_v4  ;;  %4457 = vmatmul.msk.f32.gmra.mxu3 %vm2189_vm8, %v2491_v4  ;;  %v2887_v4 = vld [vmem:[#allocation3 + $0x22] sm:$0xff] }
 0x481   :  { %4474 = vmatmul.msk.f32.gmra.mxu0 %vm2189_vm8, %v2448_v23  ;;  %4490 = vmatmul.msk.f32.gmra.mxu1 %vm2189_vm8, %v2448_v23 }
 0x485   :  { %v2410_v1 = vpop.f32.mrf.mxu1 }
 0x486   :  { %v2411_v13 = vadd.f32 %v2410_v1, %v2345_v27 }
 0x487   :  { %v2492_v7 = vld [vmem:[#allocation3 + $0x51] sm:$0xff] }
 0x488   :  { %v2449_v21 = vld [vmem:[#allocation3 + $0x58] sm:$0xff]  ;;  %2434 = vst.msk [vmem:[#allocation3 + $0x60] sm:$0xff] %vm2189_vm8, %v2411_v13  ;;  %4442 = vmatmul.msk.f32.gmra.mxu2 %vm2189_vm8, %v2492_v7  ;;  %4458 = vmatmul.msk.f32.gmra.mxu3 %vm2189_vm8, %v2492_v7 }
 0x489   :  { %4475 = vmatmul.msk.f32.gmra.mxu0 %vm2189_vm8, %v2449_v21  ;;  %4491 = vmatmul.msk.f32.gmra.mxu1 %vm2189_vm8, %v2449_v21  ;;  %v2893_v55 = vld [vmem:[#allocation3 + $0x52] sm:$0xff] }
 0x48d   :  { %v2413_v61 = vpop.f32.mrf.mxu1 }
 0x48e   :  { %v2414_v48 = vadd.f32 %v2413_v61, %v2348_v41  ;;  %v2892_v41 = vld [vmem:[#allocation3 + $0x4a] sm:$0xff] }
 0x48f   :  { %v2493_v26 = vld [vmem:[#allocation3 + $0x59] sm:$0xff] }
 0x490   :  { %v2450_v34 = vld [vmem:[#allocation3 + $0x60] sm:$0xff]  ;;  %2435 = vst.msk [vmem:[#allocation3 + $0x68] sm:$0xff] %vm2189_vm8, %v2414_v48  ;;  %4443 = vmatmul.msk.f32.gmra.mxu2 %vm2189_vm8, %v2493_v26  ;;  %4459 = vmatmul.msk.f32.gmra.mxu3 %vm2189_vm8, %v2493_v26 }
 0x491   :  { %4476 = vmatmul.msk.f32.gmra.mxu0 %vm2189_vm8, %v2450_v34  ;;  %4492 = vmatmul.msk.f32.gmra.mxu1 %vm2189_vm8, %v2450_v34  ;;  %v2894_v11 = vld [vmem:[#allocation3 + $0x5a] sm:$0xff] }
 0x495   :  { %v2416_v46 = vpop.f32.mrf.mxu1 }
 0x496   :  { %v2417_v33 = vadd.f32 %v2416_v46, %v2351_v6 }
 0x497   :  { %v2494_v17 = vld [vmem:[#allocation3 + $0x61] sm:$0xff] }
 0x498   :  { %v2451_v30 = vld [vmem:[#allocation3 + $0x68] sm:$0xff]  ;;  %2436 = vst.msk [vmem:[#allocation3 + $0x70] sm:$0xff] %vm2189_vm8, %v2417_v33  ;;  %4444 = vmatmul.msk.f32.gmra.mxu2 %vm2189_vm8, %v2494_v17  ;;  %4460 = vmatmul.msk.f32.gmra.mxu3 %vm2189_vm8, %v2494_v17 }
 0x499   :  { %4477 = vmatmul.msk.f32.gmra.mxu0 %vm2189_vm8, %v2451_v30  ;;  %4493 = vmatmul.msk.f32.gmra.mxu1 %vm2189_vm8, %v2451_v30  ;;  %v2895_v48 = vld [vmem:[#allocation3 + $0x62] sm:$0xff] }
 0x49d   :  { %v2419_v5 = vpop.f32.mrf.mxu1 }
 0x49e   :  { %v2420_v40 = vadd.f32 %v2419_v5, %v2354_v3 }
 0x49f   :  { %v2495_v52 = vld [vmem:[#allocation3 + $0x69] sm:$0xff] }
 0x4a0   :  { %v2452_v28 = vld [vmem:[#allocation3 + $0x70] sm:$0xff]  ;;  %2437 = vst.msk [vmem:[#allocation3 + $0x78] sm:$0xff] %vm2189_vm8, %v2420_v40  ;;  %4445 = vmatmul.msk.f32.gmra.mxu2 %vm2189_vm8, %v2495_v52  ;;  %4461 = vmatmul.msk.f32.gmra.mxu3 %vm2189_vm8, %v2495_v52  ;;  %v6867_v52 = vperm.slane %v3138_v57, 0 }
 0x4a1   :  { %4478 = vmatmul.msk.f32.gmra.mxu0 %vm2189_vm8, %v2452_v28  ;;  %4494 = vmatmul.msk.f32.gmra.mxu1 %vm2189_vm8, %v2452_v28  ;;  %v2896_v22 = vld [vmem:[#allocation3 + $0x6a] sm:$0xff]  ;;  %v6869_v28 = vperm.slane %v3138_v57, 1 }
 0x4a7   :  { %v2496_v15 = vld [vmem:[#allocation3 + $0x71] sm:$0xff]  ;;  %v2497_v53 = vld [vmem:[#allocation3 + $0x79] sm:$0xff] }
 0x4a8   :  { %v2453_v16 = vld [vmem:[#allocation3 + $0x78] sm:$0xff]  ;;  %4446 = vmatmul.msk.f32.gmra.mxu2 %vm2189_vm8, %v2496_v15  ;;  %4462 = vmatmul.msk.f32.gmra.mxu3 %vm2189_vm8, %v2496_v15 }
 0x4a9   :  { %4479 = vmatmul.msk.f32.gmra.mxu0 %vm2189_vm8, %v2453_v16  ;;  %4495 = vmatmul.msk.f32.gmra.mxu1 %vm2189_vm8, %v2453_v16  ;;  %v2897_v44 = vld [vmem:[#allocation3 + $0x72] sm:$0xff]  ;;  %v2898_v24 = vld [vmem:[#allocation3 + $0x7a] sm:$0xff] }
 0x4ad   :  { %v2770_v47 = vpop.f32.mrf.mxu0  ;;  %v2835_v43 = vpop.f32.mrf.mxu1 }
 0x4b0   :  { %4447 = vmatmul.msk.f32.gmra.mxu2 %vm2189_vm8, %v2497_v53  ;;  %4463 = vmatmul.msk.f32.gmra.mxu3 %vm2189_vm8, %v2497_v53 }
 0x4b6   :  { %v2773_v60 = vpop.f32.mrf.mxu0  ;;  %v2838_v62 = vpop.f32.mrf.mxu1 }
 0x4b8   :  { %4524 = vmatmul.msk.f32.vlgmr.msrb.gmra.mxu2 %vm2189_vm8, %v2883_v38  ;;  %4540 = vmatmul.msk.f32.vlgmr.msrb.gmra.mxu3 %vm2189_vm8, %v2883_v38 }
 0x4bb   :  { %v6768_v12 = vpop.f32.mrf.mxu2  ;;  %v6770_v25 = vpop.f32.mrf.mxu3 }
 0x4bc   :  { %v2771_v5 = vadd.f32 %v2770_v47, %v6768_v12  ;;  %v2836_v40 = vadd.f32 %v2835_v43, %v6770_v25 }
 0x4be   :  { %v2776_v33 = vpop.f32.mrf.mxu0  ;;  %v2841_v51 = vpop.f32.mrf.mxu1 }
 0x4c0   :  { %4525 = vmatmul.msk.f32.gmra.mxu2 %vm2189_vm8, %v2884_v14  ;;  %4541 = vmatmul.msk.f32.gmra.mxu3 %vm2189_vm8, %v2884_v14 }
 0x4c3   :  { %v6774_v59 = vpop.f32.mrf.mxu2  ;;  %v6776_v37 = vpop.f32.mrf.mxu3 }
 0x4c4   :  { %v2774_v25 = vadd.f32 %v2773_v60, %v6774_v59 }
 0x4c6   :  { %v2779_v36 = vpop.f32.mrf.mxu0  ;;  %v2844_v3 = vpop.f32.mrf.mxu1 }
 0x4c8   :  { %4526 = vmatmul.msk.f32.gmra.mxu2 %vm2189_vm8, %v2885_v20  ;;  %4542 = vmatmul.msk.f32.gmra.mxu3 %vm2189_vm8, %v2885_v20 }
 0x4cb   :  { %v6780_v35 = vpop.f32.mrf.mxu2  ;;  %v6782_v39 = vpop.f32.mrf.mxu3 }
 0x4cc   :  { %v2777_v47 = vadd.f32 %v2776_v33, %v6780_v35  ;;  %v2842_v43 = vadd.f32 %v2841_v51, %v6782_v39 }
 0x4d0   :  { %4527 = vmatmul.msk.f32.gmra.mxu2 %vm2189_vm8, %v2886_v0  ;;  %4543 = vmatmul.msk.f32.gmra.mxu3 %vm2189_vm8, %v2886_v0 }
 0x4d3   :  { %v6786_v27 = vpop.f32.mrf.mxu2  ;;  %v6788_v19 = vpop.f32.mrf.mxu3 }
 0x4d4   :  { %v2780_v51 = vadd.f32 %v2779_v36, %v6786_v27 }
 0x4d8   :  { %4528 = vmatmul.msk.f32.gmra.mxu2 %vm2189_vm8, %v2887_v4  ;;  %4544 = vmatmul.msk.f32.gmra.mxu3 %vm2189_vm8, %v2887_v4  ;;  %v2839_v4 = vadd.f32 %v2838_v62, %v6776_v37 }
 0x4db   :  { %v6792_v23 = vpop.f32.mrf.mxu2  ;;  %v6794_v18 = vpop.f32.mrf.mxu3 }
 0x4e0   :  { %4529 = vmatmul.msk.f32.gmra.mxu2 %vm2189_vm8, %v2888_v58  ;;  %4545 = vmatmul.msk.f32.gmra.mxu3 %vm2189_vm8, %v2888_v58  ;;  %v2782_v58 = vpop.f32.mrf.mxu0 }
 0x4e3   :  { %v6798_v2 = vpop.f32.mrf.mxu2  ;;  %v6800_v63 = vpop.f32.mrf.mxu3 }
 0x4e8   :  { %4530 = vmatmul.msk.f32.gmra.mxu2 %vm2189_vm8, %v2889_v8  ;;  %4546 = vmatmul.msk.f32.gmra.mxu3 %vm2189_vm8, %v2889_v8  ;;  %v2847_v8 = vpop.f32.mrf.mxu1  ;;  %v2785_v62 = vpop.f32.mrf.mxu0 }
 0x4eb   :  { %v6804_v45 = vpop.f32.mrf.mxu2  ;;  %v6806_v49 = vpop.f32.mrf.mxu3 }
 0x4f0   :  { %4531 = vmatmul.msk.f32.gmra.mxu2 %vm2189_vm8, %v2890_v29  ;;  %4547 = vmatmul.msk.f32.gmra.mxu3 %vm2189_vm8, %v2890_v29 }
 0x4f3   :  { %v6810_v1 = vpop.f32.mrf.mxu2  ;;  %v6812_v13 = vpop.f32.mrf.mxu3 }
 0x4f8   :  { %4532 = vmatmul.msk.f32.gmra.mxu2 %vm2189_vm8, %v2891_v54  ;;  %4548 = vmatmul.msk.f32.gmra.mxu3 %vm2189_vm8, %v2891_v54 }
 0x4fb   :  { %v6816_v56 = vpop.f32.mrf.mxu2  ;;  %v6818_v7 = vpop.f32.mrf.mxu3 }
 0x500   :  { %4533 = vmatmul.msk.f32.gmra.mxu2 %vm2189_vm8, %v2892_v41  ;;  %4549 = vmatmul.msk.f32.gmra.mxu3 %vm2189_vm8, %v2892_v41 }
 0x503   :  { %v6822_v21 = vpop.f32.mrf.mxu2  ;;  %v6824_v42 = vpop.f32.mrf.mxu3 }
 0x508   :  { %4534 = vmatmul.msk.f32.gmra.mxu2 %vm2189_vm8, %v2893_v55  ;;  %4550 = vmatmul.msk.f32.gmra.mxu3 %vm2189_vm8, %v2893_v55 }
 0x50b   :  { %v6828_v9 = vpop.f32.mrf.mxu2  ;;  %v6830_v50 = vpop.f32.mrf.mxu3 }
 0x510   :  { %4535 = vmatmul.msk.f32.gmra.mxu2 %vm2189_vm8, %v2894_v11  ;;  %4551 = vmatmul.msk.f32.gmra.mxu3 %vm2189_vm8, %v2894_v11 }
 0x513   :  { %v6834_v10 = vpop.f32.mrf.mxu2  ;;  %v6836_v61 = vpop.f32.mrf.mxu3 }
 0x518   :  { %4536 = vmatmul.msk.f32.gmra.mxu2 %vm2189_vm8, %v2895_v48  ;;  %4552 = vmatmul.msk.f32.gmra.mxu3 %vm2189_vm8, %v2895_v48 }
 0x51b   :  { %v6840_v26 = vpop.f32.mrf.mxu2  ;;  %v6842_v34 = vpop.f32.mrf.mxu3 }
 0x520   :  { %4537 = vmatmul.msk.f32.gmra.mxu2 %vm2189_vm8, %v2896_v22  ;;  %4553 = vmatmul.msk.f32.gmra.mxu3 %vm2189_vm8, %v2896_v22 }
 0x523   :  { %v6846_v32 = vpop.f32.mrf.mxu2  ;;  %v6848_v6 = vpop.f32.mrf.mxu3 }
 0x528   :  { %4538 = vmatmul.msk.f32.gmra.mxu2 %vm2189_vm8, %v2897_v44  ;;  %4554 = vmatmul.msk.f32.gmra.mxu3 %vm2189_vm8, %v2897_v44  ;;  %v2850_v44 = vpop.f32.mrf.mxu1 }
 0x52b   :  { %v6852_v31 = vpop.f32.mrf.mxu2  ;;  %v6854_v46 = vpop.f32.mrf.mxu3 }
 0x530   :  { %4539 = vmatmul.msk.f32.gmra.mxu2 %vm2189_vm8, %v2898_v24  ;;  %4555 = vmatmul.msk.f32.gmra.mxu3 %vm2189_vm8, %v2898_v24 }
 0x533   :  { %v6858_v17 = vpop.f32.mrf.mxu2  ;;  %v6860_v30 = vpop.f32.mrf.mxu3 }
 0x53b   :  { %v2993_v15 = vpop.f32.mrf.mxu2  ;;  %v3058_v16 = vpop.f32.mrf.mxu3 }
 0x53c   :  { %v3106_v53 = vadd.f32 %v2993_v15, %v2771_v5  ;;  %v3107_v38 = vadd.f32 %v3058_v16, %v2836_v40  ;;  %v2845_v40 = vadd.f32 %v2844_v3, %v6788_v19  ;;  %v2783_v3 = vadd.f32 %v2782_v58, %v6792_v23 }
 0x53e   :  { %v6872_v14 = vadd.f32 %v6867_v52, %v3106_v53  ;;  %v6875_v20 = vadd.f32 %v6869_v28, %v3107_v38 }
 0x540   :  { %v3176_v0 = vmax.f32 %v6872_v14, 0.0  ;;  %v3177_v12 = vmax.f32 %v6875_v20, 0.0 }
 0x542   :  { %3242 = vrot.lane.b32.xlu1 %v3177_v12, %s4697_s6  ;;  %3240 = vrot.lane.b32.xlu0 %v3176_v0, %s4697_s6 }
 0x543   :  { %v2996_v29 = vpop.f32.mrf.mxu2  ;;  %v3061_v54 = vpop.f32.mrf.mxu3 }
 0x544   :  { %v3108_v41 = vadd.f32 %v2996_v29, %v2774_v25  ;;  %v3109_v55 = vadd.f32 %v3061_v54, %v2839_v4  ;;  %v2788_v25 = vpop.f32.mrf.mxu0  ;;  %v2853_v4 = vpop.f32.mrf.mxu1  ;;  %v2848_v54 = vadd.f32 %v2847_v8, %v6794_v18 }
 0x546   :  { %v6888_v11 = vadd.f32 %v6867_v52, %v3108_v41  ;;  %v6891_v59 = vadd.f32 %v6869_v28, %v3109_v55 }
 0x548   :  { %v3178_v37 = vmax.f32 %v6888_v11, 0.0  ;;  %v3179_v48 = vmax.f32 %v6891_v59, 0.0 }
 0x54a   :  { %3244 = vrot.lane.b32.xlu2 %v3178_v37, %s4697_s6  ;;  %3246 = vrot.lane.b32.xlu0 %v3179_v48, %s4697_s6 }
 0x54b   :  { %v2999_v22 = vpop.f32.mrf.mxu2  ;;  %v3064_v60 = vpop.f32.mrf.mxu3 }
 0x54c   :  { %v3110_v24 = vadd.f32 %v2999_v22, %v2777_v47  ;;  %v3111_v57 = vadd.f32 %v3064_v60, %v2842_v43  ;;  %v2791_v23 = vpop.f32.mrf.mxu0  ;;  %v2856_v18 = vpop.f32.mrf.mxu1 }
 0x54e   :  { %v6904_v5 = vadd.f32 %v6867_v52, %v3110_v24  ;;  %v6907_v35 = vadd.f32 %v6869_v28, %v3111_v57  ;;  %v2786_v24 = vadd.f32 %v2785_v62, %v6798_v2  ;;  %v2851_v57 = vadd.f32 %v2850_v44, %v6800_v63 }
 0x54f   :  { %v2789_v62 = vadd.f32 %v2788_v25, %v6804_v45  ;;  %v2854_v44 = vadd.f32 %v2853_v4, %v6806_v49  ;;  %v2792_v4 = vadd.f32 %v2791_v23, %v6810_v1 }
 0x550   :  { %v3180_v39 = vmax.f32 %v6904_v5, 0.0  ;;  %v3181_v33 = vmax.f32 %v6907_v35, 0.0 }
 0x552   :  { %3248 = vrot.lane.b32.xlu1 %v3180_v39, %s4697_s6  ;;  %3250 = vrot.lane.b32.xlu2 %v3181_v33, %s4697_s6 }
 0x553   :  { %v3002_v15 = vpop.f32.mrf.mxu2  ;;  %v3067_v16 = vpop.f32.mrf.mxu3 }
 0x554   :  { %v3112_v53 = vadd.f32 %v3002_v15, %v2780_v51  ;;  %v3113_v38 = vadd.f32 %v3067_v16, %v2845_v40 }
 0x556   :  { %v6920_v29 = vadd.f32 %v6867_v52, %v3112_v53  ;;  %v6923_v27 = vadd.f32 %v6869_v28, %v3113_v38 }
 0x558   :  { %v3182_v19 = vmax.f32 %v6920_v29, 0.0  ;;  %v3183_v36 = vmax.f32 %v6923_v27, 0.0 }
 0x55a   :  { %3254 = vrot.lane.b32.xlu1 %v3183_v36, %s4697_s6  ;;  %3252 = vrot.lane.b32.xlu0 %v3182_v19, %s4697_s6 }
 0x55b   :  { %v3005_v41 = vpop.f32.mrf.mxu2  ;;  %v3070_v55 = vpop.f32.mrf.mxu3 }
 0x55c   :  { %v3114_v47 = vadd.f32 %v3005_v41, %v2783_v3  ;;  %v3115_v43 = vadd.f32 %v3070_v55, %v2848_v54  ;;  %v2794_v3 = vpop.f32.mrf.mxu0  ;;  %v2859_v54 = vpop.f32.mrf.mxu1 }
 0x55e   :  { %v6936_v22 = vadd.f32 %v6867_v52, %v3114_v47  ;;  %v6939_v60 = vadd.f32 %v6869_v28, %v3115_v43 }
 0x560   :  { %v3184_v58 = vmax.f32 %v6936_v22, 0.0  ;;  %v3185_v8 = vmax.f32 %v6939_v60, 0.0 }
 0x562   :  { %3256 = vrot.lane.b32.xlu2 %v3184_v58, %s4697_s6  ;;  %3258 = vrot.lane.b32.xlu0 %v3185_v8, %s4697_s6 }
 0x563   :  { %v3008_v51 = vpop.f32.mrf.mxu2  ;;  %v3073_v40 = vpop.f32.mrf.mxu3 }
 0x564   :  { %v3116_v15 = vadd.f32 %v3008_v51, %v2786_v24  ;;  %v3117_v16 = vadd.f32 %v3073_v40, %v2851_v57  ;;  %v2857_v57 = vadd.f32 %v2856_v18, %v6812_v13  ;;  %v3399_v18 = vld [vmem:[%s7811_s7 + $0x78] sm:$0xff] }
 0x565   :  { %3459 = vmatpush.msrb.mxu0 %v3399_v18  ;;  %v3397_v18 = vld [vmem:[%s7811_s7 + $0x68] sm:$0xff] }
 0x566   :  { %v6952_v53 = vadd.f32 %v6867_v52, %v3116_v15  ;;  %v6955_v38 = vadd.f32 %v6869_v28, %v3117_v16  ;;  %v2797_v15 = vpop.f32.mrf.mxu0  ;;  %v2862_v16 = vpop.f32.mrf.mxu1 }
 0x568   :  { %v3186_v2 = vmax.f32 %v6952_v53, 0.0  ;;  %v3187_v63 = vmax.f32 %v6955_v38, 0.0 }
 0x56a   :  { %3260 = vrot.lane.b32.xlu1 %v3186_v2, %s4697_s6  ;;  %3262 = vrot.lane.b32.xlu2 %v3187_v63, %s4697_s6 }
 0x56b   :  { %v3011_v41 = vpop.f32.mrf.mxu2  ;;  %v3076_v55 = vpop.f32.mrf.mxu3 }
 0x56c   :  { %v3118_v47 = vadd.f32 %v3011_v41, %v2789_v62  ;;  %v3119_v43 = vadd.f32 %v3076_v55, %v2854_v44  ;;  %v2795_v55 = vadd.f32 %v2794_v3, %v6816_v56 }
 0x56e   :  { %v6968_v24 = vadd.f32 %v6867_v52, %v3118_v47  ;;  %v6971_v45 = vadd.f32 %v6869_v28, %v3119_v43  ;;  %v2860_v47 = vadd.f32 %v2859_v54, %v6818_v7  ;;  %v3398_v7 = vld [vmem:[%s7811_s7 + $0x70] sm:$0xff] }
 0x56f   :  { %3460 = vmatpush.msrb.mxu0 %v3398_v7 }
 0x570   :  { %v3188_v49 = vmax.f32 %v6968_v24, 0.0  ;;  %v3189_v25 = vmax.f32 %v6971_v45, 0.0 }
 0x571   :  { %3461 = vmatpush.msrb.mxu0 %v3397_v18 }
 0x572   :  { %3266 = vrot.lane.b32.xlu1 %v3189_v25, %s4697_s6  ;;  %3264 = vrot.lane.b32.xlu0 %v3188_v49, %s4697_s6 }
 0x573   :  { %v3014_v51 = vpop.f32.mrf.mxu2  ;;  %v3079_v40 = vpop.f32.mrf.mxu3 }
 0x574   :  { %v3120_v62 = vadd.f32 %v3014_v51, %v2792_v4  ;;  %v3121_v44 = vadd.f32 %v3079_v40, %v2857_v57  ;;  %v2800_v40 = vpop.f32.mrf.mxu0 }
 0x576   :  { %v6984_v41 = vadd.f32 %v6867_v52, %v3120_v62  ;;  %v6987_v1 = vadd.f32 %v6869_v28, %v3121_v44  ;;  %v2865_v62 = vpop.f32.mrf.mxu1 }
 0x578   :  { %v3190_v13 = vmax.f32 %v6984_v41, 0.0  ;;  %v3191_v23 = vmax.f32 %v6987_v1, 0.0 }
 0x57a   :  { %3268 = vrot.lane.b32.xlu2 %v3190_v13, %s4697_s6  ;;  %3270 = vrot.lane.b32.xlu0 %v3191_v23, %s4697_s6 }
 0x57b   :  { %v3017_v43 = vpop.f32.mrf.mxu2  ;;  %v3082_v4 = vpop.f32.mrf.mxu3 }
 0x57c   :  { %v3122_v57 = vadd.f32 %v3017_v43, %v2795_v55  ;;  %v3123_v51 = vadd.f32 %v3082_v4, %v2860_v47  ;;  %v2798_v55 = vadd.f32 %v2797_v15, %v6822_v21  ;;  %v2863_v47 = vadd.f32 %v2862_v16, %v6824_v42  ;;  %v3396_v43 = vld [vmem:[%s7811_s7 + $0x60] sm:$0xff]  ;;  %v3395_v21 = vld [vmem:[%s7811_s7 + $0x58] sm:$0xff]  ;;  %v3394_v16 = vld [vmem:[%s7811_s7 + $0x50] sm:$0xff] }
 0x57d   :  { %3462 = vmatpush.msrb.mxu0 %v3396_v43  ;;  %v3409_v43 = vld [vmem:[%s7811_s7 + $0xc8] sm:$0xff] }
 0x57e   :  { %v7003_v44 = vadd.f32 %v6867_v52, %v3122_v57  ;;  %v7006_v56 = vadd.f32 %v6869_v28, %v3123_v51  ;;  %v2868_v18 = vpop.f32.mrf.mxu1  ;;  %3530 = vmatpush.msrb.mxu1 %v3409_v43 }
 0x57f   :  { %3463 = vmatpush.msrb.mxu0 %v3395_v21  ;;  %v3392_v21 = vld [vmem:[%s7811_s7 + $0x40] sm:$0xff] }
 0x580   :  { %v7862_v3 = vmax.f32 %v7003_v44, 0.0  ;;  %v7865_v54 = vmax.f32 %v7006_v56, 0.0  ;;  %v7955_v24 = vmax.f32 %v7006_v56, 0.0 }
 0x581   :  { %3464 = vmatpush.msrb.mxu0 %v3394_v16  ;;  %v3407_v16 = vld [vmem:[%s7811_s7 + $0xb8] sm:$0xff] }
 0x582   :  { %3272 = vrot.lane.b32.xlu1 %v7862_v3, %s4697_s6  ;;  %3274 = vrot.lane.b32.xlu2 %v7865_v54, %s4697_s6  ;;  %v2803_v3 = vpop.f32.mrf.mxu0 }
 0x583   :  { %v3020_v4 = vpop.f32.mrf.mxu2  ;;  %v3085_v57 = vpop.f32.mrf.mxu3 }
 0x584   :  { %v3124_v51 = vadd.f32 %v3020_v4, %v2798_v55  ;;  %v3125_v7 = vadd.f32 %v3085_v57, %v2863_v47  ;;  %v3393_v4 = vld [vmem:[%s7811_s7 + $0x48] sm:$0xff]  ;;  %v3408_v57 = vld [vmem:[%s7811_s7 + $0xc0] sm:$0xff] }
 0x585   :  { %3465 = vmatpush.msrb.mxu0 %v3393_v4  ;;  %3531 = vmatpush.msrb.mxu1 %v3408_v57  ;;  %v3390_v4 = vld [vmem:[%s7811_s7 + $0x30] sm:$0xff] }
 0x586   :  { %v7031_v42 = vadd.f32 %v6867_v52, %v3124_v51  ;;  %v7034_v15 = vadd.f32 %v6869_v28, %v3125_v7  ;;  %v2801_v51 = vadd.f32 %v2800_v40, %v6828_v9  ;;  %v2866_v7 = vadd.f32 %v2865_v62, %v6830_v50  ;;  %v3391_v62 = vld [vmem:[%s7811_s7 + $0x38] sm:$0xff] }
 0x587   :  { %3466 = vmatpush.msrb.mxu0 %v3392_v21  ;;  %3532 = vmatpush.msrb.mxu1 %v3407_v16  ;;  %v3389_v21 = vld [vmem:[%s7811_s7 + $0x28] sm:$0xff]  ;;  %v2804_v16 = vadd.f32 %v2803_v3, %v6834_v10  ;;  %v3403_v10 = vld [vmem:[%s7811_s7 + $0x98] sm:$0xff] }
 0x588   :  { %v7863_v55 = vmax.f32 %v7031_v42, 0.0  ;;  %v7864_v47 = vmax.f32 %v7034_v15, 0.0  ;;  %v7957_v41 = vmax.f32 %v7034_v15, 0.0 }
 0x589   :  { %3467 = vmatpush.msrb.mxu0 %v3391_v62 }
 0x58a   :  { %3278 = vrot.lane.b32.xlu1 %v7864_v47, %s4697_s6  ;;  %3276 = vrot.lane.b32.xlu0 %v7863_v55, %s4697_s6  ;;  %v3406_v55 = vld [vmem:[%s7811_s7 + $0xb0] sm:$0xff] }
 0x58b   :  { %v3023_v43 = vpop.f32.mrf.mxu2  ;;  %v3088_v9 = vpop.f32.mrf.mxu3  ;;  %3533 = vmatpush.msrb.mxu1 %v3406_v55  ;;  %v3404_v55 = vld [vmem:[%s7811_s7 + $0xa0] sm:$0xff]  ;;  %3468 = vmatpush.msrb.mxu0 %v3390_v4  ;;  %v3387_v4 = vld [vmem:[%s7811_s7 + $0x18] sm:$0xff] }
 0x58c   :  { %v3126_v50 = vadd.f32 %v3023_v43, %v2801_v51  ;;  %v3127_v40 = vadd.f32 %v3088_v9, %v2866_v7  ;;  %v3405_v7 = vld [vmem:[%s7811_s7 + $0xa8] sm:$0xff]  ;;  %v2869_v43 = vadd.f32 %v2868_v18, %v6836_v61  ;;  %v2806_v9 = vpop.f32.mrf.mxu0 }
 0x58d   :  { %3534 = vmatpush.msrb.mxu1 %v3405_v7  ;;  %3469 = vmatpush.msrb.mxu0 %v3389_v21  ;;  %v3402_v7 = vld [vmem:[%s7811_s7 + $0x90] sm:$0xff] }
 0x58e   :  { %v7071_v47 = vadd.f32 %v6867_v52, %v3126_v50  ;;  %v7074_v54 = vadd.f32 %v6869_v28, %v3127_v40  ;;  %v2871_v50 = vpop.f32.mrf.mxu1  ;;  %v3388_v40 = vld [vmem:[%s7811_s7 + $0x20] sm:$0xff]  ;;  %v3386_v21 = vld [vmem:[%s7811_s7 + $0x10] sm:$0xff] }
 0x58f   :  { %3535 = vmatpush.msrb.mxu1 %v3404_v55  ;;  %3470 = vmatpush.msrb.mxu0 %v3388_v40  ;;  %v3385_v40 = vld [vmem:[%s7811_s7 + $0x8] sm:$0xff] }
 0x590   :  { %v7866_v57 = vmax.f32 %v7071_v47, 0.0  ;;  %v7867_v51 = vmax.f32 %v7074_v54, 0.0 }
 0x591   :  { %3536 = vmatpush.msrb.mxu1 %v3403_v10  ;;  %3471 = vmatpush.msrb.mxu0 %v3387_v4  ;;  %v3400_v10 = vld [vmem:[%s7811_s7 + $0x80] sm:$0xff] }
 0x592   :  { %3280 = vrot.lane.b32.xlu2 %v7866_v57, %s4697_s6  ;;  %3282 = vrot.lane.b32.xlu0 %v7867_v51, %s4697_s6 }
 0x593   :  { %v3026_v3 = vpop.f32.mrf.mxu2  ;;  %v3091_v61 = vpop.f32.mrf.mxu3  ;;  %3537 = vmatpush.msrb.mxu1 %v3402_v7  ;;  %3472 = vmatpush.msrb.mxu0 %v3386_v21 }
 0x594   :  { %v3128_v18 = vadd.f32 %v3026_v3, %v2804_v16  ;;  %v3129_v62 = vadd.f32 %v3091_v61, %v2869_v43  ;;  %v3401_v43 = vld [vmem:[%s7811_s7 + $0x88] sm:$0xff]  ;;  %v2807_v3 = vadd.f32 %v2806_v9, %v6840_v26  ;;  %v2872_v61 = vadd.f32 %v2871_v50, %v6842_v34  ;;  %v2809_v9 = vpop.f32.mrf.mxu0 }
 0x595   :  { %3538 = vmatpush.msrb.mxu1 %v3401_v43  ;;  %3473 = vmatpush.msrb.mxu0 %v3385_v40 }
 0x596   :  { %v7111_v57 = vadd.f32 %v6867_v52, %v3128_v18  ;;  %v7114_v51 = vadd.f32 %v6869_v28, %v3129_v62  ;;  %v3384_v18 = vld [vmem:[%s7811_s7] sm:$0xff]  ;;  %v2874_v34 = vpop.f32.mrf.mxu1 }
 0x597   :  { %3539 = vmatpush.msrb.mxu1 %v3400_v10  ;;  %3474 = vmatpush.msrb.mxu0 %v3384_v18  ;;  %v2875_v40 = vadd.f32 %v2874_v34, %v6848_v6 }
 0x598   :  { %v7868_v55 = vmax.f32 %v7111_v57, 0.0  ;;  %v7869_v16 = vmax.f32 %v7114_v51, 0.0 }
 0x59a   :  { %3284 = vrot.lane.b32.xlu1 %v7868_v55, %s4697_s6  ;;  %3286 = vrot.lane.b32.xlu2 %v7869_v16, %s4697_s6  ;;  %v2810_v16 = vadd.f32 %v2809_v9, %v6846_v32 }
 0x59b   :  { %v3029_v62 = vpop.f32.mrf.mxu2  ;;  %v3094_v4 = vpop.f32.mrf.mxu3 }
 0x59c   :  { %v3130_v7 = vadd.f32 %v3029_v62, %v2807_v3  ;;  %v3131_v26 = vadd.f32 %v3094_v4, %v2872_v61  ;;  %v2812_v32 = vpop.f32.mrf.mxu0 }
 0x59d   :  { %v2813_v9 = vadd.f32 %v2812_v32, %v6852_v31 }
 0x59e   :  { %v7142_v50 = vadd.f32 %v6867_v52, %v3130_v7  ;;  %v7145_v21 = vadd.f32 %v6869_v28, %v3131_v26  ;;  %v2877_v6 = vpop.f32.mrf.mxu1 }
 0x59f   :  { %v2878_v34 = vadd.f32 %v2877_v6, %v6854_v46 }
 0x5a0   :  { %v3200_v43 = vmax.f32 %v7142_v50, 0.0  ;;  %v3201_v55 = vmax.f32 %v7145_v21, 0.0 }
 0x5a2   :  { %3290 = vrot.lane.b32.xlu1 %v3201_v55, %s4697_s6  ;;  %3288 = vrot.lane.b32.xlu0 %v3200_v43, %s4697_s6 }
 0x5a3   :  { %v3032_v10 = vpop.f32.mrf.mxu2  ;;  %v3097_v3 = vpop.f32.mrf.mxu3 }
 0x5a4   :  { %v3132_v61 = vadd.f32 %v3032_v10, %v2810_v16  ;;  %v3133_v18 = vadd.f32 %v3097_v3, %v2875_v40  ;;  %v2815_v32 = vpop.f32.mrf.mxu0 }
 0x5a6   :  { %v7158_v62 = vadd.f32 %v6867_v52, %v3132_v61  ;;  %v7161_v4 = vadd.f32 %v6869_v28, %v3133_v18  ;;  %v2880_v6 = vpop.f32.mrf.mxu1 }
 0x5a8   :  { %v7870_v7 = vmax.f32 %v7158_v62, 0.0  ;;  %v7871_v26 = vmax.f32 %v7161_v4, 0.0 }
 0x5aa   :  { %3292 = vrot.lane.b32.xlu2 %v7870_v7, %s4697_s6  ;;  %3294 = vrot.lane.b32.xlu0 %v7871_v26, %s4697_s6  ;;  %v2816_v7 = vadd.f32 %v2815_v32, %v6858_v17  ;;  %v2881_v26 = vadd.f32 %v2880_v6, %v6860_v30 }
 0x5ab   :  { %v3035_v16 = vpop.f32.mrf.mxu2  ;;  %v3100_v40 = vpop.f32.mrf.mxu3 }
 0x5ac   :  { %v3134_v10 = vadd.f32 %v3035_v16, %v2813_v9  ;;  %v3135_v3 = vadd.f32 %v3100_v40, %v2878_v34 }
 0x5ae   :  { %v7174_v61 = vadd.f32 %v6867_v52, %v3134_v10  ;;  %v7177_v18 = vadd.f32 %v6869_v28, %v3135_v3 }
 0x5b0   :  { %v7872_v31 = vmax.f32 %v7174_v61, 0.0  ;;  %v3205_v46 = vmax.f32 %v7177_v18, 0.0 }
 0x5b2   :  { %3296 = vrot.lane.b32.xlu1 %v7872_v31, %s4697_s6  ;;  %3298 = vrot.lane.b32.xlu2 %v3205_v46, %s4697_s6 }
 0x5b3   :  { %v3038_v9 = vpop.f32.mrf.mxu2  ;;  %v3103_v34 = vpop.f32.mrf.mxu3 }
 0x5b4   :  { %v3136_v16 = vadd.f32 %v3038_v9, %v2816_v7  ;;  %v3137_v40 = vadd.f32 %v3103_v34, %v2881_v26  ;;  %v3243_v10 = vpop.permute.xlu1 %3242  ;;  %v3241_v3 = vpop.permute.xlu0 %3240 }
 0x5b5   :  { %v3353_v17 = vmax.f32 %v3177_v12, %v3243_v10  ;;  %v3304_v30 = vsel %vm2189_vm8, %v3241_v3, %v3243_v10  ;;  %v3245_v7 = vpop.permute.xlu2 %3244 }
 0x5b6   :  { %v7193_v32 = vadd.f32 %v6867_v52, %v3136_v16  ;;  %v7196_v6 = vadd.f32 %v6869_v28, %v3137_v40  ;;  %v3352_v31 = vmax.f32 %v3176_v0, %v3304_v30 }
 0x5b7   :  { %4556 = vmatmul.msk.f32.vlgmr.msrb.gmra.mxu1 %vm3410_vm10, %v3353_v17 }
 0x5b8   :  { %v3206_v26 = vmax.f32 %v7193_v32, 0.0  ;;  %v3207_v9 = vmax.f32 %v7196_v6, 0.0  ;;  %3475 = vmatmul.f32.vlgmr.msrb.gmra.mxu0 %v3352_v31 }
 0x5ba   :  { %3302 = vrot.lane.b32.xlu1 %v3207_v9, %s4697_s6  ;;  %3300 = vrot.lane.b32.xlu0 %v3206_v26, %s4697_s6 }
 0x5bc   :  { %v3247_v52 = vpop.permute.xlu0 %3246 }
 0x5bd   :  { %v3305_v28 = vsel %vm2189_vm8, %v3245_v7, %v3247_v52  ;;  %v3355_v14 = vmax.f32 %v3179_v48, %v3247_v52  ;;  %v3251_v0 = vpop.permute.xlu2 %3250  ;;  %v7956_v52 = vmax.f32 %v7003_v44, 0.0 }
 0x5be   :  { %v3354_v20 = vmax.f32 %v3178_v37, %v3305_v28  ;;  %v3357_v31 = vmax.f32 %v3181_v33, %v3251_v0 }
 0x5bf   :  { %4557 = vmatmul.msk.f32.gmra.mxu1 %vm3410_vm10, %v3355_v14 }
 0x5c0   :  { %3478 = vmatmul.f32.gmra.mxu0 %v3354_v20  ;;  %v7958_v20 = vmax.f32 %v7031_v42, 0.0  ;;  %v7961_v42 = vmax.f32 %v7114_v51, 0.0 }
 0x5c4   :  { %v3249_v12 = vpop.permute.xlu1 %3248 }
 0x5c5   :  { %v3306_v34 = vsel %vm2189_vm8, %v3249_v12, %v3251_v0  ;;  %v3257_v35 = vpop.permute.xlu2 %3256 }
 0x5c6   :  { %v3356_v16 = vmax.f32 %v3180_v39, %v3306_v34 }
 0x5c7   :  { %4558 = vmatmul.msk.f32.gmra.mxu1 %vm3410_vm10, %v3357_v31  ;;  %v7959_v31 = vmax.f32 %v7074_v54, 0.0 }
 0x5c8   :  { %3481 = vmatmul.f32.gmra.mxu0 %v3356_v16  ;;  %v7960_v16 = vmax.f32 %v7071_v47, 0.0 }
 0x5cc   :  { %v3255_v59 = vpop.permute.xlu1 %3254  ;;  %v3253_v48 = vpop.permute.xlu0 %3252 }
 0x5cd   :  { %v3359_v11 = vmax.f32 %v3183_v36, %v3255_v59  ;;  %v3307_v37 = vsel %vm2189_vm8, %v3253_v48, %v3255_v59  ;;  %v3263_v27 = vpop.permute.xlu2 %3262 }
 0x5ce   :  { %v3358_v40 = vmax.f32 %v3182_v19, %v3307_v37  ;;  %v3363_v29 = vmax.f32 %v3187_v63, %v3263_v27 }
 0x5cf   :  { %4559 = vmatmul.msk.f32.gmra.mxu1 %vm3410_vm10, %v3359_v11 }
 0x5d0   :  { %3484 = vmatmul.f32.gmra.mxu0 %v3358_v40  ;;  %v7962_v40 = vmax.f32 %v7111_v57, 0.0 }
 0x5d4   :  { %v3259_v33 = vpop.permute.xlu0 %3258 }
 0x5d5   :  { %v3308_v5 = vsel %vm2189_vm8, %v3257_v35, %v3259_v33  ;;  %v3361_v39 = vmax.f32 %v3185_v8, %v3259_v33  ;;  %v3269_v38 = vpop.permute.xlu2 %3268 }
 0x5d6   :  { %v3360_v10 = vmax.f32 %v3184_v58, %v3308_v5 }
 0x5d7   :  { %4560 = vmatmul.msk.f32.gmra.mxu1 %vm3410_vm10, %v3361_v39 }
 0x5d8   :  { %3487 = vmatmul.f32.gmra.mxu0 %v3360_v10 }
 0x5dc   :  { %v3261_v36 = vpop.permute.xlu1 %3260 }
 0x5dd   :  { %v3309_v19 = vsel %vm2189_vm8, %v3261_v36, %v3263_v27  ;;  %v3275_v45 = vpop.permute.xlu2 %3274  ;;  %v7963_v27 = vmax.f32 %v7161_v4, 0.0 }
 0x5de   :  { %v3362_v3 = vmax.f32 %v3186_v2, %v3309_v19 }
 0x5df   :  { %4561 = vmatmul.msk.f32.gmra.mxu1 %vm3410_vm10, %v3363_v29  ;;  %v7964_v29 = vmax.f32 %v7158_v62, 0.0 }
 0x5e0   :  { %3490 = vmatmul.f32.gmra.mxu0 %v3362_v3  ;;  %v7965_v3 = vmax.f32 %v7174_v61, 0.0 }
 0x5e4   :  { %v3267_v60 = vpop.permute.xlu1 %3266  ;;  %v3265_v8 = vpop.permute.xlu0 %3264 }
 0x5e5   :  { %v3365_v22 = vmax.f32 %v3189_v25, %v3267_v60  ;;  %v3310_v58 = vsel %vm2189_vm8, %v3265_v8, %v3267_v60 }
 0x5e6   :  { %v3364_v17 = vmax.f32 %v3188_v49, %v3310_v58  ;;  %v3369_v49 = vmax.f32 %v7955_v24, %v3275_v45 }
 0x5e7   :  { %4562 = vmatmul.msk.f32.gmra.mxu1 %vm3410_vm10, %v3365_v22 }
 0x5e8   :  { %3493 = vmatmul.f32.gmra.mxu0 %v3364_v17 }
 0x5ec   :  { %v3271_v63 = vpop.permute.xlu0 %3270  ;;  %v3281_v56 = vpop.permute.xlu2 %3280 }
 0x5ed   :  { %v3311_v53 = vsel %vm2189_vm8, %v3269_v38, %v3271_v63  ;;  %v3367_v2 = vmax.f32 %v3191_v23, %v3271_v63 }
 0x5ee   :  { %v3366_v30 = vmax.f32 %v3190_v13, %v3311_v53 }
 0x5ef   :  { %4563 = vmatmul.msk.f32.gmra.mxu1 %vm3410_vm10, %v3367_v2 }
 0x5f0   :  { %3496 = vmatmul.f32.gmra.mxu0 %v3366_v30 }
 0x5f4   :  { %v3273_v25 = vpop.permute.xlu1 %3272  ;;  %v3287_v15 = vpop.permute.xlu2 %3286 }
 0x5f5   :  { %v3312_v7 = vsel %vm2189_vm8, %v3273_v25, %v3275_v45  ;;  %v3375_v11 = vmax.f32 %v7961_v42, %v3287_v15 }
 0x5f6   :  { %v3368_v28 = vmax.f32 %v7956_v52, %v3312_v7 }
 0x5f7   :  { %4564 = vmatmul.msk.f32.gmra.mxu1 %vm3410_vm10, %v3369_v49 }
 0x5f8   :  { %3499 = vmatmul.f32.gmra.mxu0 %v3368_v28 }
 0x5fc   :  { %v3279_v1 = vpop.permute.xlu1 %3278  ;;  %v3277_v23 = vpop.permute.xlu0 %3276 }
 0x5fd   :  { %v3371_v13 = vmax.f32 %v7957_v41, %v3279_v1  ;;  %v3313_v14 = vsel %vm2189_vm8, %v3277_v23, %v3279_v1 }
 0x5fe   :  { %v3370_v0 = vmax.f32 %v7958_v20, %v3313_v14 }
 0x5ff   :  { %4565 = vmatmul.msk.f32.gmra.mxu1 %vm3410_vm10, %v3371_v13 }
 0x600   :  { %3502 = vmatmul.f32.gmra.mxu0 %v3370_v0 }
 0x604   :  { %v3283_v12 = vpop.permute.xlu0 %3282  ;;  %v3293_v51 = vpop.permute.xlu2 %3292 }
 0x605   :  { %v3314_v44 = vsel %vm2189_vm8, %v3281_v56, %v3283_v12  ;;  %v3373_v34 = vmax.f32 %v7959_v31, %v3283_v12 }
 0x606   :  { %v3372_v59 = vmax.f32 %v7960_v16, %v3314_v44 }
 0x607   :  { %4566 = vmatmul.msk.f32.gmra.mxu1 %vm3410_vm10, %v3373_v34 }
 0x608   :  { %3505 = vmatmul.f32.gmra.mxu0 %v3372_v59 }
 0x60c   :  { %v3285_v48 = vpop.permute.xlu1 %3284 }
 0x60d   :  { %v3315_v37 = vsel %vm2189_vm8, %v3285_v48, %v3287_v15 }
 0x60e   :  { %v3374_v35 = vmax.f32 %v7962_v40, %v3315_v37 }
 0x60f   :  { %4567 = vmatmul.msk.f32.gmra.mxu1 %vm3410_vm10, %v3375_v11 }
 0x610   :  { %3508 = vmatmul.f32.gmra.mxu0 %v3374_v35 }
 0x614   :  { %v3291_v54 = vpop.permute.xlu1 %3290  ;;  %v3289_v33 = vpop.permute.xlu0 %3288 }
 0x615   :  { %v3377_v47 = vmax.f32 %v3201_v55, %v3291_v54  ;;  %v3316_v5 = vsel %vm2189_vm8, %v3289_v33, %v3291_v54  ;;  %v3299_v55 = vpop.permute.xlu2 %3298 }
 0x616   :  { %v3376_v39 = vmax.f32 %v3200_v43, %v3316_v5  ;;  %v3381_v50 = vmax.f32 %v3205_v46, %v3299_v55 }
 0x617   :  { %4568 = vmatmul.msk.f32.gmra.mxu1 %vm3410_vm10, %v3377_v47 }
 0x618   :  { %3511 = vmatmul.f32.gmra.mxu0 %v3376_v39 }
 0x61c   :  { %v3295_v10 = vpop.permute.xlu0 %3294 }
 0x61d   :  { %v3317_v57 = vsel %vm2189_vm8, %v3293_v51, %v3295_v10  ;;  %v3379_v36 = vmax.f32 %v7963_v27, %v3295_v10 }
 0x61e   :  { %v3378_v19 = vmax.f32 %v7964_v29, %v3317_v57 }
 0x61f   :  { %4569 = vmatmul.msk.f32.gmra.mxu1 %vm3410_vm10, %v3379_v36 }
 0x620   :  { %3514 = vmatmul.f32.gmra.mxu0 %v3378_v19 }
 0x624   :  { %v3297_v21 = vpop.permute.xlu1 %3296 }
 0x625   :  { %v3318_v43 = vsel %vm2189_vm8, %v3297_v21, %v3299_v55 }
 0x626   :  { %v3380_v60 = vmax.f32 %v7965_v3, %v3318_v43 }
 0x627   :  { %4570 = vmatmul.msk.f32.gmra.mxu1 %vm3410_vm10, %v3381_v50 }
 0x628   :  { %3517 = vmatmul.f32.gmra.mxu0 %v3380_v60 }
 0x62c   :  { %v3303_v4 = vpop.permute.xlu1 %3302  ;;  %v3301_v8 = vpop.permute.xlu0 %3300 }
 0x62d   :  { %v3383_v62 = vmax.f32 %v3207_v9, %v3303_v4  ;;  %v3319_v22 = vsel %vm2189_vm8, %v3301_v8, %v3303_v4 }
 0x62e   :  { %v3382_v58 = vmax.f32 %v3206_v26, %v3319_v22 }
 0x62f   :  { %4571 = vmatmul.msk.f32.gmra.mxu1 %vm3410_vm10, %v3383_v62 }
 0x630   :  { %3520 = vmatmul.f32.gmra.mxu0 %v3382_v58 }
 0x634   :  { %v3541_v18 = vpop.f32.mrf.mxu1 }
 0x635   :  { %v3476_v46 = vpop.f32.mrf.mxu0 }
 0x636   :  { %v3542_v61 = vadd.f32 %v3541_v18, %v3476_v46 }
 0x638   :  { %v3605_v53 = vrot.slane %v3542_v61, 1 }
 0x63c   :  { %v3544_v17 = vpop.f32.mrf.mxu1 }
 0x63d   :  { %v3479_v38 = vpop.f32.mrf.mxu0 }
 0x63e   :  { %v3545_v63 = vadd.f32 %v3544_v17, %v3479_v38 }
 0x640   :  { %v3606_v2 = vrot.slane %v3545_v63, 1 }
 0x642   :  { %v3607_v30 = vsel %vm2069_vm6, %v3605_v53, %v3606_v2 }
 0x643   :  { %v7300_v6 = vmax.f32 %v3542_v61, %v3607_v30 }
 0x644   :  { %v3547_v9 = vpop.f32.mrf.mxu1 }
 0x645   :  { %v3482_v45 = vpop.f32.mrf.mxu0 }
 0x646   :  { %v3548_v25 = vadd.f32 %v3547_v9, %v3482_v45 }
 0x648   :  { %v3608_v32 = vrot.slane %v3548_v25, 1 }
 0x64a   :  { %v3609_v26 = vsel %vm2069_vm6, %v3606_v2, %v3608_v32 }
 0x64b   :  { %v7303_v24 = vmax.f32 %v3545_v63, %v3609_v26 }
 0x64c   :  { %v3550_v49 = vpop.f32.mrf.mxu1 }
 0x64d   :  { %v3485_v7 = vpop.f32.mrf.mxu0 }
 0x64e   :  { %v3551_v52 = vadd.f32 %v3550_v49, %v3485_v7 }
 0x650   :  { %v3610_v28 = vrot.slane %v3551_v52, 1 }
 0x652   :  { %v3611_v1 = vsel %vm2069_vm6, %v3608_v32, %v3610_v28 }
 0x653   :  { %v7306_v23 = vmax.f32 %v3548_v25, %v3611_v1 }
 0x654   :  { %v3553_v41 = vpop.f32.mrf.mxu1 }
 0x655   :  { %v3488_v13 = vpop.f32.mrf.mxu0 }
 0x656   :  { %v3554_v14 = vadd.f32 %v3553_v41, %v3488_v13 }
 0x658   :  { %v3612_v20 = vrot.slane %v3554_v14, 1 }
 0x65a   :  { %v3613_v0 = vsel %vm2069_vm6, %v3610_v28, %v3612_v20 }
 0x65b   :  { %v7309_v56 = vmax.f32 %v3551_v52, %v3613_v0 }
 0x65c   :  { %v3556_v12 = vpop.f32.mrf.mxu1 }
 0x65d   :  { %v3491_v44 = vpop.f32.mrf.mxu0 }
 0x65e   :  { %v3557_v31 = vadd.f32 %v3556_v12, %v3491_v44 }
 0x660   :  { %v3614_v34 = vrot.slane %v3557_v31, 1 }
 0x662   :  { %v3615_v16 = vsel %vm2069_vm6, %v3612_v20, %v3614_v34 }
 0x663   :  { %v7312_v59 = vmax.f32 %v3554_v14, %v3615_v16 }
 0x664   :  { %v3559_v15 = vpop.f32.mrf.mxu1 }
 0x665   :  { %v3494_v48 = vpop.f32.mrf.mxu0 }
 0x666   :  { %v3560_v42 = vadd.f32 %v3559_v15, %v3494_v48 }
 0x668   :  { %v3616_v11 = vrot.slane %v3560_v42, 1 }
 0x66a   :  { %v3617_v37 = vsel %vm2069_vm6, %v3614_v34, %v3616_v11 }
 0x66b   :  { %v7315_v40 = vmax.f32 %v3557_v31, %v3617_v37  ;;  %v4590_v37 = vld [vmem:[%s7813_s9 + $0xd8] sm:$0xff] }
 0x66c   :  { %v3562_v35 = vpop.f32.mrf.mxu1 }
 0x66d   :  { %v3497_v54 = vpop.f32.mrf.mxu0 }
 0x66e   :  { %v3563_v33 = vadd.f32 %v3562_v35, %v3497_v54  ;;  %v4589_v35 = vld [vmem:[%s7813_s9 + $0xd0] sm:$0xff]  ;;  %v4588_v54 = vld [vmem:[%s7813_s9 + $0xc8] sm:$0xff] }
 0x670   :  { %v3618_v47 = vrot.slane %v3563_v33, 1 }
 0x672   :  { %v3619_v5 = vsel %vm2069_vm6, %v3616_v11, %v3618_v47  ;;  %v4574_v11 = vld [vmem:[%s7812_s8 + $0x8] sm:$0xff] }
 0x673   :  { %v7318_v39 = vmax.f32 %v3560_v42, %v3619_v5  ;;  %v3668_v42 = vld [vmem:[%s7812_s8] sm:$0xff]  ;;  %v4585_v5 = vld [vmem:[%s7813_s9 + $0xb0] sm:$0xff] }
 0x674   :  { %v3565_v51 = vpop.f32.mrf.mxu1 }
 0x675   :  { %v3500_v10 = vpop.f32.mrf.mxu0 }
 0x676   :  { %v7320_v57 = vadd.f32 %v3565_v51, %v3500_v10  ;;  %v4584_v51 = vld [vmem:[%s7813_s9 + $0xa8] sm:$0xff]  ;;  %v4583_v10 = vld [vmem:[%s7813_s9 + $0xa0] sm:$0xff] }
 0x678   :  { %v3620_v27 = vrot.slane %v7320_v57, 1 }
 0x67a   :  { %v3621_v36 = vsel %vm2069_vm6, %v3618_v47, %v3620_v27  ;;  %v4586_v47 = vld [vmem:[%s7813_s9 + $0xb8] sm:$0xff] }
 0x67b   :  { %v7324_v29 = vmax.f32 %v3563_v33, %v3621_v36  ;;  %v4587_v33 = vld [vmem:[%s7813_s9 + $0xc0] sm:$0xff]  ;;  %v4580_v36 = vld [vmem:[%s7813_s9 + $0x88] sm:$0xff] }
 0x67c   :  { %v3568_v19 = vpop.f32.mrf.mxu1 }
 0x67d   :  { %v3503_v55 = vpop.f32.mrf.mxu0 }
 0x67e   :  { %v3569_v52 = vadd.f32 %v3568_v19, %v3503_v55  ;;  %v4579_v19 = vld [vmem:[%s7813_s9 + $0x80] sm:$0xff]  ;;  %v4578_v55 = vld [vmem:[%s7813_s9 + $0x78] sm:$0xff] }
 0x680   :  { %v3622_v0 = vrot.slane %v3569_v52, 1 }
 0x682   :  { %v3623_v16 = vsel %vm2069_vm6, %v3620_v27, %v3622_v0  ;;  %v4581_v27 = vld [vmem:[%s7813_s9 + $0x90] sm:$0xff] }
 0x683   :  { %v7369_v48 = vmax.f32 %v7320_v57, %v3623_v16  ;;  %v4582_v57 = vld [vmem:[%s7813_s9 + $0x98] sm:$0xff]  ;;  %v4626_v16 = vld [vmem:[%s7813_s9 + $0x1b0] sm:$0xff] }
 0x684   :  { %v3571_v21 = vpop.f32.mrf.mxu1 }
 0x685   :  { %v3506_v50 = vpop.f32.mrf.mxu0 }
 0x686   :  { %v3572_v32 = vadd.f32 %v3571_v21, %v3506_v50  ;;  %v4577_v21 = vld [vmem:[%s7813_s9 + $0x70] sm:$0xff]  ;;  %v3709_v50 = vld [vmem:[%s7813_s9 + $0x68] sm:$0xff] }
 0x688   :  { %v3624_v13 = vrot.slane %v3572_v32, 1 }
 0x68a   :  { %v3625_v31 = vsel %vm2069_vm6, %v3622_v0, %v3624_v13 }
 0x68b   :  { %v7363_v15 = vmax.f32 %v3569_v52, %v3625_v31  ;;  %v4600_v52 = vld [vmem:[%s7813_s9 + $0x100] sm:$0xff] }
 0x68c   :  { %v3574_v43 = vpop.f32.mrf.mxu1 }
 0x68d   :  { %v3509_v3 = vpop.f32.mrf.mxu0 }
 0x68e   :  { %v3575_v30 = vadd.f32 %v3574_v43, %v3509_v3  ;;  %v3708_v43 = vld [vmem:[%s7813_s9 + $0x60] sm:$0xff]  ;;  %v3707_v3 = vld [vmem:[%s7813_s9 + $0x58] sm:$0xff] }
 0x690   :  { %v3626_v28 = vrot.slane %v3575_v30, 1 }
 0x692   :  { %v3627_v12 = vsel %vm2069_vm6, %v3624_v13, %v3626_v28  ;;  %v4597_v13 = vld [vmem:[%s7813_s9 + $0xe8] sm:$0xff] }
 0x693   :  { %v7357_v34 = vmax.f32 %v3572_v32, %v3627_v12  ;;  %v4603_v32 = vld [vmem:[%s7813_s9 + $0x118] sm:$0xff] }
 0x694   :  { %v3577_v60 = vpop.f32.mrf.mxu1  ;;  %v4627_v12 = vld [vmem:[%s7813_s9 + $0x1b8] sm:$0xff] }
 0x695   :  { %v3512_v4 = vpop.f32.mrf.mxu0 }
 0x696   :  { %v3578_v63 = vadd.f32 %v3577_v60, %v3512_v4  ;;  %v3706_v60 = vld [vmem:[%s7813_s9 + $0x50] sm:$0xff]  ;;  %v3705_v4 = vld [vmem:[%s7813_s9 + $0x48] sm:$0xff] }
 0x698   :  { %v3628_v26 = vrot.slane %v3578_v63, 1 }
 0x69a   :  { %v3629_v14 = vsel %vm2069_vm6, %v3626_v28, %v3628_v26  ;;  %v4599_v28 = vld [vmem:[%s7813_s9 + $0xf8] sm:$0xff] }
 0x69b   :  { %v7351_v44 = vmax.f32 %v3575_v30, %v3629_v14  ;;  %v4606_v30 = vld [vmem:[%s7813_s9 + $0x130] sm:$0xff]  ;;  %v4596_v14 = vld [vmem:[%s7813_s9 + $0xe0] sm:$0xff] }
 0x69c   :  { %v3580_v8 = vpop.f32.mrf.mxu1 }
 0x69d   :  { %v3515_v62 = vpop.f32.mrf.mxu0 }
 0x69e   :  { %v3581_v61 = vadd.f32 %v3580_v8, %v3515_v62  ;;  %v3704_v8 = vld [vmem:[%s7813_s9 + $0x40] sm:$0xff]  ;;  %v3703_v62 = vld [vmem:[%s7813_s9 + $0x38] sm:$0xff] }
 0x6a0   :  { %v3630_v9 = vrot.slane %v3581_v61, 1 }
 0x6a2   :  { %v3631_v1 = vsel %vm2069_vm6, %v3628_v26, %v3630_v9  ;;  %v4602_v26 = vld [vmem:[%s7813_s9 + $0x110] sm:$0xff] }
 0x6a3   :  { %v7345_v20 = vmax.f32 %v3578_v63, %v3631_v1  ;;  %v4609_v63 = vld [vmem:[%s7813_s9 + $0x148] sm:$0xff]  ;;  %v4598_v1 = vld [vmem:[%s7813_s9 + $0xf0] sm:$0xff] }
 0x6a4   :  { %v3583_v22 = vpop.f32.mrf.mxu1 }
 0x6a5   :  { %v3518_v58 = vpop.f32.mrf.mxu0 }
 0x6a6   :  { %v3584_v18 = vadd.f32 %v3583_v22, %v3518_v58  ;;  %v3702_v22 = vld [vmem:[%s7813_s9 + $0x30] sm:$0xff]  ;;  %v3701_v58 = vld [vmem:[%s7813_s9 + $0x28] sm:$0xff] }
 0x6a8   :  { %v3632_v53 = vrot.slane %v3584_v18, 1 }
 0x6aa   :  { %v3633_v49 = vsel %vm2069_vm6, %v3630_v9, %v3632_v53  ;;  %v4605_v9 = vld [vmem:[%s7813_s9 + $0x128] sm:$0xff] }
 0x6ab   :  { %v7339_v41 = vmax.f32 %v3581_v61, %v3633_v49  ;;  %v3698_v61 = vld [vmem:[%s7813_s9 + $0x10] sm:$0xff]  ;;  %v4601_v49 = vld [vmem:[%s7813_s9 + $0x108] sm:$0xff] }
 0x6ac   :  { %v3586_v46 = vpop.f32.mrf.mxu1 }
 0x6ad   :  { %v3521_v17 = vpop.f32.mrf.mxu0 }
 0x6ae   :  { %v3587_v38 = vadd.f32 %v3586_v46, %v3521_v17  ;;  %v3699_v46 = vld [vmem:[%s7813_s9 + $0x18] sm:$0xff]  ;;  %v3697_v17 = vld [vmem:[%s7813_s9 + $0x8] sm:$0xff] }
 0x6b0   :  { %v3634_v2 = vrot.slane %v3587_v38, 1 }
 0x6b2   :  { %v3635_v45 = vsel %vm2069_vm6, %v3632_v53, %v3634_v2  ;;  %v7327_v25 = vmax.f32 %v3587_v38, %v3634_v2  ;;  %v3696_v38 = vld [vmem:[%s7813_s9] sm:$0xff]  ;;  %v4607_v2 = vld [vmem:[%s7813_s9 + $0x138] sm:$0xff] }
 0x6b3   :  { %v7330_v7 = vmax.f32 %v3584_v18, %v3635_v45  ;;  %v3700_v18 = vld [vmem:[%s7813_s9 + $0x20] sm:$0xff] }
 0x6b4   :  { %4572 = vmatpush.msk.msra.mxu2 %vm2069_vm6, %v7327_v25  ;;  %4575 = vmatpush.msk.msra.mxu3 %vm2069_vm6, %v7327_v25  ;;  %v4608_v53 = vld [vmem:[%s7813_s9 + $0x140] sm:$0xff] }
 0x6b5   :  { %4648 = vmatpush.msk.msra.mxu0 %vm2069_vm6, %v7327_v25  ;;  %v4604_v45 = vld [vmem:[%s7813_s9 + $0x120] sm:$0xff] }
 0x6b6   :  { %3677 = vmatpush.msra.mxu2 %v7330_v7  ;;  %3716 = vmatpush.msra.mxu3 %v7330_v7 }
 0x6b7   :  { %3994 = vmatpush.msra.mxu0 %v7330_v7 }
 0x6b8   :  { %3678 = vmatpush.msra.mxu2 %v7339_v41  ;;  %3717 = vmatpush.msra.mxu3 %v7339_v41 }
 0x6b9   :  { %3995 = vmatpush.msra.mxu0 %v7339_v41 }
 0x6ba   :  { %3679 = vmatpush.msra.mxu2 %v7345_v20  ;;  %3718 = vmatpush.msra.mxu3 %v7345_v20 }
 0x6bb   :  { %3996 = vmatpush.msra.mxu0 %v7345_v20 }
 0x6bc   :  { %3680 = vmatpush.msra.mxu2 %v7351_v44  ;;  %3719 = vmatpush.msra.mxu3 %v7351_v44 }
 0x6bd   :  { %3997 = vmatpush.msra.mxu0 %v7351_v44 }
 0x6be   :  { %3681 = vmatpush.msra.mxu2 %v7357_v34  ;;  %3720 = vmatpush.msra.mxu3 %v7357_v34 }
 0x6bf   :  { %3998 = vmatpush.msra.mxu0 %v7357_v34 }
 0x6c0   :  { %3682 = vmatpush.msra.mxu2 %v7363_v15  ;;  %3721 = vmatpush.msra.mxu3 %v7363_v15 }
 0x6c1   :  { %3999 = vmatpush.msra.mxu0 %v7363_v15 }
 0x6c2   :  { %3683 = vmatpush.msra.mxu2 %v7369_v48  ;;  %3722 = vmatpush.msra.mxu3 %v7369_v48 }
 0x6c3   :  { %4000 = vmatpush.msra.mxu0 %v7369_v48 }
 0x6c4   :  { %3684 = vmatpush.msra.mxu2 %v7324_v29  ;;  %3723 = vmatpush.msra.mxu3 %v7324_v29 }
 0x6c5   :  { %4001 = vmatpush.msra.mxu0 %v7324_v29 }
 0x6c6   :  { %3685 = vmatpush.msra.mxu2 %v7318_v39  ;;  %3724 = vmatpush.msra.mxu3 %v7318_v39 }
 0x6c7   :  { %4002 = vmatpush.msra.mxu0 %v7318_v39 }
 0x6c8   :  { %3686 = vmatpush.msra.mxu2 %v7315_v40  ;;  %3725 = vmatpush.msra.mxu3 %v7315_v40 }
 0x6c9   :  { %4003 = vmatpush.msra.mxu0 %v7315_v40 }
 0x6ca   :  { %3687 = vmatpush.msra.mxu2 %v7312_v59  ;;  %3726 = vmatpush.msra.mxu3 %v7312_v59 }
 0x6cb   :  { %4004 = vmatpush.msra.mxu0 %v7312_v59 }
 0x6cc   :  { %3688 = vmatpush.msra.mxu2 %v7309_v56  ;;  %3727 = vmatpush.msra.mxu3 %v7309_v56 }
 0x6cd   :  { %4005 = vmatpush.msra.mxu0 %v7309_v56 }
 0x6ce   :  { %3689 = vmatpush.msra.mxu2 %v7306_v23  ;;  %3728 = vmatpush.msra.mxu3 %v7306_v23 }
 0x6cf   :  { %4006 = vmatpush.msra.mxu0 %v7306_v23 }
 0x6d0   :  { %3690 = vmatpush.msra.mxu2 %v7303_v24  ;;  %3729 = vmatpush.msra.mxu3 %v7303_v24 }
 0x6d1   :  { %4007 = vmatpush.msra.mxu0 %v7303_v24 }
 0x6d2   :  { %3691 = vmatpush.msra.mxu2 %v7300_v6  ;;  %3730 = vmatpush.msra.mxu3 %v7300_v6 }
 0x6d3   :  { %4008 = vmatpush.msra.mxu0 %v7300_v6  ;;  %4573 = vmatmul.msk.f32.vlgmr.msra.gmra.mxu2 %vm3669_vm11, %v3668_v42  ;;  %v4625_v42 = vld [vmem:[%s7813_s9 + $0x1a8] sm:$0xff] }
 0x6d4   :  { %4576 = vmatmul.msk.f32.vlgmr.msra.gmra.mxu3 %vm3669_vm11, %v4574_v11  ;;  %3755 = vmatpush.msrb.mxu2 %v4590_v37  ;;  %v4624_v11 = vld [vmem:[%s7813_s9 + $0x1a0] sm:$0xff]  ;;  %v4593_v37 = vld [vmem:[%s7812_s8 + $0x10] sm:$0xff] }
 0x6d5   :  { %3778 = vmatpush.msrb.mxu3 %v3709_v50  ;;  %v4644_v50 = vld [vmem:[%s7813_s9 + $0x220] sm:$0xff] }
 0x6d6   :  { %3756 = vmatpush.msrb.mxu2 %v4589_v35  ;;  %v4623_v35 = vld [vmem:[%s7813_s9 + $0x198] sm:$0xff] }
 0x6d7   :  { %3779 = vmatpush.msrb.mxu3 %v3708_v43  ;;  %v4643_v43 = vld [vmem:[%s7813_s9 + $0x218] sm:$0xff] }
 0x6d8   :  { %3757 = vmatpush.msrb.mxu2 %v4588_v54  ;;  %v4622_v54 = vld [vmem:[%s7813_s9 + $0x190] sm:$0xff] }
 0x6d9   :  { %3780 = vmatpush.msrb.mxu3 %v3707_v3  ;;  %v4642_v3 = vld [vmem:[%s7813_s9 + $0x210] sm:$0xff] }
 0x6da   :  { %3758 = vmatpush.msrb.mxu2 %v4587_v33  ;;  %v4621_v33 = vld [vmem:[%s7813_s9 + $0x188] sm:$0xff] }
 0x6db   :  { %3781 = vmatpush.msrb.mxu3 %v3706_v60  ;;  %v4611_v60 = vld [vmem:[%s7812_s8 + $0x18] sm:$0xff] }
 0x6dc   :  { %3759 = vmatpush.msrb.mxu2 %v4586_v47  ;;  %v4620_v47 = vld [vmem:[%s7813_s9 + $0x180] sm:$0xff] }
 0x6dd   :  { %3782 = vmatpush.msrb.mxu3 %v3705_v4  ;;  %v4641_v4 = vld [vmem:[%s7813_s9 + $0x208] sm:$0xff] }
 0x6de   :  { %3760 = vmatpush.msrb.mxu2 %v4585_v5  ;;  %v4619_v5 = vld [vmem:[%s7813_s9 + $0x178] sm:$0xff] }
 0x6df   :  { %3783 = vmatpush.msrb.mxu3 %v3704_v8  ;;  %v4640_v8 = vld [vmem:[%s7813_s9 + $0x200] sm:$0xff] }
 0x6e0   :  { %3761 = vmatpush.msrb.mxu2 %v4584_v51  ;;  %v4618_v51 = vld [vmem:[%s7813_s9 + $0x170] sm:$0xff] }
 0x6e1   :  { %3784 = vmatpush.msrb.mxu3 %v3703_v62  ;;  %v4639_v62 = vld [vmem:[%s7813_s9 + $0x1f8] sm:$0xff] }
 0x6e2   :  { %3762 = vmatpush.msrb.mxu2 %v4583_v10  ;;  %v4617_v10 = vld [vmem:[%s7813_s9 + $0x168] sm:$0xff] }
 0x6e3   :  { %3785 = vmatpush.msrb.mxu3 %v3702_v22  ;;  %v4638_v22 = vld [vmem:[%s7813_s9 + $0x1f0] sm:$0xff] }
 0x6e4   :  { %3763 = vmatpush.msrb.mxu2 %v4582_v57  ;;  %v4616_v57 = vld [vmem:[%s7813_s9 + $0x160] sm:$0xff] }
 0x6e5   :  { %3786 = vmatpush.msrb.mxu3 %v3701_v58  ;;  %v4637_v58 = vld [vmem:[%s7813_s9 + $0x1e8] sm:$0xff] }
 0x6e6   :  { %3764 = vmatpush.msrb.mxu2 %v4581_v27  ;;  %v4615_v27 = vld [vmem:[%s7813_s9 + $0x158] sm:$0xff] }
 0x6e7   :  { %3787 = vmatpush.msrb.mxu3 %v3700_v18  ;;  %v4636_v18 = vld [vmem:[%s7813_s9 + $0x1e0] sm:$0xff] }
 0x6e8   :  { %3765 = vmatpush.msrb.mxu2 %v4580_v36  ;;  %v4614_v36 = vld [vmem:[%s7813_s9 + $0x150] sm:$0xff] }
 0x6e9   :  { %3788 = vmatpush.msrb.mxu3 %v3699_v46  ;;  %v4635_v46 = vld [vmem:[%s7813_s9 + $0x1d8] sm:$0xff] }
 0x6ea   :  { %3766 = vmatpush.msrb.mxu2 %v4579_v19 }
 0x6eb   :  { %3789 = vmatpush.msrb.mxu3 %v3698_v61  ;;  %v4634_v61 = vld [vmem:[%s7813_s9 + $0x1d0] sm:$0xff] }
 0x6ec   :  { %3767 = vmatpush.msrb.mxu2 %v4578_v55  ;;  %v4645_v55 = vld [vmem:[%s7813_s9 + $0x228] sm:$0xff] }
 0x6ed   :  { %3790 = vmatpush.msrb.mxu3 %v3697_v17  ;;  %v4633_v17 = vld [vmem:[%s7813_s9 + $0x1c8] sm:$0xff] }
 0x6ee   :  { %3768 = vmatpush.msrb.mxu2 %v4577_v21 }
 0x6ef   :  { %3791 = vmatpush.msrb.mxu3 %v3696_v38  ;;  %v4632_v38 = vld [vmem:[%s7813_s9 + $0x1c0] sm:$0xff] }
 0x6f0   :  { %4594 = vmatpush.msk.msra.mxu2 %vm2069_vm6, %v7327_v25 }
 0x6f1   :  { %3841 = vmatpush.msra.mxu3 %v4609_v63  ;;  %v4654_v63 = vld [vmem:[%s7813_s9 + $0x250] sm:$0xff] }
 0x6f2   :  { %3802 = vmatpush.msra.mxu2 %v7330_v7 }
 0x6f3   :  { %3842 = vmatpush.msra.mxu3 %v4608_v53  ;;  %v4653_v53 = vld [vmem:[%s7813_s9 + $0x248] sm:$0xff] }
 0x6f4   :  { %3803 = vmatpush.msra.mxu2 %v7339_v41 }
 0x6f5   :  { %3843 = vmatpush.msra.mxu3 %v4607_v2  ;;  %v4652_v2 = vld [vmem:[%s7813_s9 + $0x240] sm:$0xff] }
 0x6f6   :  { %3804 = vmatpush.msra.mxu2 %v7345_v20 }
 0x6f7   :  { %3844 = vmatpush.msra.mxu3 %v4606_v30  ;;  %v4651_v30 = vld [vmem:[%s7813_s9 + $0x238] sm:$0xff] }
 0x6f8   :  { %3805 = vmatpush.msra.mxu2 %v7351_v44 }
 0x6f9   :  { %3845 = vmatpush.msra.mxu3 %v4605_v9  ;;  %v4650_v9 = vld [vmem:[%s7813_s9 + $0x230] sm:$0xff] }
 0x6fa   :  { %3806 = vmatpush.msra.mxu2 %v7357_v34 }
 0x6fb   :  { %3846 = vmatpush.msra.mxu3 %v4604_v45 }
 0x6fc   :  { %3807 = vmatpush.msra.mxu2 %v7363_v15 }
 0x6fd   :  { %3847 = vmatpush.msra.mxu3 %v4603_v32  ;;  %v4681_v32 = vld [vmem:[%s7813_s9 + $0x308] sm:$0xff] }
 0x6fe   :  { %3808 = vmatpush.msra.mxu2 %v7369_v48 }
 0x6ff   :  { %3848 = vmatpush.msra.mxu3 %v4602_v26  ;;  %v4680_v26 = vld [vmem:[%s7813_s9 + $0x300] sm:$0xff] }
 0x700   :  { %3809 = vmatpush.msra.mxu2 %v7324_v29 }
 0x701   :  { %3849 = vmatpush.msra.mxu3 %v4601_v49  ;;  %v4679_v49 = vld [vmem:[%s7813_s9 + $0x2f8] sm:$0xff] }
 0x702   :  { %3810 = vmatpush.msra.mxu2 %v7318_v39 }
 0x703   :  { %3850 = vmatpush.msra.mxu3 %v4600_v52  ;;  %v4678_v52 = vld [vmem:[%s7813_s9 + $0x2f0] sm:$0xff] }
 0x704   :  { %3811 = vmatpush.msra.mxu2 %v7315_v40 }
 0x705   :  { %3851 = vmatpush.msra.mxu3 %v4599_v28  ;;  %v4677_v28 = vld [vmem:[%s7813_s9 + $0x2e8] sm:$0xff] }
 0x706   :  { %3812 = vmatpush.msra.mxu2 %v7312_v59 }
 0x707   :  { %3852 = vmatpush.msra.mxu3 %v4598_v1  ;;  %v4676_v1 = vld [vmem:[%s7813_s9 + $0x2e0] sm:$0xff] }
 0x708   :  { %3813 = vmatpush.msra.mxu2 %v7309_v56 }
 0x709   :  { %3853 = vmatpush.msra.mxu3 %v4597_v13  ;;  %v4675_v13 = vld [vmem:[%s7813_s9 + $0x2d8] sm:$0xff] }
 0x70a   :  { %3814 = vmatpush.msra.mxu2 %v7306_v23 }
 0x70b   :  { %3854 = vmatpush.msra.mxu3 %v4596_v14  ;;  %v4674_v14 = vld [vmem:[%s7813_s9 + $0x2d0] sm:$0xff] }
 0x70c   :  { %3815 = vmatpush.msra.mxu2 %v7303_v24 }
 0x70e   :  { %3816 = vmatpush.msra.mxu2 %v7300_v6 }
 0x756   :  { %v3693_v0 = vpop.f32.mrf.mxu2 }
 0x757   :  { %v3732_v31 = vpop.f32.mrf.mxu3  ;;  %4592 = vmatmul.msk.f32.vlgmr.msrb.gmra.mxu3 %vm2189_vm8, %v3693_v0  ;;  %v4673_v0 = vld [vmem:[%s7813_s9 + $0x2c8] sm:$0xff] }
 0x758   :  { %4591 = vmatmul.msk.f32.vlgmr.msrb.gmra.mxu2 %vm2189_vm8, %v3732_v31  ;;  %4612 = vmatpush.msk.msrb.mxu3 %vm2069_vm6, %v7327_v25 }
 0x759   :  { %3905 = vmatpush.msrb.mxu2 %v4627_v12 }
 0x75a   :  { %3866 = vmatpush.msrb.mxu3 %v7330_v7 }
 0x75b   :  { %3906 = vmatpush.msrb.mxu2 %v4626_v16 }
 0x75c   :  { %3867 = vmatpush.msrb.mxu3 %v7339_v41 }
 0x75d   :  { %3907 = vmatpush.msrb.mxu2 %v4625_v42  ;;  %v4665_v42 = vld [vmem:[%s7812_s8 + $0x30] sm:$0xff] }
 0x75e   :  { %3868 = vmatpush.msrb.mxu3 %v7345_v20 }
 0x75f   :  { %3908 = vmatpush.msrb.mxu2 %v4624_v11  ;;  %v4672_v11 = vld [vmem:[%s7813_s9 + $0x2c0] sm:$0xff] }
 0x760   :  { %4595 = vmatmul.msk.f32.vlgmr.msra.gmra.mxu2 %vm3669_vm11, %v4593_v37  ;;  %3869 = vmatpush.msrb.mxu3 %v7351_v44  ;;  %v4671_v37 = vld [vmem:[%s7813_s9 + $0x2b8] sm:$0xff] }
 0x761   :  { %3909 = vmatpush.msrb.mxu2 %v4623_v35  ;;  %v4670_v35 = vld [vmem:[%s7813_s9 + $0x2b0] sm:$0xff] }
 0x762   :  { %3870 = vmatpush.msrb.mxu3 %v7357_v34 }
 0x763   :  { %3910 = vmatpush.msrb.mxu2 %v4622_v54  ;;  %v4669_v54 = vld [vmem:[%s7813_s9 + $0x2a8] sm:$0xff] }
 0x764   :  { %3871 = vmatpush.msrb.mxu3 %v7363_v15 }
 0x765   :  { %3911 = vmatpush.msrb.mxu2 %v4621_v33  ;;  %v4668_v33 = vld [vmem:[%s7813_s9 + $0x2a0] sm:$0xff] }
 0x766   :  { %3872 = vmatpush.msrb.mxu3 %v7369_v48 }
 0x767   :  { %3912 = vmatpush.msrb.mxu2 %v4620_v47 }
 0x768   :  { %3873 = vmatpush.msrb.mxu3 %v7324_v29 }
 0x769   :  { %3913 = vmatpush.msrb.mxu2 %v4619_v5 }
 0x76a   :  { %3874 = vmatpush.msrb.mxu3 %v7318_v39 }
 0x76b   :  { %3914 = vmatpush.msrb.mxu2 %v4618_v51 }
 0x76c   :  { %3875 = vmatpush.msrb.mxu3 %v7315_v40 }
 0x76d   :  { %3915 = vmatpush.msrb.mxu2 %v4617_v10 }
 0x76e   :  { %3876 = vmatpush.msrb.mxu3 %v7312_v59 }
 0x76f   :  { %3916 = vmatpush.msrb.mxu2 %v4616_v57 }
 0x770   :  { %3877 = vmatpush.msrb.mxu3 %v7309_v56 }
 0x771   :  { %3917 = vmatpush.msrb.mxu2 %v4615_v27  ;;  %v4694_v27 = vld [vmem:[%s7814_s10] ss:$0 sm:$0xff] }
 0x772   :  { %3878 = vmatpush.msrb.mxu3 %v7306_v23 }
 0x773   :  { %3918 = vmatpush.msrb.mxu2 %v4614_v36 }
 0x774   :  { %3879 = vmatpush.msrb.mxu3 %v7303_v24 }
 0x775   :  { %4630 = vmatpush.msk.msra.mxu2 %vm2069_vm6, %v7327_v25 }
 0x776   :  { %3880 = vmatpush.msrb.mxu3 %v7300_v6 }
 0x777   :  { %3930 = vmatpush.msra.mxu2 %v7330_v7 }
 0x779   :  { %3931 = vmatpush.msra.mxu2 %v7339_v41 }
 0x77b   :  { %3932 = vmatpush.msra.mxu2 %v7345_v20 }
 0x77d   :  { %3933 = vmatpush.msra.mxu2 %v7351_v44 }
 0x77f   :  { %3934 = vmatpush.msra.mxu2 %v7357_v34 }
 0x781   :  { %3935 = vmatpush.msra.mxu2 %v7363_v15 }
 0x783   :  { %3936 = vmatpush.msra.mxu2 %v7369_v48 }
 0x785   :  { %3937 = vmatpush.msra.mxu2 %v7324_v29 }
 0x787   :  { %3938 = vmatpush.msra.mxu2 %v7318_v39 }
 0x789   :  { %3939 = vmatpush.msra.mxu2 %v7315_v40 }
 0x78b   :  { %3940 = vmatpush.msra.mxu2 %v7312_v59 }
 0x78d   :  { %3941 = vmatpush.msra.mxu2 %v7309_v56 }
 0x78f   :  { %3942 = vmatpush.msra.mxu2 %v7306_v23 }
 0x791   :  { %3943 = vmatpush.msra.mxu2 %v7303_v24 }
 0x793   :  { %3944 = vmatpush.msra.mxu2 %v7300_v6 }
 0x7db   :  { %v3770_v19 = vpop.f32.mrf.mxu2 }
 0x7e3   :  { %v3818_v21 = vpop.f32.mrf.mxu2 }
 0x7e4   :  { %4610 = vmatmul.msk.f32.vlgmr.msra.gmra.mxu3 %vm2189_vm8, %v3818_v21 }
 0x7e5   :  { %3969 = vmatpush.msra.mxu3 %v4645_v55 }
 0x7e7   :  { %3970 = vmatpush.msra.mxu3 %v4644_v50 }
 0x7e9   :  { %3971 = vmatpush.msra.mxu3 %v4643_v43 }
 0x7eb   :  { %3972 = vmatpush.msra.mxu3 %v4642_v3 }
 0x7ec   :  { %4613 = vmatmul.msk.f32.vlgmr.msrb.gmra.mxu3 %vm3669_vm11, %v4611_v60 }
 0x7ed   :  { %3973 = vmatpush.msra.mxu3 %v4641_v4 }
 0x7ef   :  { %3974 = vmatpush.msra.mxu3 %v4640_v8 }
 0x7f1   :  { %3975 = vmatpush.msra.mxu3 %v4639_v62 }
 0x7f3   :  { %3976 = vmatpush.msra.mxu3 %v4638_v22 }
 0x7f5   :  { %3977 = vmatpush.msra.mxu3 %v4637_v58 }
 0x7f7   :  { %3978 = vmatpush.msra.mxu3 %v4636_v18 }
 0x7f9   :  { %3979 = vmatpush.msra.mxu3 %v4635_v46 }
 0x7fb   :  { %3980 = vmatpush.msra.mxu3 %v4634_v61 }
 0x7fd   :  { %3981 = vmatpush.msra.mxu3 %v4633_v17 }
 0x7ff   :  { %3982 = vmatpush.msra.mxu3 %v4632_v38 }
 0x801   :  { %4666 = vmatpush.msk.msrb.mxu3 %vm2069_vm6, %v7327_v25  ;;  %v4647_v25 = vld [vmem:[%s7812_s8 + $0x28] sm:$0xff] }
 0x802   :  { %4649 = vmatmul.msk.f32.vlgmr.msra.gmra.mxu0 %vm3669_vm11, %v4647_v25 }
 0x803   :  { %4058 = vmatpush.msrb.mxu3 %v7330_v7 }
 0x805   :  { %4059 = vmatpush.msrb.mxu3 %v7339_v41 }
 0x807   :  { %4060 = vmatpush.msrb.mxu3 %v7345_v20  ;;  %v4629_v20 = vld [vmem:[%s7812_s8 + $0x20] sm:$0xff] }
 0x809   :  { %4061 = vmatpush.msrb.mxu3 %v7351_v44  ;;  %v4658_v44 = vld [vmem:[%s7813_s9 + $0x270] sm:$0xff] }
 0x80b   :  { %4062 = vmatpush.msrb.mxu3 %v7357_v34  ;;  %v4657_v34 = vld [vmem:[%s7813_s9 + $0x268] sm:$0xff] }
 0x80d   :  { %4063 = vmatpush.msrb.mxu3 %v7363_v15  ;;  %v4656_v15 = vld [vmem:[%s7813_s9 + $0x260] sm:$0xff] }
 0x80f   :  { %4064 = vmatpush.msrb.mxu3 %v7369_v48  ;;  %v4655_v48 = vld [vmem:[%s7813_s9 + $0x258] sm:$0xff] }
 0x811   :  { %4065 = vmatpush.msrb.mxu3 %v7324_v29 }
 0x813   :  { %4066 = vmatpush.msrb.mxu3 %v7318_v39  ;;  %v4663_v39 = vld [vmem:[%s7813_s9 + $0x298] sm:$0xff] }
 0x814   :  { %4033 = vmatpush.msra.mxu1 %v4663_v39 }
 0x815   :  { %4067 = vmatpush.msrb.mxu3 %v7315_v40 }
 0x817   :  { %4068 = vmatpush.msrb.mxu3 %v7312_v59  ;;  %v4662_v59 = vld [vmem:[%s7813_s9 + $0x290] sm:$0xff] }
 0x818   :  { %4034 = vmatpush.msra.mxu1 %v4662_v59 }
 0x819   :  { %4069 = vmatpush.msrb.mxu3 %v7309_v56  ;;  %v3793_v56 = vpop.f32.mrf.mxu3 }
 0x81a   :  { %v3794_v40 = vadd.f32 %v3793_v56, %v3770_v19 }
 0x81b   :  { %4070 = vmatpush.msrb.mxu3 %v7306_v23  ;;  %v4659_v23 = vld [vmem:[%s7813_s9 + $0x278] sm:$0xff] }
 0x81d   :  { %4071 = vmatpush.msrb.mxu3 %v7303_v24  ;;  %v4661_v24 = vld [vmem:[%s7813_s9 + $0x288] sm:$0xff] }
 0x81e   :  { %4035 = vmatpush.msra.mxu1 %v4661_v24 }
 0x81f   :  { %4072 = vmatpush.msrb.mxu3 %v7300_v6  ;;  %v4660_v6 = vld [vmem:[%s7813_s9 + $0x280] sm:$0xff] }
 0x820   :  { %4036 = vmatpush.msra.mxu1 %v4660_v6 }
 0x822   :  { %4037 = vmatpush.msra.mxu1 %v4659_v23 }
 0x824   :  { %4038 = vmatpush.msra.mxu1 %v4658_v44 }
 0x826   :  { %4039 = vmatpush.msra.mxu1 %v4657_v34 }
 0x828   :  { %4040 = vmatpush.msra.mxu1 %v4656_v15 }
 0x82a   :  { %4041 = vmatpush.msra.mxu1 %v4655_v48 }
 0x82c   :  { %4042 = vmatpush.msra.mxu1 %v4654_v63 }
 0x82e   :  { %4043 = vmatpush.msra.mxu1 %v4653_v53 }
 0x830   :  { %4044 = vmatpush.msra.mxu1 %v4652_v2 }
 0x832   :  { %4045 = vmatpush.msra.mxu1 %v4651_v30 }
 0x834   :  { %4046 = vmatpush.msra.mxu1 %v4650_v9 }
 0x867   :  { %v3856_v29 = vpop.f32.mrf.mxu3 }
 0x868   :  { %v3859_v7 = vadd.f32 %v3856_v29, %v3794_v40 }
 0x86f   :  { %v3882_v41 = vpop.f32.mrf.mxu3 }
 0x870   :  { %4628 = vmatmul.msk.f32.vlgmr.msrb.gmra.mxu2 %vm2189_vm8, %v3882_v41 }
 0x871   :  { %4097 = vmatpush.msrb.mxu2 %v4681_v32 }
 0x873   :  { %4098 = vmatpush.msrb.mxu2 %v4680_v26 }
 0x875   :  { %4099 = vmatpush.msrb.mxu2 %v4679_v49 }
 0x877   :  { %4100 = vmatpush.msrb.mxu2 %v4678_v52 }
 0x878   :  { %4631 = vmatmul.msk.f32.vlgmr.msra.gmra.mxu2 %vm3669_vm11, %v4629_v20 }
 0x879   :  { %4101 = vmatpush.msrb.mxu2 %v4677_v28 }
 0x87b   :  { %4102 = vmatpush.msrb.mxu2 %v4676_v1 }
 0x87d   :  { %4103 = vmatpush.msrb.mxu2 %v4675_v13 }
 0x87f   :  { %v4010_v45 = vpop.f32.mrf.mxu0  ;;  %4104 = vmatpush.msrb.mxu2 %v4674_v14 }
 0x880   :  { %4664 = vmatmul.msk.f32.vlgmr.msra.gmra.mxu1 %vm2189_vm8, %v4010_v45 }
 0x881   :  { %4105 = vmatpush.msrb.mxu2 %v4673_v0 }
 0x883   :  { %4106 = vmatpush.msrb.mxu2 %v4672_v11 }
 0x885   :  { %4107 = vmatpush.msrb.mxu2 %v4671_v37 }
 0x887   :  { %4108 = vmatpush.msrb.mxu2 %v4670_v35 }
 0x889   :  { %4109 = vmatpush.msrb.mxu2 %v4669_v54 }
 0x88b   :  { %4110 = vmatpush.msrb.mxu2 %v4668_v33 }
 0x8f3   :  { %v3920_v12 = vpop.f32.mrf.mxu2 }
 0x8f4   :  { %v3923_v31 = vadd.f32 %v3920_v12, %v3859_v7 }
 0x8fb   :  { %v3946_v16 = vpop.f32.mrf.mxu2 }
 0x8fc   :  { %4646 = vmatmul.msk.f32.vlgmr.msra.gmra.mxu3 %vm2189_vm8, %v3946_v16 }
 0x8fd   :  { %v4048_v10 = vpop.f32.mrf.mxu1 }
 0x904   :  { %4667 = vmatmul.msk.f32.vlgmr.msrb.gmra.mxu3 %vm3669_vm11, %v4665_v42 }
 0x97f   :  { %v3984_v47 = vpop.f32.mrf.mxu3 }
 0x980   :  { %v3987_v5 = vadd.f32 %v3984_v47, %v3923_v31 }
 0x982   :  { %v4051_v57 = vadd.f32 %v4048_v10, %v3987_v5 }
 0x987   :  { %v4074_v51 = vpop.f32.mrf.mxu3 }
 0x988   :  { %4682 = vmatmul.msk.f32.vlgmr.msrb.gmra.mxu2 %vm2189_vm8, %v4074_v51 }
 0xa0b   :  { %v4112_v36 = vpop.f32.mrf.mxu2 }
 0xa0c   :  { %v4115_v19 = vadd.f32 %v4112_v36, %v4051_v57 }
 0xa0e   :  { %v4120_v55 = vadd.f32 %v4694_v27, %v4115_v19 }
 0xa10   :  { %4122 = vst.msk [vmem:[%s7815_s11] sm:$0xff] %vm4121_vm12, %v4120_v55 }

</bundles_post_ra>
